<compile_context>
chip_gen: v7x
topology: tpu7x:2x2x1
jax: 0.10.0
libtpu: 0.0.40
codegen_flags: <defaults>
</compile_context>

<pallas_src>
import functools

import jax
import jax.numpy as jnp
from jax import lax
from jax.experimental import pallas as pl
from jax.experimental.pallas import tpu as pltpu


# ----------------------------------------------------------------------------
# 1-D align_corners=True bilinear interpolation matrix (out_size, in_size),
# matching nn.UpsamplingBilinear2d.
# ----------------------------------------------------------------------------
def _bilinear_matrix(in_size, out_size):
    if out_size == 1:
        return jnp.zeros((1, in_size), jnp.float32).at[0, 0].set(1.0)
    src = (jnp.arange(out_size, dtype=jnp.float32)
           * (in_size - 1) / (out_size - 1))
    i0 = jnp.clip(jnp.floor(src).astype(jnp.int32), 0, in_size - 1)
    i1 = jnp.minimum(i0 + 1, in_size - 1)
    frac = src - i0.astype(jnp.float32)
    rows = jnp.arange(out_size)
    A = jnp.zeros((out_size, in_size), jnp.float32)
    A = A.at[rows, i0].add(1.0 - frac)
    A = A.at[rows, i1].add(frac)
    return A


# ----------------------------------------------------------------------------
# Fused kernel: one image per grid step.
#   x3_ref  : ((H+2)*W, 3*Cin) bf16   h-padded, dx-pre-shifted input (wrapper plumbing)
#   wf_ref  : (9*Cin, 9)       bf16   conv1 weights folded with conv2's channel vector
#   sel_ref : (9, 9)           f32    identity (tap selector, mirrors proven pattern)
#   cws_ref : (3W, 4W)         bf16   stacked  (conv2 dx-tap ∘ up1 ∘ up2)  column operator
#   chs_ref : (4H, 3H)         bf16   stacked  (conv2 dy-tap ∘ up1 ∘ up2)  row operator
#   bias_ref: (4H, 4W)         f32    exact affine offset (b1 through conv2, + b2)
# ----------------------------------------------------------------------------
def _trimap_fused_kernel(x3_ref, wf_ref, sel_ref, cws_ref, chs_ref, bias_ref,
                         o_ref, *, H, W, Cin):
    f32 = jnp.float32
    bf16 = jnp.bfloat16
    HW = H * W
    K = 3 * Cin

    # ---- folded conv (conv1 ∘ conv2-channel-contraction): 3 aligned matmuls ----
    # every slab read is an aligned, lane-dense ref slice (offsets dy*W, W%8==0).
    acc = jnp.zeros((HW, 9), f32)
    for dy in range(3):
        slab = x3_ref[dy * W: dy * W + HW, :]                     # (HW, 3*Cin) bf16
        acc = acc + jnp.dot(slab, wf_ref[dy * K: (dy + 1) * K, :],
                            preferred_element_type=f32)

    # ---- arrange the 9 tap maps into the (3H, 3W) block layout ----
    gc = acc.reshape(H, W, 9)                                      # cheap leading-split
    row_blocks = []
    for dy2 in range(3):
        t0 = 3 * dy2
        taps = [jnp.sum(gc * sel_ref[t0 + dx2: t0 + dx2 + 1, :], axis=-1)  # (H, W)
                for dx2 in range(3)]
        row_blocks.append(jnp.concatenate(taps, axis=1))           # (H, 3W)
    g_all = jnp.concatenate(row_blocks, axis=0).astype(bf16)       # (3H, 3W)

    # ---- conv2 3x3 window + both x2 bilinear upsamples: two stacked matmuls ----
    t1 = jnp.dot(g_all, cws_ref[...], preferred_element_type=f32)              # (3H, 4W)
    out = jnp.dot(chs_ref[...], t1.astype(bf16), preferred_element_type=f32)   # (4H, 4W)

    o_ref[...] = (out + bias_ref[...]).astype(o_ref.dtype)


# ----------------------------------------------------------------------------
# Wrapper: NCHW in, NCHW out (like the PyTorch module).
# ----------------------------------------------------------------------------
def trimapnet_forward(x_nchw, params):
    N, Cin, H, W = x_nchw.shape
    Cmid = params["b1"].shape[0]                                   # 64
    f32 = jnp.float32
    bf16 = jnp.bfloat16

    # ---- input layout plumbing: zero-pad + dx-im2col, flattened over (h_pad, w) ----
    x = jnp.transpose(x_nchw, (0, 2, 3, 1)).astype(f32)            # NHWC
    xp = jnp.pad(x, ((0, 0), (1, 1), (1, 1), (0, 0)))              # conv1 padding=1
    x3 = jnp.concatenate(
        [xp[:, :, dx:dx + W, :].reshape(N, (H + 2) * W, Cin) for dx in range(3)],
        axis=-1).astype(bf16)                                      # (N, (H+2)*W, 3*Cin)

    # ---- fold conv2's (64->1) channel contraction into conv1's weights (exact) ----
    w2flat = params["w2"].reshape(9, Cmid).astype(f32)             # (9, 64), t = 3*dy2+dx2
    wfold = jnp.einsum("yxic,tc->yxit", params["w1"].astype(f32), w2flat)
    wf = wfold.reshape(9 * Cin, 9).astype(bf16)                    # (9*Cin, 9)

    # ---- fold conv2's window + up1 + up2 into two stacked operators ----
    bh1 = _bilinear_matrix(H, 2 * H)                               # (2H, H)
    bw1 = _bilinear_matrix(W, 2 * W)                               # (2W, W)
    # zero border rows encode conv2's padding=1 applied to the upsampled map
    ah1p = jnp.zeros((2 * H + 2, H), f32).at[1:2 * H + 1].set(bh1)
    aw1p = jnp.zeros((2 * W + 2, W), f32).at[1:2 * W + 1].set(bw1)
    ah2 = _bilinear_matrix(2 * H, 4 * H)                           # (4H, 2H)
    aw2 = _bilinear_matrix(2 * W, 4 * W)                           # (4W, 2W)
    chs = jnp.concatenate([ah2 @ ah1p[d:d + 2 * H] for d in range(3)], axis=1)      # (4H, 3H)
    cws = jnp.concatenate([(aw2 @ aw1p[d:d + 2 * W]).T for d in range(3)], axis=0)  # (3W, 4W)

    # ---- exact affine offset of the whole (linear) network ----
    b1w2 = w2flat @ params["b1"].astype(f32)                       # (9,)
    gb = jnp.repeat(jnp.repeat(b1w2.reshape(3, 3), H, axis=0), W, axis=1)  # (3H, 3W)
    out_bias = params["b2"].reshape(1, 1).astype(f32) + chs @ gb @ cws     # (4H, 4W)

    sel = jnp.eye(9, dtype=f32)

    kern = functools.partial(_trimap_fused_kernel, H=H, W=W, Cin=Cin)

    flops = 2 * N * (H * W) * (9 * Cin) * 9                        # folded conv
    flops += 2 * N * (3 * H * 3 * W * 4 * W + 4 * H * 3 * H * 4 * W)  # stacked combine
    bytes_accessed = (x3.size * 2 + wf.size * 2
                      + (sel.size + out_bias.size) * 4 + (cws.size + chs.size) * 2
                      + N * 16 * H * W * 4)

    out = pl.pallas_call(
        kern,
        out_shape=jax.ShapeDtypeStruct((N, 4 * H, 4 * W), f32),
        grid_spec=pltpu.PrefetchScalarGridSpec(
            num_scalar_prefetch=0,
            grid=(N,),
            in_specs=[
                pl.BlockSpec((pl.Squeezed(), (H + 2) * W, 3 * Cin),
                             lambda n: (n, 0, 0)),
                pl.BlockSpec((9 * Cin, 9), lambda n: (0, 0)),
                pl.BlockSpec((9, 9), lambda n: (0, 0)),
                pl.BlockSpec((3 * W, 4 * W), lambda n: (0, 0)),
                pl.BlockSpec((4 * H, 3 * H), lambda n: (0, 0)),
                pl.BlockSpec((4 * H, 4 * W), lambda n: (0, 0)),
            ],
            out_specs=pl.BlockSpec((pl.Squeezed(), 4 * H, 4 * W),
                                   lambda n: (n, 0, 0)),
        ),
        compiler_params=pltpu.CompilerParams(
            dimension_semantics=("parallel",)),
        cost_estimate=pl.CostEstimate(flops=int(flops), transcendentals=0,
                                      bytes_accessed=int(bytes_accessed)),
    )(x3, wf, sel, cws.astype(bf16), chs.astype(bf16), out_bias)

    return out.reshape(N, 1, 4 * H, 4 * W)


# ----------------------------------------------------------------------------
# Parameters (PyTorch layout transposed to HWIO) and a plain-XLA reference.
# ----------------------------------------------------------------------------
def init_params(key, in_dim=128):
    k1, k2, k3, k4 = jax.random.split(key, 4)
    w1 = jax.random.normal(k1, (64, in_dim, 3, 3), jnp.float32) * 0.05
    b1 = jax.random.normal(k2, (64,), jnp.float32) * 0.05
    w2 = jax.random.normal(k3, (1, 64, 3, 3), jnp.float32) * 0.05
    b2 = jax.random.normal(k4, (1,), jnp.float32) * 0.05
    return {
        "w1": jnp.transpose(w1, (2, 3, 1, 0)), "b1": b1,   # HWIO (3,3,Cin,64)
        "w2": jnp.transpose(w2, (2, 3, 1, 0)), "b2": b2,   # HWIO (3,3,64,1)
    }


def _reference_forward(x_nchw, params):
    hi = lax.Precision.HIGHEST
    x = jnp.transpose(x_nchw, (0, 2, 3, 1))

    def conv(v, w, b):
        y = lax.conv_general_dilated(v, w, (1, 1), ((1, 1), (1, 1)),
                                     dimension_numbers=("NHWC", "HWIO", "NHWC"),
                                     precision=hi)
        return y + b

    def up2x(v):
        n, h, w, c = v.shape
        ah = _bilinear_matrix(h, 2 * h)
        aw = _bilinear_matrix(w, 2 * w)
        y = jnp.einsum("ph,nhwc->npwc", ah, v, precision=hi)
        y = jnp.einsum("qw,npwc->npqc", aw, y, precision=hi)
        return y

    y = conv(x, params["w1"], params["b1"])
    y = up2x(y)
    y = conv(y, params["w2"], params["b2"])
    y = up2x(y)
    return jnp.transpose(y, (0, 3, 1, 2))


if __name__ == "__main__":
    N, IN_DIM, H, W = 2, 128, 16, 16
    key = jax.random.PRNGKey(0)
    kx, kp = jax.random.split(key)
    x = jax.random.normal(kx, (N, IN_DIM, H, W), jnp.float32)
    params = init_params(kp, in_dim=IN_DIM)

    out = jax.jit(trimapnet_forward)(x, params)
    out = jax.block_until_ready(out)

    assert out.shape == (N, 1, 4 * H, 4 * W), out.shape
    assert bool(jnp.all(jnp.isfinite(out)))

    # correctness vs plain-XLA reference (loose tol: matmul operands run in bf16 on MXU)
    ref = _reference_forward(x, params)
    max_err = float(jnp.max(jnp.abs(out - ref)))
    assert max_err < 1e-1, f"max abs err {max_err}"

    print("KERNEL_OK")
</pallas_src>

<mosaic_0001>
module attributes {stable_mosaic.version = 11 : i64} {
  func.func private @main(%arg0: i32) attributes {dimension_semantics = [#tpu.dimension_semantics<core_parallel>], iteration_bounds = array<i64: 2>, tpu.core_type = #tpu.core_type<sc_scalar_subcore>, window_params = []} {
    return
  }
}

module attributes {stable_mosaic.version = 11 : i64} {
  func.func private @main(%arg0: i32) attributes {dimension_semantics = [#tpu.dimension_semantics<core_parallel>], iteration_bounds = array<i64: 2>, tpu.core_type = #tpu.core_type<sc_scalar_subcore>, window_params = []} {
    return
  }
}

module attributes {stable_mosaic.version = 11 : i64} {
  func.func @_trimap_fused_kernel(%arg0: i32, %arg1: memref<1x288x384xbf16, #tpu.memory_space<vmem>>, %arg2: memref<1152x9xbf16, #tpu.memory_space<vmem>>, %arg3: memref<9x9xf32, #tpu.memory_space<vmem>>, %arg4: memref<48x64xbf16, #tpu.memory_space<vmem>>, %arg5: memref<64x48xbf16, #tpu.memory_space<vmem>>, %arg6: memref<64x64xf32, #tpu.memory_space<vmem>>, %arg7: memref<1x64x64xf32, #tpu.memory_space<vmem>>) attributes {dimension_semantics = [#tpu.dimension_semantics<parallel>], iteration_bounds = array<i64: 2>, scalar_prefetch = 0 : i64, scratch_operands = 0 : i64, tpu.core_type = #tpu.core_type<tc>, window_params = [{transform_indices = @transform_0, window_bounds = array<i64: 1, 288, 384>}, {pipeline_mode = #tpu.pipeline_mode<synchronous>, transform_indices = @transform_1, window_bounds = array<i64: 1152, 9>}, {pipeline_mode = #tpu.pipeline_mode<synchronous>, transform_indices = @transform_2, window_bounds = array<i64: 9, 9>}, {pipeline_mode = #tpu.pipeline_mode<synchronous>, transform_indices = @transform_3, window_bounds = array<i64: 48, 64>}, {pipeline_mode = #tpu.pipeline_mode<synchronous>, transform_indices = @transform_4, window_bounds = array<i64: 64, 48>}, {pipeline_mode = #tpu.pipeline_mode<synchronous>, transform_indices = @transform_5, window_bounds = array<i64: 64, 64>}, {transform_indices = @transform_6, window_bounds = array<i64: 1, 64, 64>}]} {
    %cst = arith.constant 0.000000e+00 : f32
    %0 = vector.broadcast %cst : f32 to vector<256x9xf32>
    %c0 = arith.constant 0 : index
    %c0_0 = arith.constant 0 : index
    %c0_1 = arith.constant 0 : index
    %1 = vector.load %arg1[%c0, %c0_0, %c0_1] : memref<1x288x384xbf16, #tpu.memory_space<vmem>>, vector<1x256x384xbf16>
    %2 = vector.shape_cast %1 : vector<1x256x384xbf16> to vector<256x384xbf16>
    %c0_2 = arith.constant 0 : index
    %c0_3 = arith.constant 0 : index
    %3 = vector.load %arg2[%c0_2, %c0_3] : memref<1152x9xbf16, #tpu.memory_space<vmem>>, vector<384x9xbf16>
    %cst_4 = arith.constant dense<0.000000e+00> : vector<256x9xf32>
    %4 = tpu.matmul %2, %3, %cst_4 {dimension_numbers = #tpu.dot_dimension_numbers<[1], [0], [0], [1], [0, 0, 1, 1], [], []>} : vector<256x384xbf16>, vector<384x9xbf16>, vector<256x9xf32> -> vector<256x9xf32>
    %5 = arith.addf %0, %4 : vector<256x9xf32>
    %c0_5 = arith.constant 0 : index
    %c16 = arith.constant 16 : index
    %c0_6 = arith.constant 0 : index
    %6 = vector.load %arg1[%c0_5, %c16, %c0_6] : memref<1x288x384xbf16, #tpu.memory_space<vmem>>, vector<1x256x384xbf16>
    %7 = vector.shape_cast %6 : vector<1x256x384xbf16> to vector<256x384xbf16>
    %c384 = arith.constant 384 : index
    %c0_7 = arith.constant 0 : index
    %8 = vector.load %arg2[%c384, %c0_7] : memref<1152x9xbf16, #tpu.memory_space<vmem>>, vector<384x9xbf16>
    %cst_8 = arith.constant dense<0.000000e+00> : vector<256x9xf32>
    %9 = tpu.matmul %7, %8, %cst_8 {dimension_numbers = #tpu.dot_dimension_numbers<[1], [0], [0], [1], [0, 0, 1, 1], [], []>} : vector<256x384xbf16>, vector<384x9xbf16>, vector<256x9xf32> -> vector<256x9xf32>
    %10 = arith.addf %5, %9 : vector<256x9xf32>
    %c0_9 = arith.constant 0 : index
    %c32 = arith.constant 32 : index
    %c0_10 = arith.constant 0 : index
    %11 = vector.load %arg1[%c0_9, %c32, %c0_10] : memref<1x288x384xbf16, #tpu.memory_space<vmem>>, vector<1x256x384xbf16>
    %12 = vector.shape_cast %11 : vector<1x256x384xbf16> to vector<256x384xbf16>
    %c768 = arith.constant 768 : index
    %c0_11 = arith.constant 0 : index
    %13 = vector.load %arg2[%c768, %c0_11] : memref<1152x9xbf16, #tpu.memory_space<vmem>>, vector<384x9xbf16>
    %cst_12 = arith.constant dense<0.000000e+00> : vector<256x9xf32>
    %14 = tpu.matmul %12, %13, %cst_12 {dimension_numbers = #tpu.dot_dimension_numbers<[1], [0], [0], [1], [0, 0, 1, 1], [], []>} : vector<256x384xbf16>, vector<384x9xbf16>, vector<256x9xf32> -> vector<256x9xf32>
    %15 = arith.addf %10, %14 : vector<256x9xf32>
    %16 = vector.shape_cast %15 : vector<256x9xf32> to vector<16x16x9xf32>
    %c0_13 = arith.constant 0 : index
    %c0_14 = arith.constant 0 : index
    %17 = vector.load %arg3[%c0_13, %c0_14] : memref<9x9xf32, #tpu.memory_space<vmem>>, vector<1x9xf32>
    %18 = vector.shape_cast %17 : vector<1x9xf32> to vector<1x1x9xf32>
    %19 = vector.broadcast %18 : vector<1x1x9xf32> to vector<16x16x9xf32>
    %20 = arith.mulf %16, %19 : vector<16x16x9xf32>
    %cst_15 = arith.constant dense<0.000000e+00> : vector<16x16xf32>
    %21 = vector.multi_reduction <add>, %20, %cst_15 [2] : vector<16x16x9xf32> to vector<16x16xf32>
    %c1 = arith.constant 1 : index
    %c0_16 = arith.constant 0 : index
    %22 = vector.load %arg3[%c1, %c0_16] : memref<9x9xf32, #tpu.memory_space<vmem>>, vector<1x9xf32>
    %23 = vector.shape_cast %22 : vector<1x9xf32> to vector<1x1x9xf32>
    %24 = vector.broadcast %23 : vector<1x1x9xf32> to vector<16x16x9xf32>
    %25 = arith.mulf %16, %24 : vector<16x16x9xf32>
    %cst_17 = arith.constant dense<0.000000e+00> : vector<16x16xf32>
    %26 = vector.multi_reduction <add>, %25, %cst_17 [2] : vector<16x16x9xf32> to vector<16x16xf32>
    %c2 = arith.constant 2 : index
    %c0_18 = arith.constant 0 : index
    %27 = vector.load %arg3[%c2, %c0_18] : memref<9x9xf32, #tpu.memory_space<vmem>>, vector<1x9xf32>
    %28 = vector.shape_cast %27 : vector<1x9xf32> to vector<1x1x9xf32>
    %29 = vector.broadcast %28 : vector<1x1x9xf32> to vector<16x16x9xf32>
    %30 = arith.mulf %16, %29 : vector<16x16x9xf32>
    %cst_19 = arith.constant dense<0.000000e+00> : vector<16x16xf32>
    %31 = vector.multi_reduction <add>, %30, %cst_19 [2] : vector<16x16x9xf32> to vector<16x16xf32>
    %32 = tpu.concatenate %21, %26, %31 in 1 : vector<16x16xf32>, vector<16x16xf32>, vector<16x16xf32> -> vector<16x48xf32>
    %c3 = arith.constant 3 : index
    %c0_20 = arith.constant 0 : index
    %33 = vector.load %arg3[%c3, %c0_20] : memref<9x9xf32, #tpu.memory_space<vmem>>, vector<1x9xf32>
    %34 = vector.shape_cast %33 : vector<1x9xf32> to vector<1x1x9xf32>
    %35 = vector.broadcast %34 : vector<1x1x9xf32> to vector<16x16x9xf32>
    %36 = arith.mulf %16, %35 : vector<16x16x9xf32>
    %cst_21 = arith.constant dense<0.000000e+00> : vector<16x16xf32>
    %37 = vector.multi_reduction <add>, %36, %cst_21 [2] : vector<16x16x9xf32> to vector<16x16xf32>
    %c4 = arith.constant 4 : index
    %c0_22 = arith.constant 0 : index
    %38 = vector.load %arg3[%c4, %c0_22] : memref<9x9xf32, #tpu.memory_space<vmem>>, vector<1x9xf32>
    %39 = vector.shape_cast %38 : vector<1x9xf32> to vector<1x1x9xf32>
    %40 = vector.broadcast %39 : vector<1x1x9xf32> to vector<16x16x9xf32>
    %41 = arith.mulf %16, %40 : vector<16x16x9xf32>
    %cst_23 = arith.constant dense<0.000000e+00> : vector<16x16xf32>
    %42 = vector.multi_reduction <add>, %41, %cst_23 [2] : vector<16x16x9xf32> to vector<16x16xf32>
    %c5 = arith.constant 5 : index
    %c0_24 = arith.constant 0 : index
    %43 = vector.load %arg3[%c5, %c0_24] : memref<9x9xf32, #tpu.memory_space<vmem>>, vector<1x9xf32>
    %44 = vector.shape_cast %43 : vector<1x9xf32> to vector<1x1x9xf32>
    %45 = vector.broadcast %44 : vector<1x1x9xf32> to vector<16x16x9xf32>
    %46 = arith.mulf %16, %45 : vector<16x16x9xf32>
    %cst_25 = arith.constant dense<0.000000e+00> : vector<16x16xf32>
    %47 = vector.multi_reduction <add>, %46, %cst_25 [2] : vector<16x16x9xf32> to vector<16x16xf32>
    %48 = tpu.concatenate %37, %42, %47 in 1 : vector<16x16xf32>, vector<16x16xf32>, vector<16x16xf32> -> vector<16x48xf32>
    %c6 = arith.constant 6 : index
    %c0_26 = arith.constant 0 : index
    %49 = vector.load %arg3[%c6, %c0_26] : memref<9x9xf32, #tpu.memory_space<vmem>>, vector<1x9xf32>
    %50 = vector.shape_cast %49 : vector<1x9xf32> to vector<1x1x9xf32>
    %51 = vector.broadcast %50 : vector<1x1x9xf32> to vector<16x16x9xf32>
    %52 = arith.mulf %16, %51 : vector<16x16x9xf32>
    %cst_27 = arith.constant dense<0.000000e+00> : vector<16x16xf32>
    %53 = vector.multi_reduction <add>, %52, %cst_27 [2] : vector<16x16x9xf32> to vector<16x16xf32>
    %c7 = arith.constant 7 : index
    %c0_28 = arith.constant 0 : index
    %54 = vector.load %arg3[%c7, %c0_28] : memref<9x9xf32, #tpu.memory_space<vmem>>, vector<1x9xf32>
    %55 = vector.shape_cast %54 : vector<1x9xf32> to vector<1x1x9xf32>
    %56 = vector.broadcast %55 : vector<1x1x9xf32> to vector<16x16x9xf32>
    %57 = arith.mulf %16, %56 : vector<16x16x9xf32>
    %cst_29 = arith.constant dense<0.000000e+00> : vector<16x16xf32>
    %58 = vector.multi_reduction <add>, %57, %cst_29 [2] : vector<16x16x9xf32> to vector<16x16xf32>
    %c8 = arith.constant 8 : index
    %c0_30 = arith.constant 0 : index
    %59 = vector.load %arg3[%c8, %c0_30] : memref<9x9xf32, #tpu.memory_space<vmem>>, vector<1x9xf32>
    %60 = vector.shape_cast %59 : vector<1x9xf32> to vector<1x1x9xf32>
    %61 = vector.broadcast %60 : vector<1x1x9xf32> to vector<16x16x9xf32>
    %62 = arith.mulf %16, %61 : vector<16x16x9xf32>
    %cst_31 = arith.constant dense<0.000000e+00> : vector<16x16xf32>
    %63 = vector.multi_reduction <add>, %62, %cst_31 [2] : vector<16x16x9xf32> to vector<16x16xf32>
    %64 = tpu.concatenate %53, %58, %63 in 1 : vector<16x16xf32>, vector<16x16xf32>, vector<16x16xf32> -> vector<16x48xf32>
    %65 = tpu.concatenate %32, %48, %64 in 0 : vector<16x48xf32>, vector<16x48xf32>, vector<16x48xf32> -> vector<48x48xf32>
    %66 = arith.truncf %65 : vector<48x48xf32> to vector<48x48xbf16>
    %c0_32 = arith.constant 0 : index
    %c0_33 = arith.constant 0 : index
    %67 = vector.load %arg4[%c0_32, %c0_33] : memref<48x64xbf16, #tpu.memory_space<vmem>>, vector<48x64xbf16>
    %cst_34 = arith.constant dense<0.000000e+00> : vector<48x64xf32>
    %68 = tpu.matmul %66, %67, %cst_34 {dimension_numbers = #tpu.dot_dimension_numbers<[1], [0], [0], [1], [0, 0, 1, 1], [], []>} : vector<48x48xbf16>, vector<48x64xbf16>, vector<48x64xf32> -> vector<48x64xf32>
    %c0_35 = arith.constant 0 : index
    %c0_36 = arith.constant 0 : index
    %69 = vector.load %arg5[%c0_35, %c0_36] : memref<64x48xbf16, #tpu.memory_space<vmem>>, vector<64x48xbf16>
    %70 = arith.truncf %68 : vector<48x64xf32> to vector<48x64xbf16>
    %cst_37 = arith.constant dense<0.000000e+00> : vector<64x64xf32>
    %71 = tpu.matmul %69, %70, %cst_37 {dimension_numbers = #tpu.dot_dimension_numbers<[1], [0], [0], [1], [0, 0, 1, 1], [], []>} : vector<64x48xbf16>, vector<48x64xbf16>, vector<64x64xf32> -> vector<64x64xf32>
    %c0_38 = arith.constant 0 : index
    %c0_39 = arith.constant 0 : index
    %72 = vector.load %arg6[%c0_38, %c0_39] : memref<64x64xf32, #tpu.memory_space<vmem>>, vector<64x64xf32>
    %73 = arith.addf %71, %72 : vector<64x64xf32>
    %c0_40 = arith.constant 0 : index
    %c0_41 = arith.constant 0 : index
    %c0_42 = arith.constant 0 : index
    %74 = vector.load %arg7[%c0_40, %c0_41, %c0_42] : memref<1x64x64xf32, #tpu.memory_space<vmem>>, vector<1x64x64xf32>
    %75 = vector.shape_cast %74 : vector<1x64x64xf32> to vector<64x64xf32>
    %76 = vector.shape_cast %73 : vector<64x64xf32> to vector<1x64x64xf32>
    tpu.vector_store %arg7[%c0_40, %c0_41, %c0_42], %76 {strides = array<i32>} : memref<1x64x64xf32, #tpu.memory_space<vmem>>, vector<1x64x64xf32>,
    return
  }
  func.func @transform_0(%arg0: i32) -> (i32, i32, i32) {
    %c0_i32 = arith.constant 0 : i32
    %c0_i32_0 = arith.constant 0 : i32
    %c0_i32_1 = arith.constant 0 : i32
    return %arg0, %c0_i32, %c0_i32_0 : i32, i32, i32
  }
  func.func @transform_1(%arg0: i32) -> (i32, i32) {
    %c0_i32 = arith.constant 0 : i32
    %c0_i32_0 = arith.constant 0 : i32
    %c0_i32_1 = arith.constant 0 : i32
    return %c0_i32, %c0_i32_0 : i32, i32
  }
  func.func @transform_2(%arg0: i32) -> (i32, i32) {
    %c0_i32 = arith.constant 0 : i32
    %c0_i32_0 = arith.constant 0 : i32
    %c0_i32_1 = arith.constant 0 : i32
    return %c0_i32, %c0_i32_0 : i32, i32
  }
  func.func @transform_3(%arg0: i32) -> (i32, i32) {
    %c0_i32 = arith.constant 0 : i32
    %c0_i32_0 = arith.constant 0 : i32
    %c0_i32_1 = arith.constant 0 : i32
    return %c0_i32, %c0_i32_0 : i32, i32
  }
  func.func @transform_4(%arg0: i32) -> (i32, i32) {
    %c0_i32 = arith.constant 0 : i32
    %c0_i32_0 = arith.constant 0 : i32
    %c0_i32_1 = arith.constant 0 : i32
    return %c0_i32, %c0_i32_0 : i32, i32
  }
  func.func @transform_5(%arg0: i32) -> (i32, i32) {
    %c0_i32 = arith.constant 0 : i32
    %c0_i32_0 = arith.constant 0 : i32
    %c0_i32_1 = arith.constant 0 : i32
    return %c0_i32, %c0_i32_0 : i32, i32
  }
  func.func @transform_6(%arg0: i32) -> (i32, i32, i32) {
    %c0_i32 = arith.constant 0 : i32
    %c0_i32_0 = arith.constant 0 : i32
    %c0_i32_1 = arith.constant 0 : i32
    return %arg0, %c0_i32, %c0_i32_0 : i32, i32, i32
  }
}

</mosaic_0001>

<bundles_post_ra>
// kernel: trimapnet_forward.1
= control target key start
LH: loop header
LB: loop body
LE: loop exit
PB: predicated region body
PF: predicated region fallthrough
CT: control target
= control target key end

     0   :  { %11 = vsyncpa [#allocation3], 0  ;;  %s10020_s0 = inlined_call_operand.vmem [shape: bf16[2,288,384], index: 0, kind: input, shape index: {}]   ;;  %s10021_s1 = inlined_call_operand.vmem [shape: bf16[1152,9], index: 1, kind: input, shape index: {}]   ;;  %s10022_s2 = inlined_call_operand.vmem [shape: f32[9,9], index: 2, kind: input, shape index: {}]   ;;  %s10023_s3 = inlined_call_operand.vmem [shape: bf16[48,64], index: 3, kind: input, shape index: {}]   ;;  %s10024_s4 = inlined_call_operand.vmem [shape: bf16[64,48], index: 4, kind: input, shape index: {}]   ;;  %s10025_s5 = inlined_call_operand.vmem [shape: f32[64,64], index: 5, kind: input, shape index: {}]   ;;  %s10026_s6 = inlined_call_operand.hbm [shape: f32[2,64,64], index: 6, kind: output, shape index: {}]  }
   0x1   :  { %13 = vsyncpa [#allocation3 + $0x1], 0  ;;  %s7048_s21 = smov 0   ;;  %s7050_s22 = smov 0  }
   0x2   :  { %s7052_s23 = smov 0   ;;  %s7054_s24 = smov 0  }
   0x3 LB: > { %s7069_s25 = sadd.s32 4294967295, %s7006_s24   ;;  %s5737_s26 = sadd.s32 4294967294, %s7006_s24   ;;  %s7006_s24 = sphi %s7054_s24, %s10044_s24   ;;  %s7002_s23 = sphi %s7052_s23, %s10043_s23   ;;  %s6998_s22 = sphi %s7050_s22, %s10042_s22   ;;  %s6994_s21 = sphi %s7048_s21, %s10041_s21  }
   0x4   : > { %s7073_s27 = sadd.s32 1, %s7006_s24   ;;  %s157_s28 = sadd.s32 1, %s7002_s23 }
   0x5   : > { %s154_s29 = ssub.s32 %s7006_s24, %s7073_s27  ;;  %p167_p0 = scmp.ne.s32.totalorder %s7002_s23, %s6998_s22 }
   0x6   : > { %p155_p1 = scmp.eq.s32.totalorder %s154_s29, 0  ;;  %p168_p2 = scmp.eq.s32.totalorder %s7069_s25, 1 }
   0x7   : > { %p173_p3 = scmp.ne.s32.totalorder %s6998_s22, %s6994_s21  ;;  %p174_p4 = scmp.eq.s32.totalorder %s5737_s26, 1 }
   0x8   : > { %s7084_s30 = scalar_select %p155_p1, %s7002_s23, %s157_s28  }
   0x9   : > { %p7086_p5 = por %p168_p2, %p167_p0  ;;  %p7090_p6 = por %p174_p4, %p173_p3 }
   0xa   : > { %p5740_p7 = scmp.ge.s32.totalorder %s7006_s24, 1  ;;  %p215_p8 = scmp.lt.s32.totalorder %s7006_s24, 3 }
   0xc   : > { %p216_p9 = pnand %p5740_p7, %p215_p8 }
   0xe   : > { %219 = sbr.rel (%p216_p9) target bundleno = 1709 (0x6ad), region = 44 }
  0x15   : > { %v6760_v0 = vld [vmem:[%s10021_s1 + $0x100] sm:$0xff]   ;;  %v6763_v3 = vld [vmem:[%s10021_s1 + $0x108] sm:$0xff]   ;;  %v6766_v6 = vld [vmem:[%s10021_s1 + $0x110] sm:$0xff]   ;;  %p245_p10 = scmp.lt.s32.totalorder %s7069_s25, 1  ;;  %vm2522_vm0 = vcmask 72704   ;;  %vm2928_vm1 = vcmask 130112  }
  0x16   : > { %v6761_v1 = vld [vmem:[%s10021_s1 + $0x140] sm:$0xff]   ;;  %5943 = vmatprep.subr.bf16.mxu0 %v6760_v0  ;;  %v6764_v4 = vld [vmem:[%s10021_s1 + $0x148] sm:$0xff]   ;;  %v6767_v7 = vld [vmem:[%s10021_s1 + $0x150] sm:$0xff]   ;;  %vm3130_vm2 = vcmask 261312   ;;  %vm3325_vm3 = vcmask 392512   ;;  %vm3065_vm4 = vcmask 1041409  }
  0x17   : > { %v6762_v2 = vld [vmem:[%s10021_s1 + $0xc0] sm:$0xff]   ;;  %6364 = vmatprep.subr.bf16.mxu1 %v6761_v1  ;;  %v6765_v5 = vld [vmem:[%s10021_s1 + $0xc8] sm:$0xff]   ;;  %v6768_v8 = vld [vmem:[%s10021_s1 + $0xd0] sm:$0xff]   ;;  %s246_s28 = scalar_select %p245_p10, %s7069_s25, 1  ;;  %vm3067_vm5 = vcmask 1042434   ;;  %vm3069_vm6 = vcmask 1043459  }
  0x18   : > { %5944 = vmatpush3.bf16.msra.mxu0 %v6762_v2  ;;  %6365 = vmatpush3.bf16.msra.mxu1 %v6761_v1  ;;  %v6769_v9 = vld [vmem:[%s10021_s1 + $0x118] sm:$0xff]   ;;  %v6772_v12 = vld [vmem:[%s10021_s1 + $0x120] sm:$0xff]   ;;  %v6775_v15 = vld [vmem:[%s10021_s1 + $0x128] sm:$0xff]   ;;  %vm3071_vm7 = vcmask 1044484   ;;  %vm3073_vm8 = vcmask 1045509   ;;  %vm3075_vm9 = vcmask 1046534  }
  0x19   : > { %5945 = vmatprep.subr.bf16.mxu0 %v6763_v3  ;;  %6366 = vmatprep.subr.bf16.mxu1 %v6764_v4  ;;  %v6770_v10 = vld [vmem:[%s10021_s1 + $0x158] sm:$0xff]   ;;  %v6773_v13 = vld [vmem:[%s10021_s1 + $0x160] sm:$0xff]   ;;  %v6776_v16 = vld [vmem:[%s10021_s1 + $0x168] sm:$0xff]   ;;  %s6716_s14 = smul.u32 432, %s246_s28  ;;  %vm3077_vm10 = vcmask 1047559   ;;  %vm3478_vm11 = vcmask 130048  }
  0x1a   : > { %v6771_v11 = vld [vmem:[%s10021_s1 + $0xd8] sm:$0xff]   ;;  %v6774_v14 = vld [vmem:[%s10021_s1 + $0xe0] sm:$0xff]   ;;  %v6777_v17 = vld [vmem:[%s10021_s1 + $0xe8] sm:$0xff]   ;;  %vm3481_vm12 = vcmask 261120   ;;  %vm7009_vm13 = vmmov 0   ;;  %vm5469_vm14 = vcmask 392192  }
  0x1b   : > { %v6778_v18 = vld [vmem:[%s10021_s1 + $0x130] sm:$0xff]   ;;  %s7164_s10 = scalar_lea.vmem %s10020_s0, %s6716_s14  ;;  %v6781_v21 = vld [vmem:[%s10021_s1 + $0x138] sm:$0xff]   ;;  %v6789_v26 = vld [vmem:[%s10021_s1 + $0x40] sm:$0xff]   ;;  %s242_s29 = sand.u32 1, %s6998_s22   ;;  %vm5652_vm15 = vcmask 523264  }
  0x1c   : > { %5946 = vmatpush3.bf16.msra.mxu0 %v6765_v5  ;;  %6367 = vmatpush3.bf16.msra.mxu1 %v6764_v4  ;;  %v6779_v19 = vld [vmem:[%s10021_s1 + $0x170] sm:$0xff]   ;;  %v6782_v22 = vld [vmem:[%s10021_s1 + $0x178] sm:$0xff]   ;;  %v7176_v24 = vld [vmem:[%s7164_s10 + $0x20] ss:$12 sps:$4 sm:$0xff]   ;;  %s5741_s28 = sshll.u32 %s242_s29, 6  ;;  %s5942_s11 = sshll.u32 %s7069_s25, 10 }
  0x1d   : > { %5947 = vmatprep.subr.bf16.mxu0 %v6766_v6  ;;  %6368 = vmatprep.subr.bf16.mxu1 %v6767_v7  ;;  %v6780_v20 = vld [vmem:[%s10021_s1 + $0xf0] sm:$0xff]   ;;  %v7173_v23 = vld [vmem:[%s7164_s10 + $0x1c] ss:$12 sps:$4 sm:$0xff]   ;;  %v7186_v27 = vld [vmem:[%s7164_s10 + $0x18] ss:$12 sps:$4 sm:$0xff]   ;;  %s244_s17 = scalar_lea.vmem [#allocation2], %s5741_s28  ;;  %s9970_s16 = scalar_lea.hbm %s10026_s6, %s5942_s11 }
  0x1e   : > { %v6783_v25 = vld [vmem:[%s10021_s1 + $0xf8] sm:$0xff]   ;;  %847 = vmatprep.mubr.bf16.mxu0 %v7173_v23  ;;  %v6790_v28 = vld [vmem:[%s10021_s1 + $0x1c0] sm:$0xff]   ;;  %6380 = vmatprep.mubr.bf16.mxu1 %v7176_v24  ;;  %v6798_v34 = vld [vmem:[%s10021_s1 + $0x48] sm:$0xff]   ;;  %s5675_s12 = sshll.u32 %s244_s17, 4  ;;  %s9979_s25 = scalar_lea.sflag [#allocation3], %s242_s29  ;;  %s9972_s12 = int_to_ptr.vmem [resolvable:$true] %s5675_s12 }
  0x1f   : > { %v7193_v29 = vld [vmem:[%s7164_s10 + $0x38] ss:$12 sps:$4 sm:$0xff]   ;;  %v7202_v32 = vld [vmem:[%s7164_s10 + $0x34] ss:$12 sps:$4 sm:$0xff]   ;;  %v7205_v33 = vld [vmem:[%s7164_s10 + $0x50] ss:$12 sps:$4 sm:$0xff]  }
  0x20   : > { %5948 = vmatpush3.bf16.msra.mxu0 %v6768_v8  ;;  %6369 = vmatpush3.bf16.msra.mxu1 %v6767_v7  ;;  %v6791_v30 = vld [vmem:[%s10021_s1] sm:$0xff]   ;;  %v6799_v35 = vld [vmem:[%s10021_s1 + $0x8] sm:$0xff]   ;;  %v7218_v36 = vld [vmem:[%s7164_s10 + $0x30] ss:$12 sps:$4 sm:$0xff]   ;;  %s6944_s18 = scalar_lea.vmem %s9972_s12, 1024  ;;  %s7010_s19 = smov [#allocation2]  }
  0x21   : > { %5949 = vmatprep.subr.bf16.mxu0 %v6769_v9  ;;  %6370 = vmatprep.subr.bf16.mxu1 %v6770_v10  ;;  %v6792_v31 = vld [vmem:[%s10021_s1 + $0x180] sm:$0xff]   ;;  %v7221_v37 = vld [vmem:[%s7164_s10 + $0x68] ss:$12 sps:$4 sm:$0xff]   ;;  %v7224_v38 = vld [vmem:[%s7164_s10 + $0x4c] ss:$12 sps:$4 sm:$0xff]   ;;  %p6945_p11 = scmp.ne.s32.totalorder %s9972_s12, %s6944_s18  ;;  %s6948_s20 = sshll.u32 %s7010_s19, 4  ;;  %s6949_s20 = int_to_ptr.vmem [resolvable:$false] %s6948_s20 }
  0x22   : > { %v7227_v39 = vld [vmem:[%s7164_s10 + $0x80] ss:$12 sps:$4 sm:$0xff]   ;;  %v6805_v40 = vld [vmem:[%s10021_s1 + $0x50] sm:$0xff]   ;;  %v7249_v45 = vld [vmem:[%s7164_s10 + $0x98] ss:$12 sps:$4 sm:$0xff]   ;;  %s6950_s26 = scalar_lea.vmem %s6949_s20, 2048  ;;  %p6951_p0 = scmp.lt.s32.totalorder %s9972_s12, %s6949_s20 }
  0x23   : > { %v6806_v41 = vld [vmem:[%s10021_s1 + $0x1c8] sm:$0xff]   ;;  %v6807_v42 = vld [vmem:[%s10021_s1 + $0x10] sm:$0xff]   ;;  %v6814_v48 = vld [vmem:[%s10021_s1 + $0x58] sm:$0xff]   ;;  %p6946_p12 = pnand %p6945_p11, %p7086_p5  ;;  %p6952_p1 = scmp.lt.s32.totalorder %s6950_s26, %s6944_s18 }
  0x24   : > { %5950 = vmatpush3.bf16.msra.mxu0 %v6771_v11  ;;  %6371 = vmatpush3.bf16.msra.mxu1 %v6770_v10  ;;  %v6808_v43 = vld [vmem:[%s10021_s1 + $0x188] sm:$0xff]   ;;  %v7252_v46 = vld [vmem:[%s7164_s10 + $0x64] ss:$12 sps:$4 sm:$0xff]   ;;  %v6815_v49 = vld [vmem:[%s10021_s1 + $0x18] sm:$0xff]  }
  0x25   : > { %5951 = vmatprep.subr.bf16.mxu0 %v6772_v12  ;;  %6372 = vmatprep.subr.bf16.mxu1 %v6773_v13  ;;  %v7246_v44 = vld [vmem:[%s7164_s10 + $0x48] ss:$12 sps:$4 sm:$0xff]   ;;  %v7255_v47 = vld [vmem:[%s7164_s10 + $0xb0] ss:$12 sps:$4 sm:$0xff]   ;;  %v7268_v50 = vld [vmem:[%s7164_s10 + $0x60] ss:$12 sps:$4 sm:$0xff]   ;;  %p6947_p13 = pneg %p6946_p12  ;;  %p6953_p2 = por %p6952_p1, %p6951_p0 }
  0x26   : > { %v7271_v51 = vld [vmem:[%s7164_s10 + $0xc8] ss:$12 sps:$4 sm:$0xff]   ;;  %v6821_v52 = vld [vmem:[%s10021_s1 + $0x60] sm:$0xff]   ;;  %v7311_v63 = vld [vmem:[%s7164_s10 + $0x110] ss:$12 sps:$4 sm:$0xff]  }
  0x27   : > { %v7277_v53 = vld [vmem:[%s7164_s10 + $0x7c] ss:$12 sps:$4 sm:$0xff]   ;;  %v7280_v54 = vld [vmem:[%s7164_s10 + $0xe0] ss:$12 sps:$4 sm:$0xff]   ;;  %v6822_v55 = vld [vmem:[%s10021_s1 + $0x1d0] sm:$0xff]   ;;  %p6954_p3 = pnand %p6953_p2, %p6947_p13 }
  0x28   : > { %5952 = vmatpush3.bf16.msra.mxu0 %v6774_v14  ;;  %6373 = vmatpush3.bf16.msra.mxu1 %v6773_v13  ;;  %v6823_v56 = vld [vmem:[%s10021_s1 + $0x20] sm:$0xff]   ;;  %v6824_v57 = vld [vmem:[%s10021_s1 + $0x190] sm:$0xff]   ;;  %v6830_v58 = vld [vmem:[%s10021_s1 + $0x68] sm:$0xff]  }
  0x29   : > { %5953 = vmatprep.subr.bf16.mxu0 %v6775_v15  ;;  %6374 = vmatprep.subr.bf16.mxu1 %v6776_v16  ;;  %v7299_v59 = vld [vmem:[%s7164_s10 + $0x78] ss:$12 sps:$4 sm:$0xff]   ;;  %v6831_v60 = vld [vmem:[%s10021_s1 + $0x28] sm:$0xff]   ;;  %v7308_v62 = vld [vmem:[%s7164_s10 + $0x94] ss:$12 sps:$4 sm:$0xff]  }
  0x2a   : > { %v7305_v61 = vld [vmem:[%s7164_s10 + $0xf8] ss:$12 sps:$4 sm:$0xff]   ;;  %v6837_v0 = vld [vmem:[%s10021_s1 + $0x70] sm:$0xff]   ;;  %v7339_v7 = vld [vmem:[%s7164_s10 + $0x140] ss:$12 sps:$4 sm:$0xff]  }
  0x2b   : > { %v6838_v1 = vld [vmem:[%s10021_s1 + $0x1d8] sm:$0xff]   ;;  %v6839_v2 = vld [vmem:[%s10021_s1 + $0x30] sm:$0xff]   ;;  %v6854_v14 = vld [vmem:[%s10021_s1 + $0x80] sm:$0xff]  }
  0x2c   : > { %5954 = vmatpush3.bf16.msra.mxu0 %v6777_v17  ;;  %6375 = vmatpush3.bf16.msra.mxu1 %v6776_v16  ;;  %v6840_v3 = vld [vmem:[%s10021_s1 + $0x198] sm:$0xff]   ;;  %v7333_v5 = vld [vmem:[%s7164_s10 + $0x128] ss:$12 sps:$4 sm:$0xff]   ;;  %v7358_v12 = vld [vmem:[%s7164_s10 + $0xc4] ss:$12 sps:$4 sm:$0xff]  }
  0x2d   : > { %5955 = vmatprep.subr.bf16.mxu0 %v6778_v18  ;;  %6376 = vmatprep.subr.bf16.mxu1 %v6779_v19  ;;  %v7330_v4 = vld [vmem:[%s7164_s10 + $0x90] ss:$12 sps:$4 sm:$0xff]   ;;  %v7336_v6 = vld [vmem:[%s7164_s10 + $0xac] ss:$12 sps:$4 sm:$0xff]   ;;  %v7352_v10 = vld [vmem:[%s7164_s10 + $0xa8] ss:$12 sps:$4 sm:$0xff]  }
  0x2e   : > { %v6846_v8 = vld [vmem:[%s10021_s1 + $0x78] sm:$0xff]   ;;  %v6855_v15 = vld [vmem:[%s10021_s1 + $0x1e0] sm:$0xff]   ;;  %v6864_v17 = vld [vmem:[%s10021_s1 + $0x1e8] sm:$0xff]  }
  0x2f   : > { %v6847_v9 = vld [vmem:[%s10021_s1 + $0x38] sm:$0xff]   ;;  %v6856_v16 = vld [vmem:[%s10021_s1 + $0x1a0] sm:$0xff]   ;;  %v6865_v18 = vld [vmem:[%s10021_s1 + $0x1a8] sm:$0xff]  }
  0x30   : > { %5956 = vmatpush3.bf16.msra.mxu0 %v6780_v20  ;;  %6377 = vmatpush3.bf16.msra.mxu1 %v6779_v19  ;;  %v7355_v11 = vld [vmem:[%s7164_s10 + $0x158] ss:$12 sps:$4 sm:$0xff]   ;;  %v7361_v13 = vld [vmem:[%s7164_s10 + $0x170] ss:$12 sps:$4 sm:$0xff]   ;;  %v7383_v19 = vld [vmem:[%s7164_s10 + $0xc0] ss:$12 sps:$4 sm:$0xff]  }
  0x31   : > { %5957 = vmatprep.subr.bf16.mxu0 %v6781_v21  ;;  %6378 = vmatprep.subr.bf16.mxu1 %v6782_v22  ;;  %v6845_v20 = vld [vmem:[%s7164_s10 + $0x188] ss:$12 sps:$4 sm:$0xff]  }
  0x32   : > { %v7387_v21 = vld [vmem:[%s7164_s10 + $0xdc] ss:$12 sps:$4 sm:$0xff]  }
  0x34   : > { %5958 = vmatpush3.bf16.msra.mxu0 %v6783_v25  ;;  %6379 = vmatpush3.bf16.msra.mxu1 %v6782_v22  ;;  %v6852_v22 = vld [vmem:[%s7164_s10 + $0x4] ss:$12 sps:$4 sm:$0xff]  }
  0x35   : > { %6079 = vmatprep.subr.bf16.mxu1 %v6789_v26  ;;  %6215 = vmatprep.subr.bf16.mxu0 %v6790_v28  ;;  %v6873_v25 = vld [vmem:[%s10021_s1 + $0x1f0] sm:$0xff]   ;;  %v6850_v28 = vld [vmem:[%s7164_s10] ss:$12 sps:$4 sm:$0xff]  }
  0x36   : > { %v6874_v26 = vld [vmem:[%s10021_s1 + $0x1b0] sm:$0xff]  }
  0x37   : > { %848 = vmatmul.mubr.bf16.vlgmr.msra.gmra.mrb[0].mxu0 %v7186_v27  ;;  %6381 = vmatmul.mubr.bf16.vlgmr.msra.gmra.mrb[0].mxu1 %v7193_v29 }
  0x38   : > { %6080 = vmatpush3.bf16.msra.mxu1 %v6791_v30  ;;  %6216 = vmatpush3.bf16.msra.mxu0 %v6792_v31  ;;  %v7400_v30 = vld [vmem:[%s7164_s10 + $0xd8] ss:$12 sps:$4 sm:$0xff]   ;;  %v7403_v31 = vld [vmem:[%s7164_s10 + $0xf4] ss:$12 sps:$4 sm:$0xff]  }
  0x39   : > { %855 = vmatprep.mubr.bf16.mxu0 %v7202_v32  ;;  %6384 = vmatprep.mubr.bf16.mxu1 %v7205_v33 }
  0x3a   : > { %6081 = vmatprep.subr.bf16.mxu1 %v6798_v34  ;;  %6217 = vmatprep.subr.bf16.mxu0 %v6806_v41  ;;  %v6882_v34 = vld [vmem:[%s10021_s1 + $0x1f8] sm:$0xff]   ;;  %v7419_v41 = vld [vmem:[%s10021_s1 + $0x200] sm:$0xff]  }
  0x3c   : > { %6082 = vmatpush3.bf16.msra.mxu1 %v6799_v35  ;;  %6218 = vmatpush3.bf16.msra.mxu0 %v6808_v43  ;;  %v6863_v35 = vld [vmem:[%s10021_s1 + $0x88] sm:$0xff]   ;;  %v7426_v43 = vld [vmem:[%s7164_s10 + $0xf0] ss:$12 sps:$4 sm:$0xff]  }
  0x3d   : > { %6083 = vmatprep.subr.bf16.mxu1 %v6805_v40  ;;  %6219 = vmatprep.subr.bf16.mxu0 %v6822_v55  ;;  %v6883_v40 = vld [vmem:[%s10021_s1 + $0x1b8] sm:$0xff]   ;;  %v7446_v55 = vld [vmem:[%s7164_s10 + $0x124] ss:$12 sps:$4 sm:$0xff]  }
  0x3f   : > { %856 = vmatmul.mubr.bf16.gmra.mrb[4].mxu0 %v7218_v36  ;;  %6385 = vmatmul.mubr.bf16.gmra.mrb[4].mxu1 %v7221_v37 }
  0x40   : > { %863 = vmatprep.mubr.bf16.mxu0 %v7224_v38  ;;  %6388 = vmatprep.mubr.bf16.mxu1 %v7227_v39 }
  0x41   : > { %6084 = vmatpush3.bf16.msra.mxu1 %v6807_v42  ;;  %6220 = vmatpush3.bf16.msra.mxu0 %v6824_v57  ;;  %v6872_v42 = vld [vmem:[%s10021_s1 + $0x90] sm:$0xff]   ;;  %v7459_v57 = vld [vmem:[%s7164_s10 + $0x120] ss:$12 sps:$4 sm:$0xff]  }
  0x42   : > { %6085 = vmatprep.subr.bf16.mxu1 %v6814_v48  ;;  %6221 = vmatprep.subr.bf16.mxu0 %v6838_v1  ;;  %v7430_v48 = vld [vmem:[%s7164_s10 + $0x10c] ss:$12 sps:$4 sm:$0xff]   ;;  %v7475_v1 = vld [vmem:[%s7164_s10 + $0x154] ss:$12 sps:$4 sm:$0xff]  }
  0x45   : > { %6086 = vmatpush3.bf16.msra.mxu1 %v6815_v49  ;;  %6222 = vmatpush3.bf16.msra.mxu0 %v6840_v3  ;;  %v6881_v49 = vld [vmem:[%s10021_s1 + $0x98] sm:$0xff]  }
  0x46   : > { %6087 = vmatprep.subr.bf16.mxu1 %v6821_v52  ;;  %6223 = vmatprep.subr.bf16.mxu0 %v6855_v15  ;;  %v7443_v52 = vld [vmem:[%s7164_s10 + $0x108] ss:$12 sps:$4 sm:$0xff]   ;;  %v7486_v3 = vld [vmem:[%s7164_s10 + $0x16c] ss:$12 sps:$4 sm:$0xff]  }
  0x47   : > { %864 = vmatmul.mubr.bf16.gmra.mrb[8].mxu0 %v7246_v44  ;;  %6389 = vmatmul.mubr.bf16.gmra.mrb[8].mxu1 %v7249_v45  ;;  %v6890_v15 = vld [vmem:[%s10021_s1 + $0x208] sm:$0xff]  }
  0x48   : > { %871 = vmatprep.mubr.bf16.mxu0 %v7252_v46  ;;  %6392 = vmatprep.mubr.bf16.mxu1 %v7255_v47 }
  0x49   : > { %6088 = vmatpush3.bf16.msra.mxu1 %v6823_v56  ;;  %6224 = vmatpush3.bf16.msra.mxu0 %v6856_v16  ;;  %v6891_v56 = vld [vmem:[%s10021_s1 + $0xb0] sm:$0xff]  }
  0x4a   : > { %6089 = vmatprep.subr.bf16.mxu1 %v6830_v58  ;;  %6225 = vmatprep.subr.bf16.mxu0 %v6864_v17  ;;  %v7462_v58 = vld [vmem:[%s7164_s10 + $0x13c] ss:$12 sps:$4 sm:$0xff]   ;;  %v6892_v16 = vld [vmem:[%s10021_s1 + $0x210] sm:$0xff]  }
  0x4d   : > { %6090 = vmatpush3.bf16.msra.mxu1 %v6831_v60  ;;  %6226 = vmatpush3.bf16.msra.mxu0 %v6865_v18  ;;  %v6893_v60 = vld [vmem:[%s10021_s1 + $0xb8] sm:$0xff]  }
  0x4e   : > { %6091 = vmatprep.subr.bf16.mxu1 %v6837_v0  ;;  %6227 = vmatprep.subr.bf16.mxu0 %v6873_v25  ;;  %v7472_v0 = vld [vmem:[%s7164_s10 + $0x138] ss:$12 sps:$4 sm:$0xff]  }
  0x4f   : > { %872 = vmatmul.mubr.bf16.gmra.mrb[12].mxu0 %v7268_v50  ;;  %6393 = vmatmul.mubr.bf16.gmra.mrb[12].mxu1 %v7271_v51 }
  0x50   : > { %879 = vmatprep.mubr.bf16.mxu0 %v7277_v53  ;;  %6396 = vmatprep.mubr.bf16.mxu1 %v7280_v54 }
  0x51   : > { %6092 = vmatpush3.bf16.msra.mxu1 %v6839_v2  ;;  %6228 = vmatpush3.bf16.msra.mxu0 %v6874_v26  ;;  %v7483_v2 = vld [vmem:[%s7164_s10 + $0x150] ss:$12 sps:$4 sm:$0xff]  }
  0x52   : > { %6093 = vmatprep.subr.bf16.mxu1 %v6846_v8  ;;  %6229 = vmatprep.subr.bf16.mxu0 %v6882_v34  ;;  %v7493_v8 = vld [vmem:[%s7164_s10 + $0x168] ss:$12 sps:$4 sm:$0xff]   ;;  %v6903_v34 = vld [vmem:[%s7164_s10 + $0x38] ss:$12 sps:$4 sm:$0xff]  }
  0x55   : > { %6094 = vmatpush3.bf16.msra.mxu1 %v6847_v9  ;;  %6230 = vmatpush3.bf16.msra.mxu0 %v6883_v40  ;;  %v7496_v9 = vld [vmem:[%s7164_s10 + $0x184] ss:$12 sps:$4 sm:$0xff]  }
  0x56   : > { %6412 = vmatprep.subr.bf16.mxu1 %v6854_v14  ;;  %6460 = vmatprep.subr.bf16.mxu0 %v7419_v41 }
  0x57   : > { %880 = vmatmul.mubr.bf16.gmra.mrb[16].mxu0 %v7299_v59  ;;  %6397 = vmatmul.mubr.bf16.gmra.mrb[16].mxu1 %v7305_v61 }
  0x58   : > { %887 = vmatprep.mubr.bf16.mxu0 %v7308_v62  ;;  %6400 = vmatprep.mubr.bf16.mxu1 %v7311_v63 }
  0x5f   : > { %888 = vmatmul.mubr.bf16.gmra.mrb[20].mxu0 %v7330_v4  ;;  %6401 = vmatmul.mubr.bf16.gmra.mrb[20].mxu1 %v7333_v5 }
  0x60   : > { %895 = vmatprep.mubr.bf16.mxu0 %v7336_v6  ;;  %6404 = vmatprep.mubr.bf16.mxu1 %v7339_v7 }
  0x67   : > { %896 = vmatmul.mubr.bf16.gmra.mrb[24].mxu0 %v7352_v10  ;;  %6405 = vmatmul.mubr.bf16.gmra.mrb[24].mxu1 %v7355_v11 }
  0x68   : > { %903 = vmatprep.mubr.bf16.mxu0 %v7358_v12  ;;  %6408 = vmatprep.mubr.bf16.mxu1 %v7361_v13 }
  0x6f   : > { %904 = vmatmul.mubr.bf16.gmra.mrb[28].mxu0 %v7383_v19  ;;  %6409 = vmatmul.mubr.bf16.gmra.mrb[28].mxu1 %v6845_v20 }
  0x70   : > { %911 = vmatprep.mubr.bf16.mxu0 %v7387_v21  ;;  %1329 = vmatprep.mubr.bf16.mxu1 %v6852_v22  ;;  %v6900_v22 = vld [vmem:[%s7164_s10 + $0x19c] ss:$12 sps:$4 sm:$0xff]  }
  0x77   : > { %912 = vmatmul.mubr.bf16.gmra.mrb[32].mxu0 %v7400_v30  ;;  %1330 = vmatmul.mubr.bf16.vlgmr.msra.gmra.mrb[32].mxu1 %v6850_v28  ;;  %v6902_v28 = vld [vmem:[%s7164_s10 + $0x198] ss:$12 sps:$4 sm:$0xff]  }
  0x78   : > { %6413 = vmatpush3.bf16.msra.mxu1 %v6854_v14  ;;  %919 = vmatprep.mubr.bf16.mxu0 %v7403_v31  ;;  %v7503_v14 = vld [vmem:[%s7164_s10 + $0x180] ss:$12 sps:$4 sm:$0xff]  }
  0x79   : > { %1337 = vmatprep.mubr.bf16.mxu1 %v7173_v23  ;;  %6414 = vmatprep.subr.bf16.mxu1 %v6863_v35  ;;  %v6887_v23 = vld [vmem:[%s10021_s1 + $0xa0] sm:$0xff]  }
  0x7c   : > { %6415 = vmatpush3.bf16.msra.mxu1 %v6863_v35  ;;  %v6904_v35 = vld [vmem:[%s7164_s10 + $0x68] ss:$12 sps:$4 sm:$0xff]  }
  0x7d   : > { %6416 = vmatprep.subr.bf16.mxu1 %v6872_v42 }
  0x7f   : > { %920 = vmatmul.mubr.bf16.gmra.mrb[36].mxu0 %v7426_v43  ;;  %1338 = vmatmul.mubr.bf16.gmra.mrb[36].mxu1 %v7186_v27  ;;  %v6889_v27 = vld [vmem:[%s10021_s1 + $0xa8] sm:$0xff]  }
  0x80   : > { %927 = vmatprep.mubr.bf16.mxu0 %v7430_v48  ;;  %1345 = vmatprep.mubr.bf16.mxu1 %v7202_v32 }
  0x81   : > { %6417 = vmatpush3.bf16.msra.mxu1 %v6872_v42  ;;  %v6905_v42 = vld [vmem:[%s7164_s10 + $0x50] ss:$12 sps:$4 sm:$0xff]  }
  0x82   : > { %6418 = vmatprep.subr.bf16.mxu1 %v6881_v49 }
  0x85   : > { %6419 = vmatpush3.bf16.msra.mxu1 %v6881_v49 }
  0x86   : > { %6420 = vmatprep.subr.bf16.mxu1 %v6887_v23 }
  0x87   : > { %928 = vmatmul.mubr.bf16.gmra.mrb[40].mxu0 %v7443_v52  ;;  %1346 = vmatmul.mubr.bf16.gmra.mrb[40].mxu1 %v7218_v36 }
  0x88   : > { %935 = vmatprep.mubr.bf16.mxu0 %v7446_v55  ;;  %1353 = vmatprep.mubr.bf16.mxu1 %v7224_v38 }
  0x89   : > { %6421 = vmatpush3.bf16.msra.mxu1 %v6887_v23  ;;  %v6907_v23 = vld [vmem:[%s7164_s10 + $0x98] ss:$12 sps:$4 sm:$0xff]  }
  0x8a   : > { %6422 = vmatprep.subr.bf16.mxu1 %v6889_v27 }
  0x8d   : > { %6423 = vmatpush3.bf16.msra.mxu1 %v6889_v27 }
  0x8e   : > { %6424 = vmatprep.subr.bf16.mxu1 %v6891_v56 }
  0x8f   : > { %936 = vmatmul.mubr.bf16.gmra.mrb[44].mxu0 %v7459_v57  ;;  %1354 = vmatmul.mubr.bf16.gmra.mrb[44].mxu1 %v7246_v44 }
  0x90   : > { %943 = vmatprep.mubr.bf16.mxu0 %v7462_v58  ;;  %1361 = vmatprep.mubr.bf16.mxu1 %v7252_v46 }
  0x91   : > { %6425 = vmatpush3.bf16.msra.mxu1 %v6891_v56  ;;  %v6908_v56 = vld [vmem:[%s7164_s10 + $0xb0] ss:$12 sps:$4 sm:$0xff]  }
  0x92   : > { %6426 = vmatprep.subr.bf16.mxu1 %v6893_v60 }
  0x95   : > { %6427 = vmatpush3.bf16.msra.mxu1 %v6893_v60  ;;  %v6909_v60 = vld [vmem:[%s7164_s10 + $0xc8] ss:$12 sps:$4 sm:$0xff]  }
  0x96   : > { %6540 = vmatprep.subr.bf16.mxu1 %v7419_v41 }
  0x97   : > { %944 = vmatmul.mubr.bf16.gmra.mrb[48].mxu0 %v7472_v0  ;;  %1362 = vmatmul.mubr.bf16.gmra.mrb[48].mxu1 %v7268_v50 }
  0x98   : > { %951 = vmatprep.mubr.bf16.mxu0 %v7475_v1  ;;  %1369 = vmatprep.mubr.bf16.mxu1 %v7277_v53 }
  0x9f   : > { %952 = vmatmul.mubr.bf16.gmra.mrb[52].mxu0 %v7483_v2  ;;  %1370 = vmatmul.mubr.bf16.gmra.mrb[52].mxu1 %v7299_v59 }
  0xa0   : > { %959 = vmatprep.mubr.bf16.mxu0 %v7486_v3  ;;  %1377 = vmatprep.mubr.bf16.mxu1 %v7308_v62 }
  0xa7   : > { %960 = vmatmul.mubr.bf16.gmra.mrb[56].mxu0 %v7493_v8  ;;  %1378 = vmatmul.mubr.bf16.gmra.mrb[56].mxu1 %v7330_v4 }
  0xa8   : > { %967 = vmatprep.mubr.bf16.mxu0 %v7496_v9  ;;  %1385 = vmatprep.mubr.bf16.mxu1 %v7336_v6 }
  0xaf   : > { %968 = vmatmul.mubr.bf16.gmra.mrb[60].mxu0 %v7503_v14  ;;  %1386 = vmatmul.mubr.bf16.gmra.mrb[60].mxu1 %v7352_v10 }
  0xb0   : > { %1393 = vmatprep.mubr.bf16.mxu1 %v7358_v12  ;;  %2163 = vmatprep.mubr.bf16.mxu0 %v7202_v32  ;;  %v6894_v32 = vld [vmem:[%s10021_s1 + $0x218] sm:$0xff]  }
  0xb7   : > { %1394 = vmatmul.mubr.bf16.gmra.mrb[64].mxu1 %v7383_v19  ;;  %2164 = vmatmul.mubr.bf16.vlgmr.msra.gmra.mrb[64].mxu0 %v7218_v36  ;;  %v6896_v36 = vld [vmem:[%s10021_s1 + $0x220] sm:$0xff]  }
  0xb8   : > { %6461 = vmatpush3.bf16.msra.mxu0 %v7419_v41  ;;  %1401 = vmatprep.mubr.bf16.mxu1 %v7387_v21 }
  0xb9   : > { %2171 = vmatprep.mubr.bf16.mxu0 %v7224_v38  ;;  %6462 = vmatprep.subr.bf16.mxu0 %v6890_v15  ;;  %v6897_v38 = vld [vmem:[%s10021_s1 + $0x228] sm:$0xff]  }
  0xbc   : > { %6463 = vmatpush3.bf16.msra.mxu0 %v6890_v15 }
  0xbd   : > { %6464 = vmatprep.subr.bf16.mxu0 %v6892_v16 }
  0xbf   : > { %1402 = vmatmul.mubr.bf16.gmra.mrb[68].mxu1 %v7400_v30  ;;  %2172 = vmatmul.mubr.bf16.gmra.mrb[68].mxu0 %v7246_v44  ;;  %v6898_v44 = vld [vmem:[%s10021_s1 + $0x230] sm:$0xff]  }
  0xc0   : > { %1409 = vmatprep.mubr.bf16.mxu1 %v7403_v31  ;;  %2179 = vmatprep.mubr.bf16.mxu0 %v7252_v46  ;;  %v7543_v46 = vld [vmem:[%s10021_s1 + $0x238] sm:$0xff]  }
  0xc1   : > { %6465 = vmatpush3.bf16.msra.mxu0 %v6892_v16 }
  0xc2   : > { %6466 = vmatprep.subr.bf16.mxu0 %v6894_v32 }
  0xc5   : > { %6467 = vmatpush3.bf16.msra.mxu0 %v6894_v32 }
  0xc6   : > { %6468 = vmatprep.subr.bf16.mxu0 %v6896_v36 }
  0xc7   : > { %1410 = vmatmul.mubr.bf16.gmra.mrb[72].mxu1 %v7426_v43  ;;  %2180 = vmatmul.mubr.bf16.gmra.mrb[72].mxu0 %v7268_v50  ;;  %v6895_v50 = vld [vmem:[%s7164_s10 + $0x8] ss:$12 sps:$4 sm:$0xff]  }
  0xc8   : > { %1417 = vmatprep.mubr.bf16.mxu1 %v7430_v48  ;;  %2187 = vmatprep.mubr.bf16.mxu0 %v7277_v53 }
  0xc9   : > { %6469 = vmatpush3.bf16.msra.mxu0 %v6896_v36 }
  0xca   : > { %6470 = vmatprep.subr.bf16.mxu0 %v6897_v38 }
  0xcd   : > { %6471 = vmatpush3.bf16.msra.mxu0 %v6897_v38 }
  0xce   : > { %6472 = vmatprep.subr.bf16.mxu0 %v6898_v44 }
  0xcf   : > { %1418 = vmatmul.mubr.bf16.gmra.mrb[76].mxu1 %v7443_v52  ;;  %2188 = vmatmul.mubr.bf16.gmra.mrb[76].mxu0 %v7299_v59 }
  0xd0   : > { %1425 = vmatprep.mubr.bf16.mxu1 %v7446_v55  ;;  %2195 = vmatprep.mubr.bf16.mxu0 %v7308_v62 }
  0xd1   : > { %6473 = vmatpush3.bf16.msra.mxu0 %v6898_v44 }
  0xd2   : > { %6474 = vmatprep.subr.bf16.mxu0 %v7543_v46 }
  0xd5   : > { %6475 = vmatpush3.bf16.msra.mxu0 %v7543_v46 }
  0xd7   : > { %1426 = vmatmul.mubr.bf16.gmra.mrb[80].mxu1 %v7459_v57  ;;  %2196 = vmatmul.mubr.bf16.gmra.mrb[80].mxu0 %v7330_v4 }
  0xd8   : > { %1433 = vmatprep.mubr.bf16.mxu1 %v7462_v58  ;;  %2203 = vmatprep.mubr.bf16.mxu0 %v7336_v6 }
  0xdf   : > { %1434 = vmatmul.mubr.bf16.gmra.mrb[84].mxu1 %v7472_v0  ;;  %2204 = vmatmul.mubr.bf16.gmra.mrb[84].mxu0 %v7352_v10 }
  0xe0   : > { %1441 = vmatprep.mubr.bf16.mxu1 %v7475_v1  ;;  %2211 = vmatprep.mubr.bf16.mxu0 %v7358_v12 }
  0xe7   : > { %1442 = vmatmul.mubr.bf16.gmra.mrb[88].mxu1 %v7483_v2  ;;  %2212 = vmatmul.mubr.bf16.gmra.mrb[88].mxu0 %v7383_v19 }
  0xe8   : > { %1449 = vmatprep.mubr.bf16.mxu1 %v7486_v3  ;;  %2219 = vmatprep.mubr.bf16.mxu0 %v7387_v21 }
  0xef   : > { %1450 = vmatmul.mubr.bf16.gmra.mrb[92].mxu1 %v7493_v8  ;;  %2220 = vmatmul.mubr.bf16.gmra.mrb[92].mxu0 %v7400_v30 }
  0xf0   : > { %6428 = vmatprep.mubr.bf16.mxu1 %v6895_v50  ;;  %2227 = vmatprep.mubr.bf16.mxu0 %v7403_v31  ;;  %v6912_v50 = vld [vmem:[%s7164_s10 + $0x110] ss:$12 sps:$4 sm:$0xff]  }
  0xf7   : > { %6429 = vmatmul.mubr.bf16.vlgmr.msra.gmra.mrb[0].mxu1 %v7176_v24  ;;  %2228 = vmatmul.mubr.bf16.gmra.mrb[96].mxu0 %v7426_v43  ;;  %v6906_v43 = vld [vmem:[%s7164_s10 + $0x80] ss:$12 sps:$4 sm:$0xff]  }
  0xf8   : > { %6548 = vmatpush3.bf16.msra.mxu1 %v7419_v41  ;;  %6432 = vmatprep.mubr.bf16.mxu1 %v7193_v29 }
  0xf9   : > { %2235 = vmatprep.mubr.bf16.mxu0 %v7430_v48  ;;  %6541 = vmatprep.subr.bf16.mxu1 %v6890_v15 }
  0xfc   : > { %6549 = vmatpush3.bf16.msra.mxu1 %v6890_v15  ;;  %v6911_v15 = vld [vmem:[%s7164_s10 + $0xf8] ss:$12 sps:$4 sm:$0xff]  }
  0xfd   : > { %6542 = vmatprep.subr.bf16.mxu1 %v6892_v16 }
  0xff   : > { %6433 = vmatmul.mubr.bf16.gmra.mrb[4].mxu1 %v7205_v33  ;;  %2236 = vmatmul.mubr.bf16.gmra.mrb[100].mxu0 %v7443_v52 }
 0x100   : > { %6436 = vmatprep.mubr.bf16.mxu1 %v7221_v37  ;;  %2243 = vmatprep.mubr.bf16.mxu0 %v7446_v55 }
 0x101   : > { %6550 = vmatpush3.bf16.msra.mxu1 %v6892_v16 }
 0x102   : > { %6543 = vmatprep.subr.bf16.mxu1 %v6894_v32 }
 0x105   : > { %6551 = vmatpush3.bf16.msra.mxu1 %v6894_v32 }
 0x106   : > { %6544 = vmatprep.subr.bf16.mxu1 %v6896_v36 }
 0x107   : > { %6437 = vmatmul.mubr.bf16.gmra.mrb[8].mxu1 %v7227_v39  ;;  %2244 = vmatmul.mubr.bf16.gmra.mrb[104].mxu0 %v7459_v57 }
 0x108   : > { %6440 = vmatprep.mubr.bf16.mxu1 %v7249_v45  ;;  %2251 = vmatprep.mubr.bf16.mxu0 %v7462_v58 }
 0x109   : > { %6552 = vmatpush3.bf16.msra.mxu1 %v6896_v36 }
 0x10a   : > { %v5959_v24 = vpop.f32.mrb[0].mxu0  ;;  %6545 = vmatprep.subr.bf16.mxu1 %v6897_v38 }
 0x10b   : > { %v5960_v29 = vpop.f32.mrb[1].mxu0 }
 0x10c   : > { %v7580_v33 = vadd.f32 %v5960_v29, %v5959_v24  ;;  %v5962_v37 = vpop.f32.mrb[2].mxu0 }
 0x10d   : > { %v5963_v53 = vpop.f32.mrb[3].mxu0  ;;  %6553 = vmatpush3.bf16.msra.mxu1 %v6897_v38 }
 0x10e   : > { %v7582_v59 = vadd.f32 %v5963_v53, %v5962_v37  ;;  %6546 = vmatprep.subr.bf16.mxu1 %v6898_v44 }
 0x10f   : > { %6441 = vmatmul.mubr.bf16.gmra.mrb[12].mxu1 %v7255_v47  ;;  %2252 = vmatmul.mubr.bf16.gmra.mrb[108].mxu0 %v7472_v0 }
 0x110   : > { %6444 = vmatprep.mubr.bf16.mxu1 %v7271_v51  ;;  %2259 = vmatprep.mubr.bf16.mxu0 %v7475_v1 }
 0x111   : > { %6554 = vmatpush3.bf16.msra.mxu1 %v6898_v44 }
 0x112   : > { %v5965_v39 = vpop.f32.mrb[4].mxu0  ;;  %6547 = vmatprep.subr.bf16.mxu1 %v7543_v46 }
 0x113   : > { %v5966_v45 = vpop.f32.mrb[5].mxu0 }
 0x114   : > { %v7589_v62 = vadd.f32 %v5966_v45, %v5965_v39  ;;  %v5968_v4 = vpop.f32.mrb[6].mxu0  ;;  %v6913_v39 = vld [vmem:[%s7164_s10 + $0x128] ss:$12 sps:$4 sm:$0xff]  }
 0x115   : > { %v5969_v6 = vpop.f32.mrb[7].mxu0  ;;  %6555 = vmatpush3.bf16.msra.mxu1 %v7543_v46 }
 0x116   : > { %v7592_v10 = vadd.f32 %v5969_v6, %v5968_v4 }
 0x117   : > { %6445 = vmatmul.mubr.bf16.gmra.mrb[16].mxu1 %v7280_v54  ;;  %2260 = vmatmul.mubr.bf16.gmra.mrb[112].mxu0 %v7483_v2 }
 0x118   : > { %6448 = vmatprep.mubr.bf16.mxu1 %v7305_v61  ;;  %2267 = vmatprep.mubr.bf16.mxu0 %v7486_v3 }
 0x11a   : > { %v5971_v47 = vpop.f32.mrb[8].mxu0 }
 0x11b   : > { %v5972_v51 = vpop.f32.mrb[9].mxu0 }
 0x11c   : > { %v7598_v12 = vadd.f32 %v5972_v51, %v5971_v47  ;;  %v5974_v17 = vpop.f32.mrb[10].mxu0 }
 0x11d   : > { %v5975_v18 = vpop.f32.mrb[11].mxu0 }
 0x11e   : > { %v7600_v19 = vadd.f32 %v5975_v18, %v5974_v17 }
 0x11f   : > { %6449 = vmatmul.mubr.bf16.gmra.mrb[20].mxu1 %v7311_v63  ;;  %2268 = vmatmul.mubr.bf16.gmra.mrb[116].mxu0 %v7493_v8  ;;  %v6910_v8 = vld [vmem:[%s7164_s10 + $0xe0] ss:$12 sps:$4 sm:$0xff]  }
 0x120   : > { %6452 = vmatprep.mubr.bf16.mxu1 %v7333_v5  ;;  %2275 = vmatprep.mubr.bf16.mxu0 %v7496_v9 }
 0x122   : > { %v5977_v54 = vpop.f32.mrb[12].mxu0 }
 0x123   : > { %v5978_v61 = vpop.f32.mrb[13].mxu0 }
 0x124   : > { %v7606_v20 = vadd.f32 %v5978_v61, %v5977_v54  ;;  %v5980_v21 = vpop.f32.mrb[14].mxu0 }
 0x125   : > { %v5981_v25 = vpop.f32.mrb[15].mxu0 }
 0x126   : > { %v7609_v26 = vadd.f32 %v5981_v25, %v5980_v21 }
 0x127   : > { %6453 = vmatmul.mubr.bf16.gmra.mrb[24].mxu1 %v7339_v7  ;;  %2276 = vmatmul.mubr.bf16.gmra.mrb[120].mxu0 %v7503_v14 }
 0x128   : > { %6456 = vmatprep.mubr.bf16.mxu1 %v7355_v11  ;;  %2283 = vmatprep.mubr.bf16.mxu0 %v6900_v22  ;;  %v6914_v22 = vld [vmem:[%s7164_s10 + $0x140] ss:$12 sps:$4 sm:$0xff]  }
 0x12a   : > { %v5983_v63 = vpop.f32.mrb[16].mxu0 }
 0x12b   : > { %v5984_v5 = vpop.f32.mrb[17].mxu0 }
 0x12c   : > { %v7615_v30 = vadd.f32 %v5984_v5, %v5983_v63  ;;  %v5986_v31 = vpop.f32.mrb[18].mxu0 }
 0x12d   : > { %v5987_v40 = vpop.f32.mrb[19].mxu0 }
 0x12e   : > { %v7619_v41 = vadd.f32 %v5987_v40, %v5986_v31  ;;  %v6915_v31 = vld [vmem:[%s7164_s10 + $0x158] ss:$12 sps:$4 sm:$0xff]  }
 0x12f   : > { %6457 = vmatmul.mubr.bf16.gmra.mrb[28].mxu1 %v7361_v13  ;;  %2284 = vmatmul.mubr.bf16.gmra.mrb[124].mxu0 %v6902_v28 }
 0x130   : > { %6476 = vmatprep.mubr.bf16.mxu0 %v6903_v34  ;;  %6480 = vmatprep.mubr.bf16.mxu1 %v6904_v35 }
 0x132   : > { %v5989_v7 = vpop.f32.mrb[20].mxu0 }
 0x133   : > { %v5990_v11 = vpop.f32.mrb[21].mxu0 }
 0x134   : > { %v7624_v48 = vadd.f32 %v5990_v11, %v5989_v7  ;;  %v5992_v49 = vpop.f32.mrb[22].mxu0 }
 0x135   : > { %v5993_v52 = vpop.f32.mrb[23].mxu0 }
 0x136   : > { %v7627_v55 = vadd.f32 %v5993_v52, %v5992_v49 }
 0x137   : > { %6477 = vmatmul.mubr.bf16.vlgmr.msra.gmra.mrb[128].mxu0 %v6905_v42  ;;  %6481 = vmatmul.mubr.bf16.vlgmr.msra.gmra.mrb[4].mxu1 %v6906_v43 }
 0x138   : > { %6484 = vmatprep.mubr.bf16.mxu1 %v6907_v23  ;;  %v6916_v23 = vld [vmem:[%s7164_s10 + $0x170] ss:$12 sps:$4 sm:$0xff]  }
 0x13a   : > { %v5995_v13 = vpop.f32.mrb[24].mxu0 }
 0x13b   : > { %v5996_v27 = vpop.f32.mrb[25].mxu0 }
 0x13c   : > { %v7630_v57 = vadd.f32 %v5996_v27, %v5995_v13  ;;  %v5998_v58 = vpop.f32.mrb[26].mxu0 }
 0x13d   : > { %v5999_v0 = vpop.f32.mrb[27].mxu0 }
 0x13e   : > { %v7633_v1 = vadd.f32 %v5999_v0, %v5998_v58  ;;  %v6917_v58 = vld [vmem:[%s7164_s10 + $0x188] ss:$12 sps:$4 sm:$0xff]  }
 0x13f   : > { %6485 = vmatmul.mubr.bf16.gmra.mrb[8].mxu1 %v6908_v56 }
 0x140   : > { %6488 = vmatprep.mubr.bf16.mxu1 %v6909_v60 }
 0x142   : > { %v6001_v2 = vpop.f32.mrb[28].mxu0 }
 0x143   : > { %v6002_v3 = vpop.f32.mrb[29].mxu0 }
 0x144   : > { %v7636_v9 = vadd.f32 %v6002_v3, %v6001_v2  ;;  %v6004_v14 = vpop.f32.mrb[30].mxu0 }
 0x145   : > { %v6005_v16 = vpop.f32.mrb[31].mxu0 }
 0x146   : > { %v7639_v32 = vadd.f32 %v6005_v16, %v6004_v14 }
 0x147   : > { %6489 = vmatmul.mubr.bf16.gmra.mrb[12].mxu1 %v6910_v8 }
 0x148   : > { %6492 = vmatprep.mubr.bf16.mxu1 %v6911_v15 }
 0x14a   : > { %v6007_v36 = vpop.f32.mrb[32].mxu0  ;;  %v6095_v38 = vpop.f32.mrb[32].mxu1 }
 0x14b   : > { %v6008_v44 = vpop.f32.mrb[33].mxu0  ;;  %v6096_v46 = vpop.f32.mrb[33].mxu1 }
 0x14c   : > { %v7642_v24 = vadd.f32 %v6008_v44, %v6007_v36  ;;  %v6097_v29 = vadd.f32 %v6096_v46, %v6095_v38  ;;  %v6010_v37 = vpop.f32.mrb[34].mxu0  ;;  %v6098_v53 = vpop.f32.mrb[34].mxu1  ;;  %v6918_v36 = vld [vmem:[%s7164_s10 + $0x1a0] ss:$12 sps:$4 sm:$0xff]  }
 0x14d   : > { %v6011_v45 = vpop.f32.mrb[35].mxu0  ;;  %v6099_v4 = vpop.f32.mrb[35].mxu1 }
 0x14e   : > { %v7645_v6 = vadd.f32 %v6011_v45, %v6010_v37  ;;  %v6100_v47 = vadd.f32 %v6099_v4, %v6098_v53  ;;  %v7648_v51 = vadd.f32 %v6097_v29, %v7580_v33 }
 0x14f   : > { %6493 = vmatmul.mubr.bf16.gmra.mrb[16].mxu1 %v6912_v50 }
 0x150   : > { %6496 = vmatprep.mubr.bf16.mxu1 %v6913_v39  ;;  %v7651_v17 = vadd.f32 %v6100_v47, %v7582_v59 }
 0x152   : > { %v6013_v18 = vpop.f32.mrb[36].mxu0  ;;  %v6101_v54 = vpop.f32.mrb[36].mxu1 }
 0x153   : > { %v6014_v61 = vpop.f32.mrb[37].mxu0  ;;  %v6102_v21 = vpop.f32.mrb[37].mxu1 }
 0x154   : > { %v7654_v25 = vadd.f32 %v6014_v61, %v6013_v18  ;;  %v6103_v63 = vadd.f32 %v6102_v21, %v6101_v54  ;;  %v6016_v5 = vpop.f32.mrb[38].mxu0  ;;  %v6104_v28 = vpop.f32.mrb[38].mxu1 }
 0x155   : > { %v6017_v34 = vpop.f32.mrb[39].mxu0  ;;  %v6105_v33 = vpop.f32.mrb[39].mxu1 }
 0x156   : > { %v7657_v35 = vadd.f32 %v6017_v34, %v6016_v5  ;;  %v6106_v40 = vadd.f32 %v6105_v33, %v6104_v28  ;;  %v7660_v59 = vadd.f32 %v6103_v63, %v7589_v62 }
 0x157   : > { %6497 = vmatmul.mubr.bf16.gmra.mrb[20].mxu1 %v6914_v22 }
 0x158   : > { %6500 = vmatprep.mubr.bf16.mxu1 %v6915_v31  ;;  %v7663_v7 = vadd.f32 %v6106_v40, %v7592_v10 }
 0x15a   : > { %v6019_v11 = vpop.f32.mrb[40].mxu0  ;;  %v6107_v42 = vpop.f32.mrb[40].mxu1 }
 0x15b   : > { %v6020_v43 = vpop.f32.mrb[41].mxu0  ;;  %v6108_v49 = vpop.f32.mrb[41].mxu1 }
 0x15c   : > { %v7666_v52 = vadd.f32 %v6020_v43, %v6019_v11  ;;  %v6109_v13 = vadd.f32 %v6108_v49, %v6107_v42  ;;  %v6022_v27 = vpop.f32.mrb[42].mxu0  ;;  %v6110_v56 = vpop.f32.mrb[42].mxu1 }
 0x15d   : > { %v6023_v60 = vpop.f32.mrb[43].mxu0  ;;  %v6111_v62 = vpop.f32.mrb[43].mxu1 }
 0x15e   : > { %v7670_v0 = vadd.f32 %v6109_v13, %v7598_v12  ;;  %v7672_v2 = vadd.f32 %v6023_v60, %v6022_v27  ;;  %v6112_v10 = vadd.f32 %v6111_v62, %v6110_v56 }
 0x15f   : > { %6501 = vmatmul.mubr.bf16.gmra.mrb[24].mxu1 %v6916_v23 }
 0x160   : > { %v7675_v3 = vadd.f32 %v6112_v10, %v7600_v19  ;;  %6504 = vmatprep.mubr.bf16.mxu1 %v6917_v58 }
 0x162   : > { %v6025_v8 = vpop.f32.mrb[44].mxu0  ;;  %v6113_v14 = vpop.f32.mrb[44].mxu1 }
 0x163   : > { %v6026_v15 = vpop.f32.mrb[45].mxu0  ;;  %v6114_v16 = vpop.f32.mrb[45].mxu1 }
 0x164   : > { %v7678_v38 = vadd.f32 %v6026_v15, %v6025_v8  ;;  %v6115_v44 = vadd.f32 %v6114_v16, %v6113_v14  ;;  %v6028_v46 = vpop.f32.mrb[46].mxu0  ;;  %v6116_v50 = vpop.f32.mrb[46].mxu1 }
 0x165   : > { %v6029_v12 = vpop.f32.mrb[47].mxu0  ;;  %v6117_v29 = vpop.f32.mrb[47].mxu1 }
 0x166   : > { %v7681_v37 = vadd.f32 %v6115_v44, %v7606_v20  ;;  %v7683_v53 = vadd.f32 %v6029_v12, %v6028_v46  ;;  %v6118_v19 = vadd.f32 %v6117_v29, %v6116_v50 }
 0x167   : > { %6505 = vmatmul.mubr.bf16.gmra.mrb[28].mxu1 %v6918_v36 }
 0x168   : > { %v7686_v39 = vadd.f32 %v6118_v19, %v7609_v26 }
 0x16a   : > { %v6031_v45 = vpop.f32.mrb[48].mxu0  ;;  %v6119_v4 = vpop.f32.mrb[48].mxu1 }
 0x16b   : > { %v6032_v47 = vpop.f32.mrb[49].mxu0  ;;  %v6120_v18 = vpop.f32.mrb[49].mxu1 }
 0x16c   : > { %v7688_v54 = vadd.f32 %v6032_v47, %v6031_v45  ;;  %v6121_v61 = vadd.f32 %v6120_v18, %v6119_v4  ;;  %v6034_v21 = vpop.f32.mrb[50].mxu0  ;;  %v6122_v22 = vpop.f32.mrb[50].mxu1 }
 0x16d   : > { %v6035_v63 = vpop.f32.mrb[51].mxu0  ;;  %v6123_v5 = vpop.f32.mrb[51].mxu1 }
 0x16e   : > { %v7691_v20 = vadd.f32 %v6121_v61, %v7615_v30  ;;  %v7693_v28 = vadd.f32 %v6035_v63, %v6034_v21  ;;  %v6124_v31 = vadd.f32 %v6123_v5, %v6122_v22 }
 0x170   : > { %v7696_v26 = vadd.f32 %v6124_v31, %v7619_v41 }
 0x172   : > { %v6037_v34 = vpop.f32.mrb[52].mxu0  ;;  %v6125_v33 = vpop.f32.mrb[52].mxu1 }
 0x173   : > { %v6038_v40 = vpop.f32.mrb[53].mxu0  ;;  %v6126_v11 = vpop.f32.mrb[53].mxu1 }
 0x174   : > { %v7698_v42 = vadd.f32 %v6038_v40, %v6037_v34  ;;  %v6127_v43 = vadd.f32 %v6126_v11, %v6125_v33  ;;  %v6040_v49 = vpop.f32.mrb[54].mxu0  ;;  %v6128_v23 = vpop.f32.mrb[54].mxu1 }
 0x175   : > { %v6041_v13 = vpop.f32.mrb[55].mxu0  ;;  %v6129_v27 = vpop.f32.mrb[55].mxu1 }
 0x176   : > { %v7701_v30 = vadd.f32 %v6127_v43, %v7624_v48  ;;  %v7703_v56 = vadd.f32 %v6041_v13, %v6040_v49  ;;  %v6130_v58 = vadd.f32 %v6129_v27, %v6128_v23 }
 0x178   : > { %v7706_v41 = vadd.f32 %v6130_v58, %v7627_v55 }
 0x17a   : > { %v6043_v60 = vpop.f32.mrb[56].mxu0  ;;  %v6131_v62 = vpop.f32.mrb[56].mxu1 }
 0x17b   : > { %v6044_v10 = vpop.f32.mrb[57].mxu0  ;;  %v6132_v8 = vpop.f32.mrb[57].mxu1 }
 0x17c   : > { %v7708_v14 = vadd.f32 %v6044_v10, %v6043_v60  ;;  %v6133_v15 = vadd.f32 %v6132_v8, %v6131_v62  ;;  %v6046_v16 = vpop.f32.mrb[58].mxu0  ;;  %v6134_v36 = vpop.f32.mrb[58].mxu1 }
 0x17d   : > { %v6047_v44 = vpop.f32.mrb[59].mxu0  ;;  %v6135_v46 = vpop.f32.mrb[59].mxu1 }
 0x17e   : > { %v7711_v48 = vadd.f32 %v6133_v15, %v7630_v57  ;;  %v7713_v50 = vadd.f32 %v6047_v44, %v6046_v16  ;;  %v6136_v12 = vadd.f32 %v6135_v46, %v6134_v36 }
 0x180   : > { %v7716_v55 = vadd.f32 %v6136_v12, %v7633_v1 }
 0x182   : > { %v6049_v29 = vpop.f32.mrb[60].mxu0  ;;  %v6137_v19 = vpop.f32.mrb[60].mxu1 }
 0x183   : > { %v6050_v45 = vpop.f32.mrb[61].mxu0  ;;  %v6138_v4 = vpop.f32.mrb[61].mxu1 }
 0x184   : > { %v7718_v47 = vadd.f32 %v6050_v45, %v6049_v29  ;;  %v6139_v18 = vadd.f32 %v6138_v4, %v6137_v19  ;;  %v6052_v61 = vpop.f32.mrb[62].mxu0  ;;  %v6140_v21 = vpop.f32.mrb[62].mxu1 }
 0x185   : > { %v6053_v22 = vpop.f32.mrb[63].mxu0  ;;  %v6141_v63 = vpop.f32.mrb[63].mxu1 }
 0x186   : > { %v7721_v57 = vadd.f32 %v6139_v18, %v7636_v9  ;;  %v7723_v5 = vadd.f32 %v6053_v22, %v6052_v61  ;;  %v6142_v31 = vadd.f32 %v6141_v63, %v6140_v21 }
 0x188   : > { %v7726_v1 = vadd.f32 %v6142_v31, %v7639_v32 }
 0x18a   : > { %v6143_v34 = vpop.f32.mrb[64].mxu1  ;;  %v6231_v33 = vpop.f32.mrb[64].mxu0 }
 0x18b   : > { %v6144_v40 = vpop.f32.mrb[65].mxu1  ;;  %v6232_v11 = vpop.f32.mrb[65].mxu0 }
 0x18c   : > { %v6145_v43 = vadd.f32 %v6144_v40, %v6143_v34  ;;  %v7728_v49 = vadd.f32 %v6232_v11, %v6231_v33  ;;  %v6146_v23 = vpop.f32.mrb[66].mxu1  ;;  %v6234_v13 = vpop.f32.mrb[66].mxu0 }
 0x18d   : > { %v6147_v27 = vpop.f32.mrb[67].mxu1  ;;  %v6235_v58 = vpop.f32.mrb[67].mxu0 }
 0x18e   : > { %v7731_v9 = vadd.f32 %v6145_v43, %v7642_v24  ;;  %v6148_v60 = vadd.f32 %v6147_v27, %v6146_v23  ;;  %v7733_v62 = vadd.f32 %v6235_v58, %v6234_v13 }
 0x190   : > { %v7736_v32 = vadd.f32 %v6148_v60, %v7645_v6 }
 0x192   : > { %v6149_v10 = vpop.f32.mrb[68].mxu1  ;;  %v6237_v8 = vpop.f32.mrb[68].mxu0 }
 0x193   : > { %v6150_v15 = vpop.f32.mrb[69].mxu1  ;;  %v6238_v16 = vpop.f32.mrb[69].mxu0 }
 0x194   : > { %v6151_v36 = vadd.f32 %v6150_v15, %v6149_v10  ;;  %v7738_v44 = vadd.f32 %v6238_v16, %v6237_v8  ;;  %v6152_v46 = vpop.f32.mrb[70].mxu1  ;;  %v6240_v12 = vpop.f32.mrb[70].mxu0 }
 0x195   : > { %v6153_v29 = vpop.f32.mrb[71].mxu1  ;;  %v6241_v19 = vpop.f32.mrb[71].mxu0 }
 0x196   : > { %v7741_v24 = vadd.f32 %v6151_v36, %v7654_v25  ;;  %v6154_v45 = vadd.f32 %v6153_v29, %v6152_v46  ;;  %v7743_v4 = vadd.f32 %v6241_v19, %v6240_v12 }
 0x198   : > { %v7746_v6 = vadd.f32 %v6154_v45, %v7657_v35 }
 0x19a   : > { %v6155_v18 = vpop.f32.mrb[72].mxu1  ;;  %v6243_v61 = vpop.f32.mrb[72].mxu0 }
 0x19b   : > { %v6156_v21 = vpop.f32.mrb[73].mxu1  ;;  %v6244_v22 = vpop.f32.mrb[73].mxu0 }
 0x19c   : > { %v6157_v63 = vadd.f32 %v6156_v21, %v6155_v18  ;;  %v6245_v31 = vadd.f32 %v6244_v22, %v6243_v61  ;;  %v6158_v34 = vpop.f32.mrb[74].mxu1  ;;  %v6246_v33 = vpop.f32.mrb[74].mxu0 }
 0x19d   : > { %v6159_v40 = vpop.f32.mrb[75].mxu1  ;;  %v6247_v11 = vpop.f32.mrb[75].mxu0 }
 0x19e   : > { %v7749_v43 = vadd.f32 %v6157_v63, %v7666_v52  ;;  %v6160_v25 = vadd.f32 %v6159_v40, %v6158_v34  ;;  %v6248_v23 = vadd.f32 %v6247_v11, %v6246_v33  ;;  %v7752_v13 = vadd.f32 %v7670_v0, %v6245_v31 }
 0x1a0   : > { %v7755_v35 = vadd.f32 %v6160_v25, %v7672_v2  ;;  %v7758_v27 = vadd.f32 %v7675_v3, %v6248_v23 }
 0x1a2   : > { %v6161_v58 = vpop.f32.mrb[76].mxu1  ;;  %v6249_v60 = vpop.f32.mrb[76].mxu0 }
 0x1a3   : > { %v6162_v10 = vpop.f32.mrb[77].mxu1  ;;  %v6250_v8 = vpop.f32.mrb[77].mxu0 }
 0x1a4   : > { %v6163_v15 = vadd.f32 %v6162_v10, %v6161_v58  ;;  %v6251_v16 = vadd.f32 %v6250_v8, %v6249_v60  ;;  %v6164_v36 = vpop.f32.mrb[78].mxu1  ;;  %v6252_v52 = vpop.f32.mrb[78].mxu0 }
 0x1a5   : > { %v6165_v46 = vpop.f32.mrb[79].mxu1  ;;  %v6253_v12 = vpop.f32.mrb[79].mxu0 }
 0x1a6   : > { %v7761_v29 = vadd.f32 %v6163_v15, %v7678_v38  ;;  %v6166_v0 = vadd.f32 %v6165_v46, %v6164_v36  ;;  %v6254_v19 = vadd.f32 %v6253_v12, %v6252_v52  ;;  %v7764_v2 = vadd.f32 %v7681_v37, %v6251_v16 }
 0x1a8   : > { %v7767_v3 = vadd.f32 %v6166_v0, %v7683_v53  ;;  %v7770_v45 = vadd.f32 %v7686_v39, %v6254_v19 }
 0x1aa   : > { %v6167_v18 = vpop.f32.mrb[80].mxu1  ;;  %v6255_v61 = vpop.f32.mrb[80].mxu0 }
 0x1ab   : > { %v6168_v21 = vpop.f32.mrb[81].mxu1  ;;  %v6256_v22 = vpop.f32.mrb[81].mxu0 }
 0x1ac   : > { %v6169_v63 = vadd.f32 %v6168_v21, %v6167_v18  ;;  %v6257_v31 = vadd.f32 %v6256_v22, %v6255_v61  ;;  %v6170_v34 = vpop.f32.mrb[82].mxu1  ;;  %v6258_v38 = vpop.f32.mrb[82].mxu0 }
 0x1ad   : > { %v6171_v33 = vpop.f32.mrb[83].mxu1  ;;  %v6259_v40 = vpop.f32.mrb[83].mxu0 }
 0x1ae   : > { %v7773_v11 = vadd.f32 %v6169_v63, %v7688_v54  ;;  %v6172_v37 = vadd.f32 %v6171_v33, %v6170_v34  ;;  %v6260_v25 = vadd.f32 %v6259_v40, %v6258_v38  ;;  %v7776_v53 = vadd.f32 %v7691_v20, %v6257_v31 }
 0x1b0   : > { %v7779_v39 = vadd.f32 %v6172_v37, %v7693_v28  ;;  %v7782_v23 = vadd.f32 %v7696_v26, %v6260_v25 }
 0x1b2   : > { %v6173_v58 = vpop.f32.mrb[84].mxu1  ;;  %v6261_v60 = vpop.f32.mrb[84].mxu0 }
 0x1b3   : > { %v6174_v10 = vpop.f32.mrb[85].mxu1  ;;  %v6262_v8 = vpop.f32.mrb[85].mxu0 }
 0x1b4   : > { %v6175_v15 = vadd.f32 %v6174_v10, %v6173_v58  ;;  %v6263_v16 = vadd.f32 %v6262_v8, %v6261_v60  ;;  %v6176_v36 = vpop.f32.mrb[86].mxu1  ;;  %v6264_v54 = vpop.f32.mrb[86].mxu0 }
 0x1b5   : > { %v6177_v52 = vpop.f32.mrb[87].mxu1  ;;  %v6265_v46 = vpop.f32.mrb[87].mxu0 }
 0x1b6   : > { %v7785_v12 = vadd.f32 %v6175_v15, %v7698_v42  ;;  %v6178_v20 = vadd.f32 %v6177_v52, %v6176_v36  ;;  %v6266_v0 = vadd.f32 %v6265_v46, %v6264_v54  ;;  %v7788_v28 = vadd.f32 %v7701_v30, %v6263_v16 }
 0x1b8   : > { %v7791_v26 = vadd.f32 %v6178_v20, %v7703_v56  ;;  %v7794_v19 = vadd.f32 %v7706_v41, %v6266_v0 }
 0x1ba   : > { %v6179_v18 = vpop.f32.mrb[88].mxu1  ;;  %v6267_v61 = vpop.f32.mrb[88].mxu0 }
 0x1bb   : > { %v6180_v21 = vpop.f32.mrb[89].mxu1  ;;  %v6268_v22 = vpop.f32.mrb[89].mxu0 }
 0x1bc   : > { %v6181_v63 = vadd.f32 %v6180_v21, %v6179_v18  ;;  %v6269_v31 = vadd.f32 %v6268_v22, %v6267_v61  ;;  %v6182_v34 = vpop.f32.mrb[90].mxu1  ;;  %v6270_v42 = vpop.f32.mrb[90].mxu0 }
 0x1bd   : > { %v6183_v38 = vpop.f32.mrb[91].mxu1  ;;  %v6271_v33 = vpop.f32.mrb[91].mxu0 }
 0x1be   : > { %v7797_v40 = vadd.f32 %v6181_v63, %v7708_v14  ;;  %v6184_v30 = vadd.f32 %v6183_v38, %v6182_v34  ;;  %v6272_v37 = vadd.f32 %v6271_v33, %v6270_v42  ;;  %v7800_v56 = vadd.f32 %v7711_v48, %v6269_v31 }
 0x1c0   : > { %v7803_v41 = vadd.f32 %v6184_v30, %v7713_v50  ;;  %v7806_v25 = vadd.f32 %v7716_v55, %v6272_v37 }
 0x1c2   : > { %v6185_v58 = vpop.f32.mrb[92].mxu1  ;;  %v6273_v60 = vpop.f32.mrb[92].mxu0 }
 0x1c3   : > { %v6186_v10 = vpop.f32.mrb[93].mxu1  ;;  %v6274_v8 = vpop.f32.mrb[93].mxu0 }
 0x1c4   : > { %v6187_v15 = vadd.f32 %v6186_v10, %v6185_v58  ;;  %v6275_v16 = vadd.f32 %v6274_v8, %v6273_v60  ;;  %v6188_v36 = vpop.f32.mrb[94].mxu1  ;;  %v6276_v14 = vpop.f32.mrb[94].mxu0 }
 0x1c5   : > { %v6189_v54 = vpop.f32.mrb[95].mxu1  ;;  %v6277_v52 = vpop.f32.mrb[95].mxu0 }
 0x1c6   : > { %v7809_v46 = vadd.f32 %v6187_v15, %v7718_v47  ;;  %v6190_v48 = vadd.f32 %v6189_v54, %v6188_v36  ;;  %v6278_v20 = vadd.f32 %v6277_v52, %v6276_v14  ;;  %v7812_v50 = vadd.f32 %v7721_v57, %v6275_v16 }
 0x1c8   : > { %v7815_v55 = vadd.f32 %v6190_v48, %v7723_v5  ;;  %v7818_v0 = vadd.f32 %v7726_v1, %v6278_v20 }
 0x1ca   : > { %v6430_v18 = vpop.f32.mrb[0].mxu1  ;;  %v6279_v61 = vpop.f32.mrb[96].mxu0 }
 0x1cb   : > { %v6557_v21 = vadd.f32 %v7660_v59, %v6430_v18  ;;  %v1492_v22 = vpop.f32.mrb[1].mxu1  ;;  %v6280_v63 = vpop.f32.mrb[97].mxu0 }
 0x1cc   : > { %v6561_v47 = vadd.f32 %v7648_v51, %v1492_v22  ;;  %v6281_v31 = vadd.f32 %v6280_v63, %v6279_v61  ;;  %v6431_v34 = vpop.f32.mrb[2].mxu1  ;;  %v6282_v42 = vpop.f32.mrb[98].mxu0 }
 0x1cd   : > { %v6565_v57 = vadd.f32 %v7663_v7, %v6431_v34  ;;  %v1495_v38 = vpop.f32.mrb[3].mxu1  ;;  %v6283_v33 = vpop.f32.mrb[99].mxu0  ;;  %v7824_v5 = vadd.f32 %v6557_v21, %v7738_v44 }
 0x1ce   : > { %v6569_v1 = vadd.f32 %v7651_v17, %v1495_v38  ;;  %v6284_v30 = vadd.f32 %v6283_v33, %v6282_v42  ;;  %v7828_v37 = vadd.f32 %v6561_v47, %v7728_v49  ;;  %v7831_v59 = vadd.f32 %v7731_v9, %v6281_v31 }
 0x1cf   : > { %v7834_v51 = vadd.f32 %v6565_v57, %v7743_v4 }
 0x1d0   : > { %v7837_v58 = vadd.f32 %v6569_v1, %v7733_v62  ;;  %v7840_v7 = vadd.f32 %v7736_v32, %v6284_v30 }
 0x1d2   : > { %v6285_v44 = vpop.f32.mrb[100].mxu0 }
 0x1d3   : > { %v6286_v60 = vpop.f32.mrb[101].mxu0 }
 0x1d4   : > { %v6287_v10 = vadd.f32 %v6286_v60, %v6285_v44  ;;  %v6288_v17 = vpop.f32.mrb[102].mxu0 }
 0x1d5   : > { %v6289_v8 = vpop.f32.mrb[103].mxu0 }
 0x1d6   : > { %v6290_v15 = vadd.f32 %v6289_v8, %v6288_v17  ;;  %v7843_v49 = vadd.f32 %v7741_v24, %v6287_v10 }
 0x1d8   : > { %v7846_v9 = vadd.f32 %v7746_v6, %v6290_v15 }
 0x1da   : > { %v6291_v4 = vpop.f32.mrb[104].mxu0 }
 0x1db   : > { %v6292_v16 = vpop.f32.mrb[105].mxu0 }
 0x1dc   : > { %v6293_v36 = vadd.f32 %v6292_v16, %v6291_v4  ;;  %v6294_v62 = vpop.f32.mrb[106].mxu0 }
 0x1dd   : > { %v6295_v14 = vpop.f32.mrb[107].mxu0 }
 0x1de   : > { %v6296_v54 = vadd.f32 %v6295_v14, %v6294_v62  ;;  %v7849_v32 = vadd.f32 %v7749_v43, %v6293_v36 }
 0x1e0   : > { %v7852_v52 = vadd.f32 %v7755_v35, %v6296_v54 }
 0x1e2   : > { %v6297_v48 = vpop.f32.mrb[108].mxu0 }
 0x1e3   : > { %v6298_v20 = vpop.f32.mrb[109].mxu0 }
 0x1e4   : > { %v6299_v18 = vadd.f32 %v6298_v20, %v6297_v48  ;;  %v6300_v24 = vpop.f32.mrb[110].mxu0 }
 0x1e5   : > { %v6301_v61 = vpop.f32.mrb[111].mxu0 }
 0x1e6   : > { %v6302_v21 = vadd.f32 %v6301_v61, %v6300_v24  ;;  %v7855_v6 = vadd.f32 %v7761_v29, %v6299_v18 }
 0x1e8   : > { %v7858_v22 = vadd.f32 %v7767_v3, %v6302_v21 }
 0x1ea   : > { %v6303_v63 = vpop.f32.mrb[112].mxu0 }
 0x1eb   : > { %v6304_v47 = vpop.f32.mrb[113].mxu0 }
 0x1ec   : > { %v6305_v31 = vadd.f32 %v6304_v47, %v6303_v63  ;;  %v6306_v43 = vpop.f32.mrb[114].mxu0 }
 0x1ed   : > { %v6307_v34 = vpop.f32.mrb[115].mxu0 }
 0x1ee   : > { %v6308_v42 = vadd.f32 %v6307_v34, %v6306_v43  ;;  %v7861_v35 = vadd.f32 %v7773_v11, %v6305_v31  ;;  %v7904_v43 = vld [vmem:[%s10022_s2 + $0x1] ss:$0 sm:$0xff] }
 0x1f0   : > { %v7864_v57 = vadd.f32 %v7779_v39, %v6308_v42 }
 0x1f2   : > { %v6309_v38 = vpop.f32.mrb[116].mxu0 }
 0x1f3   : > { %v6310_v33 = vpop.f32.mrb[117].mxu0 }
 0x1f4   : > { %v6311_v1 = vadd.f32 %v6310_v33, %v6309_v38  ;;  %v6312_v29 = vpop.f32.mrb[118].mxu0 }
 0x1f5   : > { %v6313_v30 = vpop.f32.mrb[119].mxu0 }
 0x1f6   : > { %v6314_v44 = vadd.f32 %v6313_v30, %v6312_v29  ;;  %v7867_v3 = vadd.f32 %v7785_v12, %v6311_v1  ;;  %v7931_v30 = vld [vmem:[%s10022_s2 + $0x2] ss:$0 sm:$0xff] }
 0x1f8   : > { %v7870_v60 = vadd.f32 %v7791_v26, %v6314_v44 }
 0x1fa   : > { %v6315_v10 = vpop.f32.mrb[120].mxu0 }
 0x1fb   : > { %v6316_v17 = vpop.f32.mrb[121].mxu0 }
 0x1fc   : > { %v6317_v8 = vadd.f32 %v6316_v17, %v6315_v10  ;;  %v6318_v11 = vpop.f32.mrb[122].mxu0 }
 0x1fd   : > { %v6319_v15 = vpop.f32.mrb[123].mxu0 }
 0x1fe   : > { %v6320_v4 = vadd.f32 %v6319_v15, %v6318_v11  ;;  %v7873_v39 = vadd.f32 %v7797_v40, %v6317_v8  ;;  %v7887_v40 = vld [vmem:[%s10022_s2] ss:$0 sm:$0xff] }
 0x200   : > { %v7876_v16 = vadd.f32 %v7803_v41, %v6320_v4 }
 0x202   : > { %v6321_v36 = vpop.f32.mrb[124].mxu0 }
 0x203   : > { %v6322_v62 = vpop.f32.mrb[125].mxu0 }
 0x204   : > { %v6323_v14 = vadd.f32 %v6322_v62, %v6321_v36  ;;  %v6324_v12 = vpop.f32.mrb[126].mxu0 }
 0x205   : > { %v6325_v54 = vpop.f32.mrb[127].mxu0 }
 0x206   : > { %v6326_v48 = vadd.f32 %v6325_v54, %v6324_v12  ;;  %v7879_v26 = vadd.f32 %v7809_v46, %v6323_v14 }
 0x208   : > { %v7882_v20 = vadd.f32 %v7815_v55, %v6326_v48 }
 0x20a   : > { %v6478_v18 = vpop.f32.mrb[128].mxu0  ;;  %v6482_v24 = vpop.f32.mrb[4].mxu1 }
 0x20b   : > { %v7890_v41 = vadd.f32 %v7824_v5, %v6478_v18  ;;  %v7893_v61 = vadd.f32 %v7764_v2, %v6482_v24  ;;  %v2326_v21 = vpop.f32.mrb[129].mxu0  ;;  %v2342_v63 = vpop.f32.mrb[5].mxu1 }
 0x20c   : > { %v7896_v46 = vadd.f32 %v7828_v37, %v2326_v21  ;;  %v7899_v55 = vadd.f32 %v7752_v13, %v2342_v63  ;;  %v6479_v47 = vpop.f32.mrb[130].mxu0  ;;  %v6483_v31 = vpop.f32.mrb[6].mxu1 }
 0x20d   : > { %v7907_v5 = vadd.f32 %v7834_v51, %v6479_v47  ;;  %v7910_v2 = vadd.f32 %v7770_v45, %v6483_v31  ;;  %v2329_v34 = vpop.f32.mrb[131].mxu0  ;;  %v2345_v37 = vpop.f32.mrb[7].mxu1  ;;  %v2496_v13 = vmul.f32 %v7893_v61, %v7887_v40  ;;  %v2492_v42 = vmul.f32 %v7890_v41, %v7887_v40 }
 0x20e   : > { %v7917_v38 = vadd.f32 %v7837_v58, %v2329_v34  ;;  %v7920_v33 = vadd.f32 %v7758_v27, %v2345_v37  ;;  %v2626_v45 = vmul.f32 %v7890_v41, %v7904_v43  ;;  %v2759_v27 = vmul.f32 %v7890_v41, %v7931_v30  ;;  %v7972_v34 = vld [vmem:[%s10022_s2 + $0x3] ss:$0 sm:$0xff] }
 0x20f   : > { %v2541_v51 = vsel %vm2522_vm0, %v2496_v13, 0.0  ;;  %v2529_v1 = vsel %vm2522_vm0, %v2492_v42, 0.0  ;;  %v2493_v29 = vmul.f32 %v7907_v5, %v7887_v40  ;;  %v2497_v11 = vmul.f32 %v7910_v2, %v7887_v40 }
 0x210   : > { %2542 = vadd.xlane.f32.xlu0 %v2541_v51  ;;  %2530 = vadd.xlane.f32.xlu1 %v2529_v1  ;;  %v2662_v17 = vsel %vm2522_vm0, %v2626_v45, 0.0  ;;  %v2795_v14 = vsel %vm2522_vm0, %v2759_v27, 0.0  ;;  %v2630_v54 = vmul.f32 %v7893_v61, %v7904_v43  ;;  %v2760_v63 = vmul.f32 %v7907_v5, %v7931_v30  ;;  %v7989_v45 = vld [vmem:[%s10022_s2 + $0x4] ss:$0 sm:$0xff] }
 0x211   : > { %v2532_v8 = vsel %vm2522_vm0, %v2493_v29, 0.0  ;;  %v2544_v12 = vsel %vm2522_vm0, %v2497_v11, 0.0  ;;  %v3491_v51 = vmul.f32 %v7890_v41, %v7972_v34  ;;  %v2631_v1 = vmul.f32 %v7910_v2, %v7904_v43 }
 0x212   : > { %v6486_v58 = vpop.f32.mrb[8].mxu1  ;;  %v2674_v24 = vsel %vm2522_vm0, %v2630_v54, 0.0 }
 0x213   : > { %v7936_v44 = vadd.f32 %v7788_v28, %v6486_v58  ;;  %v2358_v10 = vpop.f32.mrb[9].mxu1  ;;  %v3527_v27 = vsel %vm2522_vm0, %v3491_v51, 0.0 }
 0x214   : > { %v7943_v15 = vadd.f32 %v7776_v53, %v2358_v10  ;;  %v6487_v4 = vpop.f32.mrb[10].mxu1  ;;  %2663 = vadd.xlane.f32.xlu0 %v2662_v17  ;;  %2533 = vadd.xlane.f32.xlu1 %v2532_v8  ;;  %v2627_v53 = vmul.f32 %v7907_v5, %v7904_v43  ;;  %v2677_v10 = vsel %vm2522_vm0, %v2631_v1, 0.0  ;;  %v2764_v17 = vmul.f32 %v7910_v2, %v7931_v30 }
 0x215   : > { %v7946_v36 = vadd.f32 %v7794_v19, %v6487_v4  ;;  %v2361_v62 = vpop.f32.mrb[11].mxu1  ;;  %v2763_v19 = vmul.f32 %v7893_v61, %v7931_v30  ;;  %v8006_v4 = vld [vmem:[%s10022_s2 + $0x5] ss:$0 sm:$0xff]  ;;  %v3628_v1 = vmul.f32 %v7893_v61, %v7989_v45 }
 0x216   : > { %v7949_v28 = vadd.f32 %v7782_v23, %v2361_v62  ;;  %v2665_v21 = vsel %vm2522_vm0, %v2627_v53, 0.0  ;;  %v3757_v54 = vmul.f32 %v7890_v41, %v8006_v4  ;;  %v3492_v53 = vmul.f32 %v7907_v5, %v7972_v34 }
 0x217   : > { %v2807_v42 = vsel %vm2522_vm0, %v2763_v19, 0.0 }
 0x218   : > { %2796 = vadd.xlane.f32.xlu0 %v2795_v14  ;;  %2545 = vadd.xlane.f32.xlu1 %v2544_v12 }
 0x21a   : > { %v6490_v48 = vpop.f32.mrb[12].mxu1 }
 0x21b   : > { %v7960_v18 = vadd.f32 %v7812_v50, %v6490_v48  ;;  %v2374_v23 = vpop.f32.mrb[13].mxu1 }
 0x21c   : > { %v7967_v47 = vadd.f32 %v7800_v56, %v2374_v23  ;;  %v6491_v31 = vpop.f32.mrb[14].mxu1  ;;  %2675 = vadd.xlane.f32.xlu0 %v2674_v24  ;;  %2666 = vadd.xlane.f32.xlu1 %v2665_v21  ;;  %v2798_v56 = vsel %vm2522_vm0, %v2760_v63, 0.0  ;;  %v3793_v23 = vsel %vm2522_vm0, %v3757_v54, 0.0  ;;  %v3530_v24 = vsel %vm2522_vm0, %v3492_v53, 0.0 }
 0x21d   : > { %v7975_v50 = vadd.f32 %v7818_v0, %v6491_v31  ;;  %v2377_v37 = vpop.f32.mrb[15].mxu1  ;;  %v3625_v21 = vmul.f32 %v7907_v5, %v7989_v45 }
 0x21e   : > { %v7978_v13 = vadd.f32 %v7806_v25, %v2377_v37  ;;  %v3624_v25 = vmul.f32 %v7890_v41, %v7989_v45 }
 0x21f   : > { %v3663_v51 = vsel %vm2522_vm0, %v3625_v21, 0.0 }
 0x220   : > { %2808 = vadd.xlane.f32.xlu0 %v2807_v42  ;;  %2799 = vadd.xlane.f32.xlu1 %v2798_v56  ;;  %v3660_v12 = vsel %vm2522_vm0, %v3624_v25, 0.0 }
 0x222   : > { %v6494_v0 = vpop.f32.mrb[16].mxu1 }
 0x223   : > { %v7994_v29 = vadd.f32 %v7843_v49, %v6494_v0  ;;  %v2390_v58 = vpop.f32.mrb[17].mxu1 }
 0x224   : > { %v8001_v8 = vadd.f32 %v7831_v59, %v2390_v58  ;;  %v6495_v11 = vpop.f32.mrb[18].mxu1  ;;  %3528 = vadd.xlane.f32.xlu0 %v3527_v27  ;;  %2678 = vadd.xlane.f32.xlu1 %v2677_v10  ;;  %v2810_v59 = vsel %vm2522_vm0, %v2764_v17, 0.0  ;;  %v3672_v58 = vsel %vm2522_vm0, %v3628_v1, 0.0  ;;  %v3496_v10 = vmul.f32 %v7910_v2, %v7972_v34 }
 0x225   : > { %v8009_v49 = vadd.f32 %v7846_v9, %v6495_v11  ;;  %v2393_v62 = vpop.f32.mrb[19].mxu1  ;;  %v3495_v9 = vmul.f32 %v7893_v61, %v7972_v34 }
 0x226   : > { %v8012_v14 = vadd.f32 %v7840_v7, %v2393_v62  ;;  %v8059_v62 = vld [vmem:[%s10022_s2 + $0x6] ss:$0 sm:$0xff] }
 0x227   : > { %v3539_v56 = vsel %vm2522_vm0, %v3495_v9, 0.0  ;;  %v4470_v53 = vmul.f32 %v7890_v41, %v8059_v62  ;;  %v8076_v9 = vld [vmem:[%s10022_s2 + $0x7] ss:$0 sm:$0xff] }
 0x228   : > { %3661 = vadd.xlane.f32.xlu0 %v3660_v12  ;;  %2811 = vadd.xlane.f32.xlu1 %v2810_v59 }
 0x22a   : > { %v6498_v48 = vpop.f32.mrb[20].mxu1 }
 0x22b   : > { %v8023_v19 = vadd.f32 %v7855_v6, %v6498_v48  ;;  %v2406_v7 = vpop.f32.mrb[21].mxu1  ;;  %v3629_v48 = vmul.f32 %v7910_v2, %v7989_v45 }
 0x22c   : > { %v8030_v63 = vadd.f32 %v7849_v32, %v2406_v7  ;;  %v6499_v31 = vpop.f32.mrb[22].mxu1  ;;  %3794 = vadd.xlane.f32.xlu0 %v3793_v23  ;;  %3531 = vadd.xlane.f32.xlu1 %v3530_v24  ;;  %v3758_v32 = vmul.f32 %v7907_v5, %v8006_v4  ;;  %v4506_v24 = vsel %vm2522_vm0, %v4470_v53, 0.0 }
 0x22d   : > { %v8033_v37 = vadd.f32 %v7858_v22, %v6499_v31  ;;  %v2409_v42 = vpop.f32.mrb[23].mxu1  ;;  %v3761_v22 = vmul.f32 %v7893_v61, %v8006_v4  ;;  %v3675_v21 = vsel %vm2522_vm0, %v3629_v48, 0.0  ;;  %v3762_v31 = vmul.f32 %v7910_v2, %v8006_v4 }
 0x22e   : > { %v8036_v6 = vadd.f32 %v7852_v52, %v2409_v42  ;;  %v3796_v27 = vsel %vm2522_vm0, %v3758_v32, 0.0  ;;  %v4475_v48 = vmul.f32 %v7910_v2, %v8059_v62 }
 0x22f   : > { %v3805_v54 = vsel %vm2522_vm0, %v3761_v22, 0.0 }
 0x230   : > { %3540 = vadd.xlane.f32.xlu0 %v3539_v56  ;;  %3664 = vadd.xlane.f32.xlu1 %v3663_v51  ;;  %v8093_v51 = vld [vmem:[%s10022_s2 + $0x8] ss:$0 sm:$0xff] }
 0x231   : > { %v4736_v22 = vmul.f32 %v7890_v41, %v8093_v51  ;;  %v4740_v53 = vmul.f32 %v7893_v61, %v8093_v51 }
 0x232   : > { %v6502_v0 = vpop.f32.mrb[24].mxu1 }
 0x233   : > { %v8047_v25 = vadd.f32 %v7867_v3, %v6502_v0  ;;  %v2422_v52 = vpop.f32.mrb[25].mxu1 }
 0x234   : > { %v8054_v17 = vadd.f32 %v7861_v35, %v2422_v52  ;;  %v6503_v11 = vpop.f32.mrb[26].mxu1  ;;  %3673 = vadd.xlane.f32.xlu0 %v3672_v58  ;;  %3797 = vadd.xlane.f32.xlu1 %v3796_v27  ;;  %v3542_v35 = vsel %vm2522_vm0, %v3496_v10, 0.0  ;;  %v4471_v52 = vmul.f32 %v7907_v5, %v8059_v62  ;;  %v4772_v58 = vsel %vm2522_vm0, %v4736_v22, 0.0 }
 0x235   : > { %v8062_v3 = vadd.f32 %v7870_v60, %v6503_v11  ;;  %v2425_v12 = vpop.f32.mrb[27].mxu1  ;;  %v4604_v27 = vmul.f32 %v7907_v5, %v8076_v9  ;;  %v4607_v11 = vmul.f32 %v7893_v61, %v8076_v9 }
 0x236   : > { %v8065_v59 = vadd.f32 %v7864_v57, %v2425_v12  ;;  %v4603_v57 = vmul.f32 %v7890_v41, %v8076_v9  ;;  %v4737_v12 = vmul.f32 %v7907_v5, %v8093_v51  ;;  %v4608_v5 = vmul.f32 %v7910_v2, %v8076_v9 }
 0x237   : > { %v4642_v41 = vsel %vm2522_vm0, %v4604_v27, 0.0  ;;  %v2629_v27 = vmul.f32 %v7920_v33, %v7904_v43 }
 0x238   : > { %3806 = vadd.xlane.f32.xlu0 %v3805_v54  ;;  %3543 = vadd.xlane.f32.xlu1 %v3542_v35  ;;  %v4639_v0 = vsel %vm2522_vm0, %v4603_v57, 0.0  ;;  %v4651_v54 = vsel %vm2522_vm0, %v4607_v11, 0.0  ;;  %v4775_v35 = vsel %vm2522_vm0, %v4737_v12, 0.0  ;;  %v4521_v57 = vsel %vm2522_vm0, %v4475_v48, 0.0 }
 0x239   : > { %v2758_v12 = vmul.f32 %v7917_v38, %v7931_v30  ;;  %v2762_v48 = vmul.f32 %v7920_v33, %v7931_v30 }
 0x23a   : > { %v6506_v60 = vpop.f32.mrb[28].mxu1 }
 0x23b   : > { %v8081_v7 = vadd.f32 %v7879_v26, %v6506_v60  ;;  %v2438_v23 = vpop.f32.mrb[29].mxu1  ;;  %v4784_v60 = vsel %vm2522_vm0, %v4740_v53, 0.0 }
 0x23c   : > { %v8088_v42 = vadd.f32 %v7873_v39, %v2438_v23  ;;  %v6507_v56 = vpop.f32.mrb[30].mxu1  ;;  %4507 = vadd.xlane.f32.xlu0 %v4506_v24  ;;  %3676 = vadd.xlane.f32.xlu1 %v3675_v21  ;;  %v3808_v39 = vsel %vm2522_vm0, %v3762_v31, 0.0  ;;  %v2490_v23 = vmul.f32 %v7896_v46, %v7887_v40  ;;  %v4654_v24 = vsel %vm2522_vm0, %v4608_v5, 0.0 }
 0x23d   : > { %10033 = vst [vmem:[#allocation5_spill] sm:$0xff] %v8081_v7  ;;  %v8096_v26 = vadd.f32 %v7882_v20, %v6507_v56  ;;  %v2441_v1 = vpop.f32.mrb[31].mxu1  ;;  %v4509_v20 = vsel %vm2522_vm0, %v4471_v52, 0.0  ;;  %v4741_v21 = vmul.f32 %v7910_v2, %v8093_v51  ;;  %v2494_v31 = vmul.f32 %v7899_v55, %v7887_v40 }
 0x23e   : > { %10034 = vst [vmem:[#allocation6_spill] sm:$0xff] %v8088_v42  ;;  %v8099_v32 = vadd.f32 %v7876_v16, %v2441_v1  ;;  %v4474_v16 = vmul.f32 %v7893_v61, %v8059_v62  ;;  %v2523_v61 = vsel %vm2522_vm0, %v2490_v23, 0.0  ;;  %v2625_v52 = vmul.f32 %v7917_v38, %v7904_v43 }
 0x23f   : > { %10035 = vst [vmem:[#allocation7_spill] sm:$0xff] %v8096_v26  ;;  %v4787_v56 = vsel %vm2522_vm0, %v4741_v21, 0.0  ;;  %v2535_v1 = vsel %vm2522_vm0, %v2494_v31, 0.0  ;;  %v3490_v23 = vmul.f32 %v7917_v38, %v7972_v34  ;;  %v3623_v31 = vmul.f32 %v7917_v38, %v7989_v45 }
 0x240   : > { %10036 = vst [vmem:[#allocation8_spill] sm:$0xff] %v8099_v32  ;;  %4640 = vadd.xlane.f32.xlu0 %v4639_v0  ;;  %3809 = vadd.xlane.f32.xlu1 %v3808_v39  ;;  %v4518_v10 = vsel %vm2522_vm0, %v4474_v16, 0.0  ;;  %v2495_v0 = vmul.f32 %v7920_v33, %v7887_v40  ;;  %v2624_v39 = vmul.f32 %v7896_v46, %v7904_v43 }
 0x241   : > { %v3763_v42 = vmul.f32 %v7943_v15, %v8006_v4  ;;  %v4476_v32 = vmul.f32 %v7943_v15, %v8059_v62  ;;  %v4609_v7 = vmul.f32 %v7943_v15, %v8076_v9  ;;  %v4742_v26 = vmul.f32 %v7943_v15, %v8093_v51 }
 0x242   : > { %v2538_v22 = vsel %vm2522_vm0, %v2495_v0, 0.0  ;;  %v2656_v2 = vsel %vm2522_vm0, %v2624_v39, 0.0  ;;  %v3494_v39 = vmul.f32 %v7920_v33, %v7972_v34 }
 0x244   : > { %4773 = vadd.xlane.f32.xlu0 %v4772_v58  ;;  %4510 = vadd.xlane.f32.xlu1 %v4509_v20  ;;  %v2628_v58 = vmul.f32 %v7899_v55, %v7904_v43  ;;  %v2659_v20 = vsel %vm2522_vm0, %v2625_v52, 0.0 }
 0x246   : > { %v2668_v16 = vsel %vm2522_vm0, %v2628_v58, 0.0  ;;  %v3627_v58 = vmul.f32 %v7920_v33, %v7989_v45 }
 0x248   : > { %4519 = vadd.xlane.f32.xlu0 %v4518_v10  ;;  %4643 = vadd.xlane.f32.xlu1 %v4642_v41  ;;  %v2757_v10 = vmul.f32 %v7896_v46, %v7931_v30  ;;  %v2671_v41 = vsel %vm2522_vm0, %v2629_v27, 0.0 }
 0x24a   : > { %v2789_v11 = vsel %vm2522_vm0, %v2757_v10, 0.0  ;;  %v3756_v10 = vmul.f32 %v7917_v38, %v8006_v4 }
 0x24c   : > { %4652 = vadd.xlane.f32.xlu0 %v4651_v54  ;;  %4776 = vadd.xlane.f32.xlu1 %v4775_v35  ;;  %v2761_v54 = vmul.f32 %v7899_v55, %v7931_v30  ;;  %v2792_v35 = vsel %vm2522_vm0, %v2758_v12, 0.0 }
 0x24e   : > { %v2801_v53 = vsel %vm2522_vm0, %v2761_v54, 0.0  ;;  %v3760_v54 = vmul.f32 %v7920_v33, %v8006_v4 }
 0x250   : > { %4785 = vadd.xlane.f32.xlu0 %v4784_v60  ;;  %4522 = vadd.xlane.f32.xlu1 %v4521_v57  ;;  %v3489_v60 = vmul.f32 %v7896_v46, %v7972_v34  ;;  %v2804_v57 = vsel %vm2522_vm0, %v2762_v48, 0.0 }
 0x252   : > { %v3521_v5 = vsel %vm2522_vm0, %v3489_v60, 0.0  ;;  %v4469_v60 = vmul.f32 %v7917_v38, %v8059_v62 }
 0x254   : > { %4655 = vadd.xlane.f32.xlu1 %v4654_v24  ;;  %2524 = vadd.xlane.f32.xlu0 %v2523_v61  ;;  %v3622_v24 = vmul.f32 %v7896_v46, %v7989_v45  ;;  %v3524_v61 = vsel %vm2522_vm0, %v3490_v23, 0.0 }
 0x256   : > { %v3654_v21 = vsel %vm2522_vm0, %v3622_v24, 0.0  ;;  %v4602_v24 = vmul.f32 %v7917_v38, %v8076_v9 }
 0x258   : > { %4788 = vadd.xlane.f32.xlu1 %v4787_v56  ;;  %2536 = vadd.xlane.f32.xlu0 %v2535_v1  ;;  %v3493_v56 = vmul.f32 %v7899_v55, %v7972_v34  ;;  %v3657_v1 = vsel %vm2522_vm0, %v3623_v31, 0.0 }
 0x25a   : > { %v3533_v0 = vsel %vm2522_vm0, %v3493_v56, 0.0  ;;  %v4473_v56 = vmul.f32 %v7920_v33, %v8059_v62 }
 0x25c   : > { %2539 = vadd.xlane.f32.xlu1 %v2538_v22  ;;  %2657 = vadd.xlane.f32.xlu0 %v2656_v2  ;;  %v3626_v22 = vmul.f32 %v7899_v55, %v7989_v45  ;;  %v3536_v2 = vsel %vm2522_vm0, %v3494_v39, 0.0 }
 0x25e   : > { %v3666_v52 = vsel %vm2522_vm0, %v3626_v22, 0.0  ;;  %v4606_v22 = vmul.f32 %v7920_v33, %v8076_v9 }
 0x260   : > { %2660 = vadd.xlane.f32.xlu1 %v2659_v20  ;;  %2669 = vadd.xlane.f32.xlu0 %v2668_v16  ;;  %v3755_v20 = vmul.f32 %v7896_v46, %v8006_v4  ;;  %v3669_v16 = vsel %vm2522_vm0, %v3627_v58, 0.0 }
 0x262   : > { %v3787_v27 = vsel %vm2522_vm0, %v3755_v20, 0.0  ;;  %v4735_v20 = vmul.f32 %v7917_v38, %v8093_v51 }
 0x264   : > { %2672 = vadd.xlane.f32.xlu1 %v2671_v41  ;;  %2790 = vadd.xlane.f32.xlu0 %v2789_v11  ;;  %v3759_v41 = vmul.f32 %v7899_v55, %v8006_v4  ;;  %v3790_v11 = vsel %vm2522_vm0, %v3756_v10, 0.0  ;;  %v4769_v10 = vsel %vm2522_vm0, %v4735_v20, 0.0  ;;  %v2767_v20 = vmul.f32 %v7936_v44, %v7931_v30 }
 0x266   : > { %v3799_v12 = vsel %vm2522_vm0, %v3759_v41, 0.0 }
 0x268   : > { %2793 = vadd.xlane.f32.xlu1 %v2792_v35  ;;  %2802 = vadd.xlane.f32.xlu0 %v2801_v53  ;;  %v4468_v35 = vmul.f32 %v7896_v46, %v8059_v62  ;;  %v3802_v53 = vsel %vm2522_vm0, %v3760_v54, 0.0 }
 0x26a   : > { %v4500_v48 = vsel %vm2522_vm0, %v4468_v35, 0.0 }
 0x26c   : > { %2805 = vadd.xlane.f32.xlu1 %v2804_v57  ;;  %3522 = vadd.xlane.f32.xlu0 %v3521_v5  ;;  %v4601_v57 = vmul.f32 %v7896_v46, %v8076_v9  ;;  %v4503_v5 = vsel %vm2522_vm0, %v4469_v60, 0.0  ;;  %v2500_v60 = vmul.f32 %v7936_v44, %v7887_v40 }
 0x26e   : > { %v4633_v23 = vsel %vm2522_vm0, %v4601_v57, 0.0 }
 0x270   : > { %3525 = vadd.xlane.f32.xlu1 %v3524_v61  ;;  %3655 = vadd.xlane.f32.xlu0 %v3654_v21  ;;  %v4472_v61 = vmul.f32 %v7899_v55, %v8059_v62  ;;  %v4636_v21 = vsel %vm2522_vm0, %v4602_v24, 0.0  ;;  %v2553_v24 = vsel %vm2522_vm0, %v2500_v60, 0.0  ;;  %v2819_v60 = vsel %vm2522_vm0, %v2767_v20, 0.0 }
 0x272   : > { %v4512_v31 = vsel %vm2522_vm0, %v4472_v61, 0.0  ;;  %v2635_v61 = vmul.f32 %v7946_v36, %v7904_v43 }
 0x274   : > { %3658 = vadd.xlane.f32.xlu1 %v3657_v1  ;;  %3534 = vadd.xlane.f32.xlu0 %v3533_v0  ;;  %v4605_v1 = vmul.f32 %v7899_v55, %v8076_v9  ;;  %v4515_v0 = vsel %vm2522_vm0, %v4473_v56, 0.0 }
 0x276   : > { %v4645_v39 = vsel %vm2522_vm0, %v4605_v1, 0.0 }
 0x278   : > { %3537 = vadd.xlane.f32.xlu1 %v3536_v2  ;;  %3667 = vadd.xlane.f32.xlu0 %v3666_v52  ;;  %v4734_v2 = vmul.f32 %v7896_v46, %v8093_v51  ;;  %v4648_v52 = vsel %vm2522_vm0, %v4606_v22, 0.0  ;;  %v4739_v46 = vmul.f32 %v7920_v33, %v8093_v51 }
 0x27a   : > { %v4766_v58 = vsel %vm2522_vm0, %v4734_v2, 0.0  ;;  %v2689_v2 = vsel %vm2522_vm0, %v2635_v61, 0.0 }
 0x27c   : > { %3670 = vadd.xlane.f32.xlu1 %v3669_v16  ;;  %3788 = vadd.xlane.f32.xlu0 %v3787_v27  ;;  %v4738_v16 = vmul.f32 %v7899_v55, %v8093_v51  ;;  %v2917_v27 = vlaneseq  ;;  %v4781_v55 = vsel %vm2522_vm0, %v4739_v46, 0.0 }
 0x27e   : > { %v4778_v41 = vsel %vm2522_vm0, %v4738_v16, 0.0  ;;  %v2920_v54 = vshrl.u32 %v2917_v27, 7 }
 0x280   : > { %3791 = vadd.xlane.f32.xlu1 %v3790_v11  ;;  %3800 = vadd.xlane.f32.xlu0 %v3799_v12  ;;  %v2491_v11 = vmul.f32 %v7917_v38, %v7887_v40  ;;  %v2918_v12 = vand.u32 127, %v2917_v27 }
 0x282   : > { %v2923_v35 = vadd.s32 4294967288, %v2918_v12  ;;  %v8245_v38 = vsub.s32 %v2918_v12, %v2920_v54  ;;  %v3125_v22 = vadd.s32 4294967272, %v2918_v12 }
 0x284   : > { %3803 = vadd.xlane.f32.xlu1 %v3802_v53  ;;  %4501 = vadd.xlane.f32.xlu0 %v4500_v48  ;;  %v2526_v53 = vsel %vm2522_vm0, %v2491_v11, 0.0  ;;  %v2501_v48 = vmul.f32 %v7946_v36, %v7887_v40 }
 0x288   : > { %4504 = vadd.xlane.f32.xlu1 %v4503_v5  ;;  %4634 = vadd.xlane.f32.xlu0 %v4633_v23  ;;  %v8247_v5 = vsub.s32 %v2923_v35, %v2920_v54  ;;  %v2556_v23 = vsel %vm2522_vm0, %v2501_v48, 0.0 }
 0x28c   : > { %4637 = vadd.xlane.f32.xlu1 %v4636_v21  ;;  %4513 = vadd.xlane.f32.xlu0 %v4512_v31  ;;  %v2634_v21 = vmul.f32 %v7936_v44, %v7904_v43  ;;  %v3120_v31 = vadd.s32 4294967280, %v2918_v12 }
 0x28e   : > { %v8266_v27 = vsub.s32 %v3120_v31, %v2920_v54 }
 0x290   : > { %4516 = vadd.xlane.f32.xlu1 %v4515_v0  ;;  %4646 = vadd.xlane.f32.xlu0 %v4645_v39 }
 0x294   : > { %4649 = vadd.xlane.f32.xlu1 %v4648_v52  ;;  %4767 = vadd.xlane.f32.xlu0 %v4766_v58  ;;  %v2686_v52 = vsel %vm2522_vm0, %v2634_v21, 0.0  ;;  %v2768_v58 = vmul.f32 %v7946_v36, %v7931_v30 }
 0x296   : > { %v2822_v48 = vsel %vm2522_vm0, %v2768_v58, 0.0 }
 0x298   : > { %4770 = vadd.xlane.f32.xlu1 %v4769_v10  ;;  %4779 = vadd.xlane.f32.xlu0 %v4778_v41  ;;  %v3315_v10 = vadd.s32 4294967264, %v2918_v12 }
 0x29a   : > { %v8282_v21 = vsub.s32 %v3315_v10, %v2920_v54 }
 0x29c   : > { %4782 = vadd.xlane.f32.xlu1 %v4781_v55  ;;  %2527 = vadd.xlane.f32.xlu0 %v2526_v53  ;;  %v8270_v55 = vsub.s32 %v3125_v22, %v2920_v54  ;;  %v3320_v53 = vadd.s32 4294967256, %v2918_v12  ;;  %v3633_v22 = vmul.f32 %v7946_v36, %v7989_v45 }
 0x29d   : > { %v2543_v33 = vpop.xlane.xlu0 %2542  ;;  %v2531_v57 = vpop.xlane.xlu1 %2530 }
 0x29e   : > { %v2933_v0 = vrot.slane %v2531_v57, %v8245_v38  ;;  %v2951_v11 = vrot.slane %v2543_v33, %v8245_v38  ;;  %v3500_v57 = vmul.f32 %v7946_v36, %v7972_v34  ;;  %v3687_v10 = vsel %vm2522_vm0, %v3633_v22, 0.0 }
 0x2a0   : > { %2557 = vadd.xlane.f32.xlu1 %v2556_v23  ;;  %2554 = vadd.xlane.f32.xlu0 %v2553_v24  ;;  %v3499_v23 = vmul.f32 %v7936_v44, %v7972_v34 }
 0x2a1   : > { %v2664_v56 = vpop.xlane.xlu0 %2663  ;;  %v2534_v1 = vpop.xlane.xlu1 %2533 }
 0x2a2   : > { %v2937_v39 = vrot.slane %v2534_v1, %v8247_v5  ;;  %v3135_v12 = vrot.slane %v2664_v56, %v8266_v27  ;;  %v8285_v1 = vsub.s32 %v3320_v53, %v2920_v54 }
 0x2a4   : > { %v8264_v16 = vsel %vm2928_vm1, %v2937_v39, %v2933_v0  ;;  %2690 = vadd.xlane.f32.xlu1 %v2689_v2  ;;  %2687 = vadd.xlane.f32.xlu0 %v2686_v52  ;;  %v3554_v0 = vsel %vm2522_vm0, %v3500_v57, 0.0  ;;  %v3551_v39 = vsel %vm2522_vm0, %v3499_v23, 0.0  ;;  %v3632_v2 = vmul.f32 %v7936_v44, %v7989_v45 }
 0x2a5   : > { %v2797_v41 = vpop.xlane.xlu0 %2796  ;;  %v2546_v46 = vpop.xlane.xlu1 %2545 }
 0x2a6   : > { %v2955_v35 = vrot.slane %v2546_v46, %v8247_v5  ;;  %v3330_v54 = vrot.slane %v2797_v41, %v8282_v21  ;;  %v3684_v46 = vsel %vm2522_vm0, %v3632_v2, 0.0 }
 0x2a8   : > { %v8279_v24 = vsel %vm2928_vm1, %v2955_v35, %v2951_v11  ;;  %2823 = vadd.xlane.f32.xlu1 %v2822_v48  ;;  %2820 = vadd.xlane.f32.xlu0 %v2819_v60  ;;  %v3766_v11 = vmul.f32 %v7946_v36, %v8006_v4  ;;  %v3765_v35 = vmul.f32 %v7936_v44, %v8006_v4 }
 0x2a9   : > { %v2676_v33 = vpop.xlane.xlu0 %2675  ;;  %v2667_v61 = vpop.xlane.xlu1 %2666 }
 0x2aa   : > { %v3139_v31 = vrot.slane %v2667_v61, %v8270_v55  ;;  %v3153_v41 = vrot.slane %v2676_v33, %v8266_v27  ;;  %v3820_v23 = vsel %vm2522_vm0, %v3766_v11, 0.0  ;;  %v3817_v61 = vsel %vm2522_vm0, %v3765_v35, 0.0 }
 0x2ac   : > { %v8294_v52 = vsel %vm3130_vm2, %v3139_v31, %v3135_v12  ;;  %3555 = vadd.xlane.f32.xlu1 %v3554_v0  ;;  %3552 = vadd.xlane.f32.xlu0 %v3551_v39  ;;  %v4479_v12 = vmul.f32 %v7946_v36, %v8059_v62  ;;  %v4478_v31 = vmul.f32 %v7936_v44, %v8059_v62 }
 0x2ad   : > { %v2809_v56 = vpop.xlane.xlu0 %2808  ;;  %v2800_v58 = vpop.xlane.xlu1 %2799 }
 0x2ae   : > { %v3334_v20 = vrot.slane %v2800_v58, %v8285_v1  ;;  %v3348_v33 = vrot.slane %v2809_v56, %v8282_v21  ;;  %v4533_v58 = vsel %vm2522_vm0, %v4479_v12, 0.0 }
 0x2b0   : > { %v8305_v53 = vsel %vm3325_vm3, %v3334_v20, %v3330_v54  ;;  %3688 = vadd.xlane.f32.xlu1 %v3687_v10  ;;  %3685 = vadd.xlane.f32.xlu0 %v3684_v46  ;;  %v4530_v54 = vsel %vm2522_vm0, %v4478_v31, 0.0  ;;  %v4612_v20 = vmul.f32 %v7946_v36, %v8076_v9  ;;  %v4611_v10 = vmul.f32 %v7936_v44, %v8076_v9 }
 0x2b1   : > { %v3529_v48 = vpop.xlane.xlu0 %3528  ;;  %v2679_v60 = vpop.xlane.xlu1 %2678 }
 0x2b2   : > { %v3157_v57 = vrot.slane %v2679_v60, %v8270_v55  ;;  %v3927_v56 = vrot.slane %v3529_v48, %v8245_v38 }
 0x2b4   : > { %v8316_v0 = vsel %vm3130_vm2, %v3157_v57, %v3153_v41  ;;  %3821 = vadd.xlane.f32.xlu1 %v3820_v23  ;;  %3818 = vadd.xlane.f32.xlu0 %v3817_v61  ;;  %v4666_v41 = vsel %vm2522_vm0, %v4612_v20, 0.0  ;;  %v4663_v57 = vsel %vm2522_vm0, %v4611_v10, 0.0  ;;  %v4745_v23 = vmul.f32 %v7946_v36, %v8093_v51 }
 0x2b5   : > { %v3662_v39 = vpop.xlane.xlu0 %3661  ;;  %v2812_v22 = vpop.xlane.xlu1 %2811  ;;  %v4744_v61 = vmul.f32 %v7936_v44, %v8093_v51  ;;  %v2499_v36 = vmul.f32 %v7949_v28, %v7887_v40  ;;  %v2498_v44 = vmul.f32 %v7943_v15, %v7887_v40 }
 0x2b6   : > { %v3352_v2 = vrot.slane %v2812_v22, %v8285_v1  ;;  %v4119_v48 = vrot.slane %v3662_v39, %v8266_v27 }
 0x2b8   : > { %v8327_v46 = vsel %vm3325_vm3, %v3352_v2, %v3348_v33  ;;  %4534 = vadd.xlane.f32.xlu1 %v4533_v58  ;;  %4531 = vadd.xlane.f32.xlu0 %v4530_v54  ;;  %v4799_v2 = vsel %vm2522_vm0, %v4745_v23, 0.0  ;;  %v4796_v58 = vsel %vm2522_vm0, %v4744_v61, 0.0 }
 0x2b9   : > { %v3795_v11 = vpop.xlane.xlu0 %3794  ;;  %v3532_v35 = vpop.xlane.xlu1 %3531 }
 0x2ba   : > { %v3931_v60 = vrot.slane %v3532_v35, %v8247_v5  ;;  %v4311_v39 = vrot.slane %v3795_v11, %v8282_v21 }
 0x2bc   : > { %v8338_v12 = vsel %vm2928_vm1, %v3931_v60, %v3927_v56  ;;  %4667 = vadd.xlane.f32.xlu1 %v4666_v41  ;;  %4664 = vadd.xlane.f32.xlu0 %v4663_v57  ;;  %v2550_v56 = vsel %vm2522_vm0, %v2499_v36, 0.0  ;;  %v2547_v60 = vsel %vm2522_vm0, %v2498_v44, 0.0  ;;  %v2633_v41 = vmul.f32 %v7949_v28, %v7904_v43 }
 0x2bd   : > { %v3541_v31 = vpop.xlane.xlu0 %3540  ;;  %v3665_v22 = vpop.xlane.xlu1 %3664  ;;  %v2632_v57 = vmul.f32 %v7943_v15, %v7904_v43  ;;  %v2765_v36 = vmul.f32 %v7943_v15, %v7931_v30 }
 0x2be   : > { %v4123_v33 = vrot.slane %v3665_v22, %v8270_v55  ;;  %v3945_v11 = vrot.slane %v3541_v31, %v8245_v38 }
 0x2c0   : > { %v8349_v54 = vsel %vm3130_vm2, %v4123_v33, %v4119_v48  ;;  %4800 = vadd.xlane.f32.xlu1 %v4799_v2  ;;  %4797 = vadd.xlane.f32.xlu0 %v4796_v58  ;;  %v2683_v33 = vsel %vm2522_vm0, %v2633_v41, 0.0  ;;  %v2680_v2 = vsel %vm2522_vm0, %v2632_v57, 0.0  ;;  %v2766_v58 = vmul.f32 %v7949_v28, %v7931_v30 }
 0x2c1   : > { %v3674_v20 = vpop.xlane.xlu0 %3673  ;;  %v3798_v10 = vpop.xlane.xlu1 %3797  ;;  %v3498_v41 = vmul.f32 %v7949_v28, %v7972_v34  ;;  %v3497_v57 = vmul.f32 %v7943_v15, %v7972_v34 }
 0x2c2   : > { %v4315_v35 = vrot.slane %v3798_v10, %v8285_v1  ;;  %v4137_v31 = vrot.slane %v3674_v20, %v8266_v27 }
 0x2c4   : > { %v8360_v23 = vsel %vm3325_vm3, %v4315_v35, %v4311_v39  ;;  %2551 = vadd.xlane.f32.xlu1 %v2550_v56  ;;  %2548 = vadd.xlane.f32.xlu0 %v2547_v60  ;;  %v2816_v56 = vsel %vm2522_vm0, %v2766_v58, 0.0  ;;  %v2813_v60 = vsel %vm2522_vm0, %v2765_v36, 0.0  ;;  %v3545_v58 = vsel %vm2522_vm0, %v3497_v57, 0.0 }
 0x2c5   : > { %v3807_v61 = vpop.xlane.xlu0 %3806  ;;  %v3544_v22 = vpop.xlane.xlu1 %3543  ;;  %v3631_v36 = vmul.f32 %v7949_v28, %v7989_v45 }
 0x2c6   : > { %v3949_v48 = vrot.slane %v3544_v22, %v8247_v5  ;;  %v4329_v20 = vrot.slane %v3807_v61, %v8282_v21 }
 0x2c8   : > { %v8371_v44 = vsel %vm2928_vm1, %v3949_v48, %v3945_v11  ;;  %2684 = vadd.xlane.f32.xlu1 %v2683_v33  ;;  %2681 = vadd.xlane.f32.xlu0 %v2680_v2  ;;  %v3548_v2 = vsel %vm2522_vm0, %v3498_v41, 0.0  ;;  %v3681_v41 = vsel %vm2522_vm0, %v3631_v36, 0.0 }
 0x2c9   : > { %v4508_v10 = vpop.xlane.xlu0 %4507  ;;  %v3677_v39 = vpop.xlane.xlu1 %3676 }
 0x2ca   : > { %v4141_v35 = vrot.slane %v3677_v39, %v8270_v55  ;;  %v3630_v39 = vmul.f32 %v7943_v15, %v7989_v45  ;;  %v4906_v61 = vrot.slane %v4508_v10, %v8245_v38  ;;  %v2504_v15 = vmul.f32 %v7960_v18, %v7887_v40 }
 0x2cc   : > { %v8382_v22 = vsel %vm3130_vm2, %v4141_v35, %v4137_v31  ;;  %2817 = vadd.xlane.f32.xlu1 %v2816_v56  ;;  %2814 = vadd.xlane.f32.xlu0 %v2813_v60  ;;  %v3678_v57 = vsel %vm2522_vm0, %v3630_v39, 0.0  ;;  %v3811_v39 = vsel %vm2522_vm0, %v3763_v42, 0.0  ;;  %v4524_v42 = vsel %vm2522_vm0, %v4476_v32, 0.0 }
 0x2cd   : > { %v4641_v11 = vpop.xlane.xlu0 %4640  ;;  %v3810_v48 = vpop.xlane.xlu1 %3809  ;;  %v4657_v32 = vsel %vm2522_vm0, %v4609_v7, 0.0 }
 0x2ce   : > { %v4333_v33 = vrot.slane %v3810_v48, %v8285_v1  ;;  %v3764_v48 = vmul.f32 %v7949_v28, %v8006_v4  ;;  %v5098_v10 = vrot.slane %v4641_v11, %v8266_v27 }
 0x2d0   : > { %v8393_v31 = vsel %vm3325_vm3, %v4333_v33, %v4329_v20  ;;  %3549 = vadd.xlane.f32.xlu1 %v3548_v2  ;;  %3546 = vadd.xlane.f32.xlu0 %v3545_v58  ;;  %v3814_v36 = vsel %vm2522_vm0, %v3764_v48, 0.0 }
 0x2d1   : > { %v4774_v35 = vpop.xlane.xlu0 %4773  ;;  %v4511_v56 = vpop.xlane.xlu1 %4510 }
 0x2d2   : > { %v4910_v60 = vrot.slane %v4511_v56, %v8247_v5  ;;  %v4477_v56 = vmul.f32 %v7949_v28, %v8059_v62  ;;  %v5290_v11 = vrot.slane %v4774_v35, %v8282_v21 }
 0x2d4   : > { %v8404_v20 = vsel %vm2928_vm1, %v4910_v60, %v4906_v61  ;;  %3682 = vadd.xlane.f32.xlu1 %v3681_v41  ;;  %3679 = vadd.xlane.f32.xlu0 %v3678_v57  ;;  %v4527_v48 = vsel %vm2522_vm0, %v4477_v56, 0.0 }
 0x2d5   : > { %v4520_v33 = vpop.xlane.xlu0 %4519  ;;  %v4644_v2 = vpop.xlane.xlu1 %4643 }
 0x2d6   : > { %v5102_v58 = vrot.slane %v4644_v2, %v8270_v55  ;;  %v4610_v2 = vmul.f32 %v7949_v28, %v8076_v9  ;;  %v4924_v35 = vrot.slane %v4520_v33, %v8245_v38 }
 0x2d8   : > { %v8415_v61 = vsel %vm3130_vm2, %v5102_v58, %v5098_v10  ;;  %3815 = vadd.xlane.f32.xlu1 %v3814_v36  ;;  %3812 = vadd.xlane.f32.xlu0 %v3811_v39  ;;  %v4660_v56 = vsel %vm2522_vm0, %v4610_v2, 0.0  ;;  %v4790_v2 = vsel %vm2522_vm0, %v4742_v26, 0.0  ;;  %v2565_v26 = vsel %vm2522_vm0, %v2504_v15, 0.0 }
 0x2d9   : > { %v4653_v60 = vpop.xlane.xlu0 %4652  ;;  %v4777_v41 = vpop.xlane.xlu1 %4776 }
 0x2da   : > { %v5294_v57 = vrot.slane %v4777_v41, %v8285_v1  ;;  %v4743_v41 = vmul.f32 %v7949_v28, %v8093_v51  ;;  %v5116_v33 = vrot.slane %v4653_v60, %v8266_v27  ;;  %v2505_v28 = vmul.f32 %v7975_v50, %v7887_v40 }
 0x2db   : > { %v2638_v40 = vmul.f32 %v7960_v18, %v7904_v43 }
 0x2dc   : > { %v8426_v10 = vsel %vm3325_vm3, %v5294_v57, %v5290_v11  ;;  %4528 = vadd.xlane.f32.xlu1 %v4527_v48  ;;  %4525 = vadd.xlane.f32.xlu0 %v4524_v42  ;;  %v4793_v7 = vsel %vm2522_vm0, %v4743_v41, 0.0 }
 0x2dd   : > { %v4786_v58 = vpop.xlane.xlu0 %4785  ;;  %v4523_v36 = vpop.xlane.xlu1 %4522 }
 0x2de   : > { %v4928_v39 = vrot.slane %v4523_v36, %v8247_v5  ;;  %v5308_v60 = vrot.slane %v4786_v58, %v8282_v21 }
 0x2e0   : > { %v8437_v11 = vsel %vm2928_vm1, %v4928_v39, %v4924_v35  ;;  %4661 = vadd.xlane.f32.xlu1 %v4660_v56  ;;  %4658 = vadd.xlane.f32.xlu0 %v4657_v32  ;;  %v2568_v56 = vsel %vm2522_vm0, %v2505_v28, 0.0  ;;  %v2639_v32 = vmul.f32 %v7975_v50, %v7904_v43  ;;  %v2772_v28 = vmul.f32 %v7975_v50, %v7931_v30 }
 0x2e1   : > { %v4656_v57 = vpop.xlane.xlu1 %4655  ;;  %v8439_v48 = vpop.xlane.xlu0 %2524  ;;  %v2771_v43 = vmul.f32 %v7960_v18, %v7931_v30  ;;  %v3503_v30 = vmul.f32 %v7960_v18, %v7972_v34 }
 0x2e2   : > { %v5120_v42 = vrot.slane %v4656_v57, %v8270_v55 }
 0x2e4   : > { %v8450_v51 = vsel %vm3130_vm2, %v5120_v42, %v5116_v33  ;;  %4794 = vadd.xlane.f32.xlu1 %v4793_v7  ;;  %4791 = vadd.xlane.f32.xlu0 %v4790_v2  ;;  %v2701_v7 = vsel %vm2522_vm0, %v2639_v32, 0.0  ;;  %v2698_v2 = vsel %vm2522_vm0, %v2638_v40, 0.0  ;;  %v3504_v32 = vmul.f32 %v7975_v50, %v7972_v34 }
 0x2e5   : > { %v4789_v36 = vpop.xlane.xlu1 %4788  ;;  %v2537_v35 = vpop.xlane.xlu0 %2536  ;;  %v3563_v34 = vsel %vm2522_vm0, %v3503_v30, 0.0  ;;  %v3770_v30 = vmul.f32 %v7975_v50, %v8006_v4 }
 0x2e6   : > { %v5312_v39 = vrot.slane %v4789_v36, %v8285_v1  ;;  %v2942_v58 = vrot.slane %v2537_v35, %v8245_v38 }
 0x2e8   : > { %v8461_v41 = vsel %vm3325_vm3, %v5312_v39, %v5308_v60  ;;  %2569 = vadd.xlane.f32.xlu1 %v2568_v56  ;;  %2566 = vadd.xlane.f32.xlu0 %v2565_v26  ;;  %v2834_v56 = vsel %vm2522_vm0, %v2772_v28, 0.0  ;;  %v2831_v26 = vsel %vm2522_vm0, %v2771_v43, 0.0  ;;  %v3566_v28 = vsel %vm2522_vm0, %v3504_v32, 0.0 }
 0x2e9   : > { %v2540_v57 = vpop.xlane.xlu1 %2539  ;;  %v2658_v33 = vpop.xlane.xlu0 %2657  ;;  %v3636_v43 = vmul.f32 %v7960_v18, %v7989_v45 }
 0x2ea   : > { %v2946_v42 = vrot.slane %v2540_v57, %v8247_v5  ;;  %v3124_v35 = vrot.slane %v2658_v33, %v8266_v27 }
 0x2ec   : > { %v8472_v15 = vsel %vm2928_vm1, %v2946_v42, %v2942_v58  ;;  %2702 = vadd.xlane.f32.xlu1 %v2701_v7  ;;  %2699 = vadd.xlane.f32.xlu0 %v2698_v2  ;;  %v3637_v2 = vmul.f32 %v7975_v50, %v7989_v45  ;;  %v3696_v45 = vsel %vm2522_vm0, %v3636_v43, 0.0 }
 0x2ed   : > { %v2661_v36 = vpop.xlane.xlu1 %2660  ;;  %v2670_v60 = vpop.xlane.xlu0 %2669 }
 0x2ee   : > { %v3129_v39 = vrot.slane %v2661_v36, %v8270_v55  ;;  %v3144_v42 = vrot.slane %v2670_v60, %v8266_v27  ;;  %v3699_v32 = vsel %vm2522_vm0, %v3637_v2, 0.0  ;;  %v3832_v2 = vsel %vm2522_vm0, %v3770_v30, 0.0 }
 0x2f0   : > { %v3131_v40 = vsel %vm3130_vm2, %v3129_v39, %v3124_v35  ;;  %2835 = vadd.xlane.f32.xlu1 %v2834_v56  ;;  %2832 = vadd.xlane.f32.xlu0 %v2831_v26 }
 0x2f1   : > { %v3267_v57 = vsel %vm3065_vm4, %v8294_v52, %v3131_v40  ;;  %v2673_v33 = vpop.xlane.xlu1 %2672  ;;  %v2791_v58 = vpop.xlane.xlu0 %2790  ;;  %v3769_v40 = vmul.f32 %v7960_v18, %v8006_v4  ;;  %v4483_v4 = vmul.f32 %v7975_v50, %v8059_v62 }
 0x2f2   : > { %v3148_v7 = vrot.slane %v2673_v33, %v8270_v55  ;;  %v3319_v39 = vrot.slane %v2791_v58, %v8282_v21 }
 0x2f4   : > { %v3149_v52 = vsel %vm3130_vm2, %v3148_v7, %v3144_v42  ;;  %3567 = vadd.xlane.f32.xlu1 %v3566_v28  ;;  %3564 = vadd.xlane.f32.xlu0 %v3563_v34  ;;  %v3829_v28 = vsel %vm2522_vm0, %v3769_v40, 0.0  ;;  %v4482_v34 = vmul.f32 %v7960_v18, %v8059_v62 }
 0x2f5   : > { %v3268_v36 = vsel %vm3067_vm5, %v3149_v52, %v3267_v57  ;;  %v2794_v60 = vpop.xlane.xlu1 %2793  ;;  %v2803_v35 = vpop.xlane.xlu0 %2802 }
 0x2f6   : > { %v3324_v56 = vrot.slane %v2794_v60, %v8285_v1  ;;  %v8499_v26 = vsel %vm3069_vm6, %v8316_v0, %v3268_v36  ;;  %v3339_v42 = vrot.slane %v2803_v35, %v8282_v21  ;;  %v4542_v62 = vsel %vm2522_vm0, %v4482_v34, 0.0 }
 0x2f8   : > { %v3326_v57 = vsel %vm3325_vm3, %v3324_v56, %v3319_v39  ;;  %3700 = vadd.xlane.f32.xlu1 %v3699_v32  ;;  %3697 = vadd.xlane.f32.xlu0 %v3696_v45  ;;  %v4545_v56 = vsel %vm2522_vm0, %v4483_v4, 0.0  ;;  %v4616_v32 = vmul.f32 %v7975_v50, %v8076_v9  ;;  %v4615_v45 = vmul.f32 %v7960_v18, %v8076_v9  ;;  %v8542_v9 = vld [vmem:[%s10022_s2] ss:$0 sm:$0xff] }
 0x2f9   : > { %v3462_v33 = vsel %vm3065_vm4, %v8305_v53, %v3326_v57  ;;  %v2806_v58 = vpop.xlane.xlu1 %2805  ;;  %v3523_v0 = vpop.xlane.xlu0 %3522 }
 0x2fa   : > { %v3343_v7 = vrot.slane %v2806_v58, %v8285_v1  ;;  %v3918_v60 = vrot.slane %v3523_v0, %v8245_v38  ;;  %v4678_v0 = vsel %vm2522_vm0, %v4616_v32, 0.0 }
 0x2fc   : > { %v3344_v43 = vsel %vm3325_vm3, %v3343_v7, %v3339_v42  ;;  %3833 = vadd.xlane.f32.xlu1 %v3832_v2  ;;  %3830 = vadd.xlane.f32.xlu0 %v3829_v28  ;;  %v4675_v42 = vsel %vm2522_vm0, %v4615_v45, 0.0  ;;  %v2503_v7 = vmul.f32 %v8542_v9, %v7978_v13 }
 0x2fd   : > { %v3463_v53 = vsel %vm3067_vm5, %v3344_v43, %v3462_v33  ;;  %v3526_v52 = vpop.xlane.xlu1 %3525  ;;  %v3656_v36 = vpop.xlane.xlu0 %3655 }
 0x2fe   : > { %v3922_v35 = vrot.slane %v3526_v52, %v8247_v5  ;;  %v8524_v39 = vsel %vm3069_vm6, %v8327_v46, %v3463_v53  ;;  %v4110_v33 = vrot.slane %v3656_v36, %v8266_v27  ;;  %v2562_v52 = vsel %vm2522_vm0, %v2503_v7, 0.0 }
 0x300   : > { %v3923_v30 = vsel %vm2928_vm1, %v3922_v35, %v3918_v60  ;;  %4546 = vadd.xlane.f32.xlu1 %v4545_v56  ;;  %4543 = vadd.xlane.f32.xlu0 %v4542_v62  ;;  %v8558_v60 = vld [vmem:[%s10022_s2 + $0x1] ss:$0 sm:$0xff] }
 0x301   : > { %v4059_v40 = vsel %vm3065_vm4, %v8338_v12, %v3923_v30  ;;  %v3659_v57 = vpop.xlane.xlu1 %3658  ;;  %v3535_v46 = vpop.xlane.xlu0 %3534  ;;  %v2502_v12 = vmul.f32 %v8542_v9, %v7967_v47  ;;  %v2637_v35 = vmul.f32 %v8558_v60, %v7978_v13 }
 0x302   : > { %v4114_v58 = vrot.slane %v3659_v57, %v8270_v55  ;;  %v3936_v43 = vrot.slane %v3535_v46, %v8245_v38 }
 0x303   : > { %v2559_v36 = vsel %vm2522_vm0, %v2502_v12, 0.0 }
 0x304   : > { %v4115_v2 = vsel %vm3130_vm2, %v4114_v58, %v4110_v33  ;;  %4679 = vadd.xlane.f32.xlu1 %v4678_v0  ;;  %4676 = vadd.xlane.f32.xlu0 %v4675_v42  ;;  %v2695_v33 = vsel %vm2522_vm0, %v2637_v35, 0.0  ;;  %v8577_v0 = vld [vmem:[%s10022_s2 + $0x2] ss:$0 sm:$0xff] }
 0x305   : > { %v4251_v28 = vsel %vm3065_vm4, %v8349_v54, %v4115_v2  ;;  %v3538_v4 = vpop.xlane.xlu1 %3537  ;;  %v3668_v34 = vpop.xlane.xlu0 %3667  ;;  %v2636_v54 = vmul.f32 %v8558_v60, %v7967_v47  ;;  %v2769_v42 = vmul.f32 %v8577_v0, %v7967_v47 }
 0x306   : > { %v3940_v53 = vrot.slane %v3538_v4, %v8247_v5  ;;  %v4128_v30 = vrot.slane %v3668_v34, %v8266_v27 }
 0x307   : > { %v2692_v58 = vsel %vm2522_vm0, %v2636_v54, 0.0 }
 0x308   : > { %v3941_v56 = vsel %vm2928_vm1, %v3940_v53, %v3936_v43  ;;  %2563 = vadd.xlane.f32.xlu1 %v2562_v52  ;;  %2560 = vadd.xlane.f32.xlu0 %v2559_v36  ;;  %v2825_v52 = vsel %vm2522_vm0, %v2769_v42, 0.0  ;;  %v8596_v36 = vld [vmem:[%s10022_s2 + $0x3] ss:$0 sm:$0xff] }
 0x309   : > { %v4060_v62 = vsel %vm3067_vm5, %v3941_v56, %v4059_v40  ;;  %v3671_v32 = vpop.xlane.xlu1 %3670  ;;  %v3789_v45 = vpop.xlane.xlu0 %3788  ;;  %v2770_v40 = vmul.f32 %v8577_v0, %v7978_v13  ;;  %v3501_v35 = vmul.f32 %v8596_v36, %v7967_v47 }
 0x30a   : > { %v4132_v57 = vrot.slane %v3671_v32, %v8270_v55  ;;  %v8570_v46 = vsel %vm3069_vm6, %v8371_v44, %v4060_v62  ;;  %v4302_v4 = vrot.slane %v3789_v45, %v8282_v21 }
 0x30b   : > { %v2828_v53 = vsel %vm2522_vm0, %v2770_v40, 0.0 }
 0x30c   : > { %v4133_v7 = vsel %vm3130_vm2, %v4132_v57, %v4128_v30  ;;  %2696 = vadd.xlane.f32.xlu1 %v2695_v33  ;;  %2693 = vadd.xlane.f32.xlu0 %v2692_v58  ;;  %v3557_v57 = vsel %vm2522_vm0, %v3501_v35, 0.0  ;;  %v8612_v33 = vld [vmem:[%s10022_s2 + $0x4] ss:$0 sm:$0xff] }
 0x30d   : > { %v4252_v44 = vsel %vm3067_vm5, %v4133_v7, %v4251_v28  ;;  %v3792_v12 = vpop.xlane.xlu1 %3791  ;;  %v3801_v2 = vpop.xlane.xlu0 %3800  ;;  %v3502_v28 = vmul.f32 %v8596_v36, %v7978_v13  ;;  %v3635_v58 = vmul.f32 %v8612_v33, %v7978_v13 }
 0x30e   : > { %v4306_v34 = vrot.slane %v3792_v12, %v8285_v1  ;;  %v8589_v43 = vsel %vm3069_vm6, %v8382_v22, %v4252_v44  ;;  %v4320_v32 = vrot.slane %v3801_v2, %v8282_v21 }
 0x30f   : > { %v3560_v30 = vsel %vm2522_vm0, %v3502_v28, 0.0 }
 0x310   : > { %v4307_v54 = vsel %vm3325_vm3, %v4306_v34, %v4302_v4  ;;  %2829 = vadd.xlane.f32.xlu1 %v2828_v53  ;;  %2826 = vadd.xlane.f32.xlu0 %v2825_v52  ;;  %v3693_v34 = vsel %vm2522_vm0, %v3635_v58, 0.0  ;;  %v8631_v52 = vld [vmem:[%s10022_s2 + $0x5] ss:$0 sm:$0xff] }
 0x311   : > { %v4443_v22 = vsel %vm3065_vm4, %v8360_v23, %v4307_v54  ;;  %v3804_v56 = vpop.xlane.xlu1 %3803  ;;  %v4502_v62 = vpop.xlane.xlu0 %4501  ;;  %v3634_v23 = vmul.f32 %v8612_v33, %v7967_v47  ;;  %v3768_v28 = vmul.f32 %v8631_v52, %v7978_v13  ;;  %v3767_v35 = vmul.f32 %v8631_v52, %v7967_v47 }
 0x312   : > { %v4324_v45 = vrot.slane %v3804_v56, %v8285_v1  ;;  %v4897_v12 = vrot.slane %v4502_v62, %v8245_v38 }
 0x313   : > { %v3690_v53 = vsel %vm2522_vm0, %v3634_v23, 0.0 }
 0x314   : > { %v4325_v40 = vsel %vm3325_vm3, %v4324_v45, %v4320_v32  ;;  %3561 = vadd.xlane.f32.xlu1 %v3560_v30  ;;  %3558 = vadd.xlane.f32.xlu0 %v3557_v57  ;;  %v3826_v45 = vsel %vm2522_vm0, %v3768_v28, 0.0  ;;  %v3823_v30 = vsel %vm2522_vm0, %v3767_v35, 0.0  ;;  %v8647_v57 = vld [vmem:[%s10022_s2 + $0x6] ss:$0 sm:$0xff] }
 0x315   : > { %v4444_v42 = vsel %vm3067_vm5, %v4325_v40, %v4443_v22  ;;  %v4505_v7 = vpop.xlane.xlu1 %4504  ;;  %v4635_v44 = vpop.xlane.xlu0 %4634  ;;  %v4481_v58 = vmul.f32 %v8647_v57, %v7978_v13 }
 0x316   : > { %v4901_v2 = vrot.slane %v4505_v7, %v8247_v5  ;;  %v8624_v4 = vsel %vm3069_vm6, %v8393_v31, %v4444_v42  ;;  %v5089_v62 = vrot.slane %v4635_v44, %v8266_v27 }
 0x318   : > { %v4902_v54 = vsel %vm2928_vm1, %v4901_v2, %v4897_v12  ;;  %3694 = vadd.xlane.f32.xlu1 %v3693_v34  ;;  %3691 = vadd.xlane.f32.xlu0 %v3690_v53  ;;  %v4539_v2 = vsel %vm2522_vm0, %v4481_v58, 0.0  ;;  %v8663_v53 = vld [vmem:[%s10022_s2 + $0x7] ss:$0 sm:$0xff] }
 0x319   : > { %v5038_v31 = vsel %vm3065_vm4, %v8404_v20, %v4902_v54  ;;  %v4638_v22 = vpop.xlane.xlu1 %4637  ;;  %v4514_v56 = vpop.xlane.xlu0 %4513  ;;  %v4480_v20 = vmul.f32 %v8647_v57, %v7967_v47  ;;  %v4614_v28 = vmul.f32 %v8663_v53, %v7978_v13 }
 0x31a   : > { %v5093_v32 = vrot.slane %v4638_v22, %v8270_v55  ;;  %v4915_v44 = vrot.slane %v4514_v56, %v8245_v38 }
 0x31b   : > { %v4536_v34 = vsel %vm2522_vm0, %v4480_v20, 0.0  ;;  %v2509_v20 = vmul.f32 %v8542_v9, %v8009_v49 }
 0x31c   : > { %v5094_v23 = vsel %vm3130_vm2, %v5093_v32, %v5089_v62  ;;  %3827 = vadd.xlane.f32.xlu1 %v3826_v45  ;;  %3824 = vadd.xlane.f32.xlu0 %v3823_v30  ;;  %v4672_v30 = vsel %vm2522_vm0, %v4614_v28, 0.0 }
 0x31d   : > { %v5230_v40 = vsel %vm3065_vm4, %v8415_v61, %v5094_v23  ;;  %v4517_v42 = vpop.xlane.xlu1 %4516  ;;  %v4647_v7 = vpop.xlane.xlu0 %4646  ;;  %v4613_v61 = vmul.f32 %v8663_v53, %v7967_v47 }
 0x31e   : > { %v4919_v12 = vrot.slane %v4517_v42, %v8247_v5  ;;  %v5107_v62 = vrot.slane %v4647_v7, %v8266_v27 }
 0x31f   : > { %v4669_v58 = vsel %vm2522_vm0, %v4613_v61, 0.0  ;;  %v2643_v61 = vmul.f32 %v8558_v60, %v8009_v49 }
 0x320   : > { %v4920_v35 = vsel %vm2928_vm1, %v4919_v12, %v4915_v44  ;;  %4540 = vadd.xlane.f32.xlu1 %v4539_v2  ;;  %4537 = vadd.xlane.f32.xlu0 %v4536_v34  ;;  %v2580_v34 = vsel %vm2522_vm0, %v2509_v20, 0.0 }
 0x321   : > { %v5039_v54 = vsel %vm3067_vm5, %v4920_v35, %v5038_v31  ;;  %v4650_v22 = vpop.xlane.xlu1 %4649  ;;  %v4768_v56 = vpop.xlane.xlu0 %4767  ;;  %v2508_v31 = vmul.f32 %v8542_v9, %v7994_v29 }
 0x322   : > { %v5111_v32 = vrot.slane %v4650_v22, %v8270_v55  ;;  %v8675_v45 = vsel %vm3069_vm6, %v8437_v11, %v5039_v54  ;;  %v5281_v11 = vrot.slane %v4768_v56, %v8282_v21  ;;  %v2922_v56 = vrot.slane %v8439_v48, %v8245_v38 }
 0x323   : > { %v2577_v28 = vsel %vm2522_vm0, %v2508_v31, 0.0  ;;  %v2776_v31 = vmul.f32 %v8577_v0, %v8009_v49 }
 0x324   : > { %v5112_v23 = vsel %vm3130_vm2, %v5111_v32, %v5107_v62  ;;  %4673 = vadd.xlane.f32.xlu1 %v4672_v30  ;;  %4670 = vadd.xlane.f32.xlu0 %v4669_v58  ;;  %v2713_v58 = vsel %vm2522_vm0, %v2643_v61, 0.0 }
 0x325   : > { %v5231_v42 = vsel %vm3067_vm5, %v5112_v23, %v5230_v40  ;;  %v4771_v7 = vpop.xlane.xlu1 %4770  ;;  %v4780_v44 = vpop.xlane.xlu0 %4779  ;;  %v2642_v40 = vmul.f32 %v8558_v60, %v7994_v29 }
 0x326   : > { %v5285_v12 = vrot.slane %v4771_v7, %v8285_v1  ;;  %v8689_v2 = vsel %vm3069_vm6, %v8450_v51, %v5231_v42  ;;  %v5299_v62 = vrot.slane %v4780_v44, %v8282_v21 }
 0x327   : > { %v2710_v20 = vsel %vm2522_vm0, %v2642_v40, 0.0 }
 0x328   : > { %v5286_v35 = vsel %vm3325_vm3, %v5285_v12, %v5281_v11  ;;  %2581 = vadd.xlane.f32.xlu1 %v2580_v34  ;;  %2578 = vadd.xlane.f32.xlu0 %v2577_v28  ;;  %v3508_v12 = vmul.f32 %v8596_v36, %v8009_v49 }
 0x329   : > { %v5422_v54 = vsel %vm3065_vm4, %v8426_v10, %v5286_v35  ;;  %v4783_v22 = vpop.xlane.xlu1 %4782  ;;  %v2528_v51 = vpop.xlane.xlu0 %2527  ;;  %v2775_v10 = vmul.f32 %v8577_v0, %v7994_v29  ;;  %v2846_v35 = vsel %vm2522_vm0, %v2776_v31, 0.0 }
 0x32a   : > { %v5303_v32 = vrot.slane %v4783_v22, %v8285_v1  ;;  %v2927_v30 = vrot.slane %v2528_v51, %v8247_v5 }
 0x32c   : > { %v5304_v23 = vsel %vm3325_vm3, %v5303_v32, %v5299_v62  ;;  %v2929_v48 = vsel %vm2928_vm1, %v2927_v30, %v2922_v56  ;;  %2714 = vadd.xlane.f32.xlu1 %v2713_v58  ;;  %2711 = vadd.xlane.f32.xlu0 %v2710_v20  ;;  %v3578_v32 = vsel %vm2522_vm0, %v3508_v12, 0.0  ;;  %v3641_v58 = vmul.f32 %v8612_v33, %v8009_v49 }
 0x32d   : > { %v5423_v42 = vsel %vm3067_vm5, %v5304_v23, %v5422_v54  ;;  %v3066_v7 = vsel %vm3065_vm4, %v8264_v16, %v2929_v48  ;;  %v2558_v44 = vpop.xlane.xlu1 %2557  ;;  %v2555_v11 = vpop.xlane.xlu0 %2554  ;;  %v2843_v16 = vsel %vm2522_vm0, %v2775_v10, 0.0  ;;  %v3507_v54 = vmul.f32 %v8596_v36, %v7994_v29 }
 0x32e   : > { %v3068_v34 = vsel %vm3067_vm5, %v8472_v15, %v3066_v7  ;;  %v2973_v28 = vrot.slane %v2558_v44, %v8247_v5  ;;  %v2969_v61 = vrot.slane %v2555_v11, %v8245_v38  ;;  %v8724_v40 = vsel %vm3069_vm6, %v8461_v41, %v5423_v42 }
 0x32f   : > { %v8732_v22 = vsel %vm3069_vm6, %v8279_v24, %v3068_v34  ;;  %v3575_v30 = vsel %vm2522_vm0, %v3507_v54, 0.0  ;;  %v3640_v24 = vmul.f32 %v8612_v33, %v7994_v29  ;;  %v3711_v42 = vsel %vm2522_vm0, %v3641_v58, 0.0 }
 0x330   : > { %v8735_v15 = vsel %vm2928_vm1, %v2973_v28, %v2969_v61  ;;  %2847 = vadd.xlane.f32.xlu1 %v2846_v35  ;;  %2844 = vadd.xlane.f32.xlu0 %v2843_v16  ;;  %v3774_v44 = vmul.f32 %v8631_v52, %v8009_v49  ;;  %v3773_v11 = vmul.f32 %v8631_v52, %v7994_v29 }
 0x331   : > { %v2691_v51 = vpop.xlane.xlu1 %2690  ;;  %v2688_v56 = vpop.xlane.xlu0 %2687  ;;  %v3708_v7 = vsel %vm2522_vm0, %v3640_v24, 0.0 }
 0x332   : > { %v3175_v41 = vrot.slane %v2691_v51, %v8270_v55  ;;  %v3171_v62 = vrot.slane %v2688_v56, %v8266_v27  ;;  %v3844_v16 = vsel %vm2522_vm0, %v3774_v44, 0.0  ;;  %v3841_v54 = vsel %vm2522_vm0, %v3773_v11, 0.0 }
 0x333   : > { %v4487_v51 = vmul.f32 %v8647_v57, %v8009_v49  ;;  %v4486_v56 = vmul.f32 %v8647_v57, %v7994_v29 }
 0x334   : > { %v8746_v20 = vsel %vm3130_vm2, %v3175_v41, %v3171_v62  ;;  %3579 = vadd.xlane.f32.xlu1 %v3578_v32  ;;  %3576 = vadd.xlane.f32.xlu0 %v3575_v30 }
 0x335   : > { %v2824_v31 = vpop.xlane.xlu1 %2823  ;;  %v2821_v10 = vpop.xlane.xlu0 %2820  ;;  %v4557_v24 = vsel %vm2522_vm0, %v4487_v51, 0.0 }
 0x336   : > { %v3370_v23 = vrot.slane %v2824_v31, %v8285_v1  ;;  %v3366_v48 = vrot.slane %v2821_v10, %v8282_v21  ;;  %v4554_v31 = vsel %vm2522_vm0, %v4486_v56, 0.0  ;;  %v4620_v10 = vmul.f32 %v8663_v53, %v8009_v49 }
 0x338   : > { %v8757_v12 = vsel %vm3325_vm3, %v3370_v23, %v3366_v48  ;;  %3712 = vadd.xlane.f32.xlu1 %v3711_v42  ;;  %3709 = vadd.xlane.f32.xlu0 %v3708_v7  ;;  %v4619_v23 = vmul.f32 %v8663_v53, %v7994_v29 }
 0x339   : > { %v3556_v34 = vpop.xlane.xlu1 %3555  ;;  %v3553_v28 = vpop.xlane.xlu0 %3552 }
 0x33a   : > { %v3967_v61 = vrot.slane %v3556_v34, %v8247_v5  ;;  %v3963_v35 = vrot.slane %v3553_v28, %v8245_v38  ;;  %v4690_v34 = vsel %vm2522_vm0, %v4620_v10, 0.0  ;;  %v4687_v28 = vsel %vm2522_vm0, %v4619_v23, 0.0 }
 0x33c   : > { %v8768_v41 = vsel %vm2928_vm1, %v3967_v61, %v3963_v35  ;;  %3845 = vadd.xlane.f32.xlu1 %v3844_v16  ;;  %3842 = vadd.xlane.f32.xlu0 %v3841_v54  ;;  %v8788_v61 = vld [vmem:[%s10022_s2 + $0x8] ss:$0 sm:$0xff] }
 0x33d   : > { %v3689_v62 = vpop.xlane.xlu1 %3688  ;;  %v3686_v32 = vpop.xlane.xlu0 %3685  ;;  %v4753_v35 = vmul.f32 %v8788_v61, %v8009_v49  ;;  %v4752_v16 = vmul.f32 %v8788_v61, %v7994_v29  ;;  %v2507_v49 = vmul.f32 %v8542_v9, %v8012_v14  ;;  %v2506_v29 = vmul.f32 %v8542_v9, %v8001_v8 }
 0x33e   : > { %v4159_v30 = vrot.slane %v3689_v62, %v8270_v55  ;;  %v4155_v58 = vrot.slane %v3686_v32, %v8266_v27 }
 0x340   : > { %v8779_v48 = vsel %vm3130_vm2, %v4159_v30, %v4155_v58  ;;  %4558 = vadd.xlane.f32.xlu1 %v4557_v24  ;;  %4555 = vadd.xlane.f32.xlu0 %v4554_v31  ;;  %v4823_v30 = vsel %vm2522_vm0, %v4753_v35, 0.0  ;;  %v4820_v58 = vsel %vm2522_vm0, %v4752_v16, 0.0 }
 0x341   : > { %v3822_v42 = vpop.xlane.xlu1 %3821  ;;  %v3819_v7 = vpop.xlane.xlu0 %3818 }
 0x342   : > { %v4351_v44 = vrot.slane %v3822_v42, %v8285_v1  ;;  %v4347_v11 = vrot.slane %v3819_v7, %v8282_v21  ;;  %v2574_v7 = vsel %vm2522_vm0, %v2507_v49, 0.0 }
 0x344   : > { %v8795_v54 = vsel %vm3325_vm3, %v4351_v44, %v4347_v11  ;;  %4691 = vadd.xlane.f32.xlu1 %v4690_v34  ;;  %4688 = vadd.xlane.f32.xlu0 %v4687_v28  ;;  %v2571_v44 = vsel %vm2522_vm0, %v2506_v29, 0.0  ;;  %v2641_v11 = vmul.f32 %v8558_v60, %v8012_v14  ;;  %v2640_v34 = vmul.f32 %v8558_v60, %v8001_v8 }
 0x345   : > { %v4535_v51 = vpop.xlane.xlu1 %4534  ;;  %v4532_v56 = vpop.xlane.xlu0 %4531 }
 0x346   : > { %v4946_v62 = vrot.slane %v4535_v51, %v8247_v5  ;;  %v4942_v32 = vrot.slane %v4532_v56, %v8245_v38 }
 0x348   : > { %v8806_v24 = vsel %vm2928_vm1, %v4946_v62, %v4942_v32  ;;  %4824 = vadd.xlane.f32.xlu1 %v4823_v30  ;;  %4821 = vadd.xlane.f32.xlu0 %v4820_v58  ;;  %v2707_v62 = vsel %vm2522_vm0, %v2641_v11, 0.0  ;;  %v2704_v32 = vsel %vm2522_vm0, %v2640_v34, 0.0  ;;  %v2774_v30 = vmul.f32 %v8577_v0, %v8012_v14 }
 0x349   : > { %v4668_v31 = vpop.xlane.xlu1 %4667  ;;  %v4665_v10 = vpop.xlane.xlu0 %4664  ;;  %v2773_v58 = vmul.f32 %v8577_v0, %v8001_v8  ;;  %v3505_v11 = vmul.f32 %v8596_v36, %v8001_v8 }
 0x34a   : > { %v5138_v23 = vrot.slane %v4668_v31, %v8270_v55  ;;  %v5134_v42 = vrot.slane %v4665_v10, %v8266_v27 }
 0x34c   : > { %v8817_v28 = vsel %vm3130_vm2, %v5138_v23, %v5134_v42  ;;  %2575 = vadd.xlane.f32.xlu1 %v2574_v7  ;;  %2572 = vadd.xlane.f32.xlu0 %v2571_v44  ;;  %v3506_v42 = vmul.f32 %v8596_v36, %v8012_v14  ;;  %v2840_v7 = vsel %vm2522_vm0, %v2774_v30, 0.0  ;;  %v2837_v44 = vsel %vm2522_vm0, %v2773_v58, 0.0 }
 0x34d   : > { %v4801_v35 = vpop.xlane.xlu1 %4800  ;;  %v4798_v16 = vpop.xlane.xlu0 %4797  ;;  %v3569_v58 = vsel %vm2522_vm0, %v3505_v11, 0.0 }
 0x34e   : > { %v5330_v51 = vrot.slane %v4801_v35, %v8285_v1  ;;  %v5326_v56 = vrot.slane %v4798_v16, %v8282_v21  ;;  %v3572_v30 = vsel %vm2522_vm0, %v3506_v42, 0.0 }
 0x350   : > { %v8828_v49 = vsel %vm3325_vm3, %v5330_v51, %v5326_v56  ;;  %2708 = vadd.xlane.f32.xlu1 %v2707_v62  ;;  %2705 = vadd.xlane.f32.xlu0 %v2704_v32 }
 0x351   : > { %v2552_v29 = vpop.xlane.xlu1 %2551  ;;  %v2549_v31 = vpop.xlane.xlu0 %2548 }
 0x352   : > { %v2964_v10 = vrot.slane %v2552_v29, %v8247_v5  ;;  %v2960_v23 = vrot.slane %v2549_v31, %v8245_v38  ;;  %v3639_v29 = vmul.f32 %v8612_v33, %v8012_v14 }
 0x354   : > { %v2965_v34 = vsel %vm2928_vm1, %v2964_v10, %v2960_v23  ;;  %2841 = vadd.xlane.f32.xlu1 %v2840_v7  ;;  %2838 = vadd.xlane.f32.xlu0 %v2837_v44  ;;  %v3705_v11 = vsel %vm2522_vm0, %v3639_v29, 0.0 }
 0x355   : > { %v3072_v35 = vsel %vm3071_vm7, %v2965_v34, %v8732_v22  ;;  %v2685_v16 = vpop.xlane.xlu1 %2684  ;;  %v2682_v51 = vpop.xlane.xlu0 %2681  ;;  %v3638_v22 = vmul.f32 %v8612_v33, %v8001_v8 }
 0x356   : > { %v3166_v56 = vrot.slane %v2685_v16, %v8270_v55  ;;  %v3162_v62 = vrot.slane %v2682_v51, %v8266_v27  ;;  %v8845_v32 = vsel %vm3073_vm8, %v8735_v15, %v3072_v35  ;;  %v3772_v35 = vmul.f32 %v8631_v52, %v8012_v14 }
 0x357   : > { %v3702_v34 = vsel %vm2522_vm0, %v3638_v22, 0.0 }
 0x358   : > { %v3167_v31 = vsel %vm3130_vm2, %v3166_v56, %v3162_v62  ;;  %3573 = vadd.xlane.f32.xlu1 %v3572_v30  ;;  %3570 = vadd.xlane.f32.xlu0 %v3569_v58  ;;  %v3838_v29 = vsel %vm2522_vm0, %v3772_v35, 0.0 }
 0x359   : > { %v3270_v10 = vsel %vm3071_vm7, %v3167_v31, %v8499_v26  ;;  %v2818_v23 = vpop.xlane.xlu1 %2817  ;;  %v2815_v15 = vpop.xlane.xlu0 %2814  ;;  %v3771_v26 = vmul.f32 %v8631_v52, %v8001_v8  ;;  %v4485_v31 = vmul.f32 %v8647_v57, %v8012_v14 }
 0x35a   : > { %v3361_v7 = vrot.slane %v2818_v23, %v8285_v1  ;;  %v3357_v42 = vrot.slane %v2815_v15, %v8282_v21  ;;  %v8860_v44 = vsel %vm3073_vm8, %v8746_v20, %v3270_v10 }
 0x35b   : > { %v3835_v22 = vsel %vm2522_vm0, %v3771_v26, 0.0  ;;  %v4618_v26 = vmul.f32 %v8663_v53, %v8012_v14 }
 0x35c   : > { %v3362_v16 = vsel %vm3325_vm3, %v3361_v7, %v3357_v42  ;;  %3706 = vadd.xlane.f32.xlu1 %v3705_v11  ;;  %3703 = vadd.xlane.f32.xlu0 %v3702_v34  ;;  %v4551_v34 = vsel %vm2522_vm0, %v4485_v31, 0.0  ;;  %v4751_v31 = vmul.f32 %v8788_v61, %v8012_v14 }
 0x35d   : > { %v3465_v51 = vsel %vm3071_vm7, %v3362_v16, %v8524_v39  ;;  %v3550_v56 = vpop.xlane.xlu1 %3549  ;;  %v3547_v20 = vpop.xlane.xlu0 %3546  ;;  %v4484_v39 = vmul.f32 %v8647_v57, %v8001_v8 }
 0x35e   : > { %v3958_v62 = vrot.slane %v3550_v56, %v8247_v5  ;;  %v3954_v30 = vrot.slane %v3547_v20, %v8245_v38  ;;  %v8875_v58 = vsel %vm3073_vm8, %v8757_v12, %v3465_v51  ;;  %v4817_v14 = vsel %vm2522_vm0, %v4751_v31, 0.0 }
 0x35f   : > { %v4548_v35 = vsel %vm2522_vm0, %v4484_v39, 0.0 }
 0x360   : > { %v3959_v10 = vsel %vm2928_vm1, %v3958_v62, %v3954_v30  ;;  %3839 = vadd.xlane.f32.xlu1 %v3838_v29  ;;  %3836 = vadd.xlane.f32.xlu0 %v3835_v22  ;;  %v4684_v29 = vsel %vm2522_vm0, %v4618_v26, 0.0 }
 0x361   : > { %v4062_v23 = vsel %vm3071_vm7, %v3959_v10, %v8570_v46  ;;  %v3683_v15 = vpop.xlane.xlu1 %3682  ;;  %v3680_v12 = vpop.xlane.xlu0 %3679  ;;  %v4617_v46 = vmul.f32 %v8663_v53, %v8001_v8 }
 0x362   : > { %v4150_v7 = vrot.slane %v3683_v15, %v8270_v55  ;;  %v4146_v42 = vrot.slane %v3680_v12, %v8266_v27  ;;  %v8890_v11 = vsel %vm3073_vm8, %v8768_v41, %v4062_v23 }
 0x363   : > { %v4681_v22 = vsel %vm2522_vm0, %v4617_v46, 0.0 }
 0x364   : > { %v4151_v16 = vsel %vm3130_vm2, %v4150_v7, %v4146_v42  ;;  %4552 = vadd.xlane.f32.xlu1 %v4551_v34  ;;  %4549 = vadd.xlane.f32.xlu0 %v4548_v35  ;;  %v2513_v42 = vmul.f32 %v8542_v9, %v8033_v37 }
 0x365   : > { %v4254_v51 = vsel %vm3071_vm7, %v4151_v16, %v8589_v43  ;;  %v3816_v56 = vpop.xlane.xlu1 %3815  ;;  %v3813_v41 = vpop.xlane.xlu0 %3812  ;;  %v4750_v43 = vmul.f32 %v8788_v61, %v8001_v8 }
 0x366   : > { %v4342_v20 = vrot.slane %v3816_v56, %v8285_v1  ;;  %v4338_v62 = vrot.slane %v3813_v41, %v8282_v21  ;;  %v8905_v30 = vsel %vm3073_vm8, %v8779_v48, %v4254_v51  ;;  %v2592_v56 = vsel %vm2522_vm0, %v2513_v42, 0.0 }
 0x367   : > { %v4814_v8 = vsel %vm2522_vm0, %v4750_v43, 0.0 }
 0x368   : > { %v4343_v39 = vsel %vm3325_vm3, %v4342_v20, %v4338_v62  ;;  %4685 = vadd.xlane.f32.xlu1 %v4684_v29  ;;  %4682 = vadd.xlane.f32.xlu0 %v4681_v22  ;;  %v2647_v20 = vmul.f32 %v8558_v60, %v8033_v37 }
 0x369   : > { %v4446_v10 = vsel %vm3071_vm7, %v4343_v39, %v8624_v4  ;;  %v4529_v23 = vpop.xlane.xlu1 %4528  ;;  %v4526_v48 = vpop.xlane.xlu0 %4525  ;;  %v2512_v4 = vmul.f32 %v8542_v9, %v8023_v19 }
 0x36a   : > { %v4937_v15 = vrot.slane %v4529_v23, %v8247_v5  ;;  %v4933_v12 = vrot.slane %v4526_v48, %v8245_v38  ;;  %v8920_v7 = vsel %vm3073_vm8, %v8795_v54, %v4446_v10  ;;  %v2725_v10 = vsel %vm2522_vm0, %v2647_v20, 0.0 }
 0x36b   : > { %v2589_v41 = vsel %vm2522_vm0, %v2512_v4, 0.0  ;;  %v2780_v48 = vmul.f32 %v8577_v0, %v8033_v37 }
 0x36c   : > { %v4938_v34 = vsel %vm2928_vm1, %v4937_v15, %v4933_v12  ;;  %4818 = vadd.xlane.f32.xlu1 %v4817_v14  ;;  %4815 = vadd.xlane.f32.xlu0 %v4814_v8 }
 0x36d   : > { %v5041_v35 = vsel %vm3071_vm7, %v4938_v34, %v8675_v45  ;;  %v4662_v26 = vpop.xlane.xlu1 %4661  ;;  %v4659_v54 = vpop.xlane.xlu0 %4658  ;;  %v2646_v45 = vmul.f32 %v8558_v60, %v8023_v19  ;;  %v2858_v4 = vsel %vm2522_vm0, %v2780_v48, 0.0  ;;  %v3778_v48 = vmul.f32 %v8631_v52, %v8033_v37 }
 0x36e   : > { %v5129_v46 = vrot.slane %v4662_v26, %v8270_v55  ;;  %v5125_v16 = vrot.slane %v4659_v54, %v8266_v27  ;;  %v8935_v51 = vsel %vm3073_vm8, %v8806_v24, %v5041_v35  ;;  %v3512_v35 = vmul.f32 %v8596_v36, %v8033_v37 }
 0x36f   : > { %v2722_v23 = vsel %vm2522_vm0, %v2646_v45, 0.0  ;;  %v3511_v26 = vmul.f32 %v8596_v36, %v8023_v19  ;;  %v3645_v45 = vmul.f32 %v8612_v33, %v8033_v37 }
 0x370   : > { %v5130_v62 = vsel %vm3130_vm2, %v5129_v46, %v5125_v16  ;;  %2593 = vadd.xlane.f32.xlu1 %v2592_v56  ;;  %2590 = vadd.xlane.f32.xlu0 %v2589_v41  ;;  %v3590_v41 = vsel %vm2522_vm0, %v3512_v35, 0.0 }
 0x371   : > { %v5233_v29 = vsel %vm3071_vm7, %v5130_v62, %v8689_v2  ;;  %v4795_v22 = vpop.xlane.xlu1 %4794  ;;  %v4792_v24 = vpop.xlane.xlu0 %4791  ;;  %v2779_v2 = vmul.f32 %v8577_v0, %v8023_v19  ;;  %v3587_v20 = vsel %vm2522_vm0, %v3511_v26, 0.0  ;;  %v3644_v62 = vmul.f32 %v8612_v33, %v8023_v19 }
 0x372   : > { %v5321_v31 = vrot.slane %v4795_v22, %v8285_v1  ;;  %v5317_v43 = vrot.slane %v4792_v24, %v8282_v21  ;;  %v8950_v39 = vsel %vm3073_vm8, %v8817_v28, %v5233_v29  ;;  %v4491_v26 = vmul.f32 %v8647_v57, %v8033_v37 }
 0x373   : > { %v2855_v34 = vsel %vm2522_vm0, %v2779_v2, 0.0  ;;  %v3777_v2 = vmul.f32 %v8631_v52, %v8023_v19 }
 0x374   : > { %v5322_v15 = vsel %vm3325_vm3, %v5321_v31, %v5317_v43  ;;  %2726 = vadd.xlane.f32.xlu1 %v2725_v10  ;;  %2723 = vadd.xlane.f32.xlu0 %v2722_v23  ;;  %v3723_v10 = vsel %vm2522_vm0, %v3645_v45, 0.0  ;;  %v3720_v23 = vsel %vm2522_vm0, %v3644_v62, 0.0  ;;  %v4624_v45 = vmul.f32 %v8663_v53, %v8033_v37 }
 0x375   : > { %v5425_v12 = vsel %vm3071_vm7, %v5322_v15, %v8724_v40  ;;  %v2570_v14 = vpop.xlane.xlu1 %2569  ;;  %v2567_v28 = vpop.xlane.xlu0 %2566  ;;  %v3853_v35 = vsel %vm2522_vm0, %v3777_v2, 0.0  ;;  %v4623_v62 = vmul.f32 %v8663_v53, %v8023_v19  ;;  %v4757_v2 = vmul.f32 %v8788_v61, %v8033_v37 }
 0x376   : > { %v2991_v8 = vrot.slane %v2570_v14, %v8247_v5  ;;  %v2987_v42 = vrot.slane %v2567_v28, %v8245_v38  ;;  %v2511_v37 = vmul.f32 %v8542_v9, %v8036_v6 }
 0x378   : > { %v8970_v54 = vsel %vm2928_vm1, %v2991_v8, %v2987_v42  ;;  %2859 = vadd.xlane.f32.xlu1 %v2858_v4  ;;  %2856 = vadd.xlane.f32.xlu0 %v2855_v34  ;;  %v8996_v8 = vsel %vm3073_vm8, %v8828_v49, %v5425_v12  ;;  %v3856_v34 = vsel %vm2522_vm0, %v3778_v48, 0.0  ;;  %v4699_v48 = vsel %vm2522_vm0, %v4623_v62, 0.0 }
 0x379   : > { %v2703_v40 = vpop.xlane.xlu1 %2702  ;;  %v2700_v46 = vpop.xlane.xlu0 %2699  ;;  %v2645_v62 = vmul.f32 %v8558_v60, %v8036_v6 }
 0x37a   : > { %v3193_v16 = vrot.slane %v2703_v40, %v8270_v55  ;;  %v3189_v56 = vrot.slane %v2700_v46, %v8266_v27  ;;  %v4490_v40 = vmul.f32 %v8647_v57, %v8023_v19 }
 0x37c   : > { %v8981_v29 = vsel %vm3130_vm2, %v3193_v16, %v3189_v56  ;;  %3591 = vadd.xlane.f32.xlu1 %v3590_v41  ;;  %3588 = vadd.xlane.f32.xlu0 %v3587_v20  ;;  %v4569_v41 = vsel %vm2522_vm0, %v4491_v26, 0.0  ;;  %v4566_v20 = vsel %vm2522_vm0, %v4490_v40, 0.0  ;;  %v4835_v26 = vsel %vm2522_vm0, %v4757_v2, 0.0 }
 0x37d   : > { %v2836_v22 = vpop.xlane.xlu1 %2835  ;;  %v2833_v24 = vpop.xlane.xlu0 %2832  ;;  %v2719_v2 = vsel %vm2522_vm0, %v2645_v62, 0.0 }
 0x37e   : > { %v3388_v31 = vrot.slane %v2836_v22, %v8285_v1  ;;  %v3384_v43 = vrot.slane %v2833_v24, %v8282_v21 }
 0x380   : > { %v8992_v15 = vsel %vm3325_vm3, %v3388_v31, %v3384_v43  ;;  %3724 = vadd.xlane.f32.xlu1 %v3723_v10  ;;  %3721 = vadd.xlane.f32.xlu0 %v3720_v23  ;;  %v4702_v23 = vsel %vm2522_vm0, %v4624_v45, 0.0 }
 0x381   : > { %v3568_v14 = vpop.xlane.xlu1 %3567  ;;  %v3565_v28 = vpop.xlane.xlu0 %3564 }
 0x382   : > { %v3985_v42 = vrot.slane %v3568_v14, %v8247_v5  ;;  %v3981_v4 = vrot.slane %v3565_v28, %v8245_v38  ;;  %v4756_v14 = vmul.f32 %v8788_v61, %v8023_v19  ;;  %v2510_v19 = vmul.f32 %v8542_v9, %v8030_v63 }
 0x383   : > { %v2644_v9 = vmul.f32 %v8558_v60, %v8030_v63 }
 0x384   : > { %v9007_v46 = vsel %vm2928_vm1, %v3985_v42, %v3981_v4  ;;  %3857 = vadd.xlane.f32.xlu1 %v3856_v34  ;;  %3854 = vadd.xlane.f32.xlu0 %v3853_v35  ;;  %v4832_v40 = vsel %vm2522_vm0, %v4756_v14, 0.0  ;;  %v2583_v45 = vsel %vm2522_vm0, %v2510_v19, 0.0  ;;  %v2777_v14 = vmul.f32 %v8577_v0, %v8030_v63 }
 0x385   : > { %v3701_v49 = vpop.xlane.xlu1 %3700  ;;  %v3698_v12 = vpop.xlane.xlu0 %3697  ;;  %v2716_v60 = vsel %vm2522_vm0, %v2644_v9, 0.0  ;;  %v3510_v19 = vmul.f32 %v8596_v36, %v8036_v6 }
 0x386   : > { %v4177_v16 = vrot.slane %v3701_v49, %v8270_v55  ;;  %v4173_v56 = vrot.slane %v3698_v12, %v8266_v27 }
 0x387   : > { %v3584_v9 = vsel %vm2522_vm0, %v3510_v19, 0.0 }
 0x388   : > { %v9018_v22 = vsel %vm3130_vm2, %v4177_v16, %v4173_v56  ;;  %4570 = vadd.xlane.f32.xlu1 %v4569_v41  ;;  %4567 = vadd.xlane.f32.xlu0 %v4566_v20  ;;  %v2586_v20 = vsel %vm2522_vm0, %v2511_v37, 0.0 }
 0x389   : > { %v3834_v24 = vpop.xlane.xlu1 %3833  ;;  %v3831_v31 = vpop.xlane.xlu0 %3830 }
 0x38a   : > { %v4369_v43 = vrot.slane %v3834_v24, %v8285_v1  ;;  %v4365_v10 = vrot.slane %v3831_v31, %v8282_v21 }
 0x38c   : > { %v9029_v28 = vsel %vm3325_vm3, %v4369_v43, %v4365_v10  ;;  %4703 = vadd.xlane.f32.xlu1 %v4702_v23  ;;  %4700 = vadd.xlane.f32.xlu0 %v4699_v48  ;;  %v2778_v48 = vmul.f32 %v8577_v0, %v8036_v6 }
 0x38d   : > { %v4547_v42 = vpop.xlane.xlu1 %4546  ;;  %v4544_v4 = vpop.xlane.xlu0 %4543 }
 0x38e   : > { %v4964_v34 = vrot.slane %v4547_v42, %v8247_v5  ;;  %v4960_v35 = vrot.slane %v4544_v4, %v8245_v38  ;;  %v2852_v0 = vsel %vm2522_vm0, %v2778_v48, 0.0 }
 0x390   : > { %v9040_v49 = vsel %vm2928_vm1, %v4964_v34, %v4960_v35  ;;  %4836 = vadd.xlane.f32.xlu1 %v4835_v26  ;;  %4833 = vadd.xlane.f32.xlu0 %v4832_v40 }
 0x391   : > { %v4680_v12 = vpop.xlane.xlu1 %4679  ;;  %v4677_v16 = vpop.xlane.xlu0 %4676 }
 0x392   : > { %v5156_v56 = vrot.slane %v4680_v12, %v8270_v55  ;;  %v5152_v41 = vrot.slane %v4677_v16, %v8266_v27  ;;  %v2849_v12 = vsel %vm2522_vm0, %v2777_v14, 0.0  ;;  %v3509_v16 = vmul.f32 %v8596_v36, %v8030_v63 }
 0x394   : > { %v9051_v24 = vsel %vm3130_vm2, %v5156_v56, %v5152_v41  ;;  %2587 = vadd.xlane.f32.xlu1 %v2586_v20  ;;  %2584 = vadd.xlane.f32.xlu0 %v2583_v45 }
 0x395   : > { %v2564_v31 = vpop.xlane.xlu1 %2563  ;;  %v2561_v43 = vpop.xlane.xlu0 %2560 }
 0x396   : > { %v2982_v10 = vrot.slane %v2564_v31, %v8247_v5  ;;  %v2978_v23 = vrot.slane %v2561_v43, %v8245_v38  ;;  %v3581_v31 = vsel %vm2522_vm0, %v3509_v16, 0.0  ;;  %v3643_v43 = vmul.f32 %v8612_v33, %v8036_v6 }
 0x397   : > { %v4488_v16 = vmul.f32 %v8647_v57, %v8030_v63 }
 0x398   : > { %v2983_v42 = vsel %vm2928_vm1, %v2982_v10, %v2978_v23  ;;  %2720 = vadd.xlane.f32.xlu1 %v2719_v2  ;;  %2717 = vadd.xlane.f32.xlu0 %v2716_v60 }
 0x399   : > { %v3076_v4 = vsel %vm3075_vm9, %v2983_v42, %v8845_v32  ;;  %v2697_v34 = vpop.xlane.xlu1 %2696  ;;  %v2694_v35 = vpop.xlane.xlu0 %2693  ;;  %v3717_v42 = vsel %vm2522_vm0, %v3643_v43, 0.0 }
 0x39a   : > { %v3078_v26 = vsel %vm3077_vm10, %v8970_v54, %v3076_v4  ;;  %v3184_v40 = vrot.slane %v2697_v34, %v8270_v55  ;;  %v3180_v37 = vrot.slane %v2694_v35, %v8266_v27  ;;  %v3776_v4 = vmul.f32 %v8631_v52, %v8036_v6 }
 0x39b   : > { %v3775_v34 = vmul.f32 %v8631_v52, %v8030_v63 }
 0x39c   : > { %v3185_v32 = vsel %vm3130_vm2, %v3184_v40, %v3180_v37  ;;  %2853 = vadd.xlane.f32.xlu1 %v2852_v0  ;;  %2850 = vadd.xlane.f32.xlu0 %v2849_v12  ;;  %v3850_v0 = vsel %vm2522_vm0, %v3776_v4, 0.0  ;;  %v4489_v12 = vmul.f32 %v8647_v57, %v8036_v6  ;;  %v4560_v57 = vsel %vm2522_vm0, %v4488_v16, 0.0 }
 0x39d   : > { %v3272_v54 = vsel %vm3075_vm9, %v3185_v32, %v8860_v44  ;;  %v2830_v56 = vpop.xlane.xlu1 %2829  ;;  %v2827_v41 = vpop.xlane.xlu0 %2826  ;;  %v3642_v44 = vmul.f32 %v8612_v33, %v8030_v63  ;;  %v3847_v52 = vsel %vm2522_vm0, %v3775_v34, 0.0  ;;  %v9153_v34 = vld [vmem:[%s10022_s2] ss:$0 sm:$0xff] }
 0x39e   : > { %v3273_v20 = vsel %vm3077_vm10, %v8981_v29, %v3272_v54  ;;  %v3379_v45 = vrot.slane %v2830_v56, %v8285_v1  ;;  %v3375_v62 = vrot.slane %v2827_v41, %v8282_v21 }
 0x39f   : > { %v3479_v36 = vsel %vm3478_vm11, %v3078_v26, %v3273_v20  ;;  %v3714_v33 = vsel %vm2522_vm0, %v3642_v44, 0.0 }
 0x3a0   : > { %v3380_v10 = vsel %vm3325_vm3, %v3379_v45, %v3375_v62  ;;  %3585 = vadd.xlane.f32.xlu1 %v3584_v9  ;;  %3582 = vadd.xlane.f32.xlu0 %v3581_v31  ;;  %v4563_v45 = vsel %vm2522_vm0, %v4489_v12, 0.0  ;;  %v4622_v62 = vmul.f32 %v8663_v53, %v8036_v6  ;;  %v4621_v9 = vmul.f32 %v8663_v53, %v8030_v63 }
 0x3a1   : > { %v3467_v29 = vsel %vm3075_vm9, %v3380_v10, %v8875_v58  ;;  %v3562_v23 = vpop.xlane.xlu1 %3561  ;;  %v3559_v48 = vpop.xlane.xlu0 %3558 }
 0x3a2   : > { %v3468_v2 = vsel %vm3077_vm10, %v8992_v15, %v3467_v29  ;;  %v3976_v60 = vrot.slane %v3562_v23, %v8247_v5  ;;  %v3972_v14 = vrot.slane %v3559_v48, %v8245_v38  ;;  %v4696_v23 = vsel %vm2522_vm0, %v4622_v62, 0.0  ;;  %v9193_v62 = vld [vmem:[%s10022_s2 + $0x2] ss:$0 sm:$0xff] }
 0x3a3   : > { %v9133_v29 = vsel %vm3481_vm12, %v3479_v36, %v3468_v2  ;;  %v4693_v53 = vsel %vm2522_vm0, %v4621_v9, 0.0  ;;  %v4755_v48 = vmul.f32 %v8788_v61, %v8036_v6  ;;  %v2784_v9 = vmul.f32 %v9193_v62, %v8062_v3 }
 0x3a4   : > { %v3977_v58 = vsel %vm2928_vm1, %v3976_v60, %v3972_v14  ;;  %3718 = vadd.xlane.f32.xlu1 %v3717_v42  ;;  %3715 = vadd.xlane.f32.xlu0 %v3714_v33 }
 0x3a5   : > { %v4064_v15 = vsel %vm3075_vm9, %v3977_v58, %v8890_v11  ;;  %v3695_v35 = vpop.xlane.xlu1 %3694  ;;  %v3692_v26 = vpop.xlane.xlu0 %3691  ;;  %v4829_v6 = vsel %vm2522_vm0, %v4755_v48, 0.0  ;;  %v2516_v58 = vmul.f32 %v9153_v34, %v8047_v25 }
 0x3a6   : > { %v4065_v40 = vsel %vm3077_vm10, %v9007_v46, %v4064_v15  ;;  %v4168_v37 = vrot.slane %v3695_v35, %v8270_v55  ;;  %v4164_v19 = vrot.slane %v3692_v26, %v8266_v27 }
 0x3a7   : > { %v2601_v16 = vsel %vm2522_vm0, %v2516_v58, 0.0 }
 0x3a8   : > { %v4169_v11 = vsel %vm3130_vm2, %v4168_v37, %v4164_v19  ;;  %3851 = vadd.xlane.f32.xlu1 %v3850_v0  ;;  %3848 = vadd.xlane.f32.xlu0 %v3847_v52 }
 0x3a9   : > { %v4256_v46 = vsel %vm3075_vm9, %v4169_v11, %v8905_v30  ;;  %v3828_v32 = vpop.xlane.xlu1 %3827  ;;  %v3825_v54 = vpop.xlane.xlu0 %3824  ;;  %v9172_v11 = vld [vmem:[%s10022_s2 + $0x1] ss:$0 sm:$0xff] }
 0x3aa   : > { %v4257_v56 = vsel %vm3077_vm10, %v9018_v22, %v4256_v46  ;;  %v4360_v41 = vrot.slane %v3828_v32, %v8285_v1  ;;  %v4356_v20 = vrot.slane %v3825_v54, %v8282_v21 }
 0x3ab   : > { %v4459_v52 = vsel %vm3478_vm11, %v4065_v40, %v4257_v56 }
 0x3ac   : > { %v4361_v30 = vsel %vm3325_vm3, %v4360_v41, %v4356_v20  ;;  %4564 = vadd.xlane.f32.xlu1 %v4563_v45  ;;  %4561 = vadd.xlane.f32.xlu0 %v4560_v57 }
 0x3ad   : > { %v4448_v22 = vsel %vm3075_vm9, %v4361_v30, %v8920_v7  ;;  %v4541_v31 = vpop.xlane.xlu1 %4540  ;;  %v4538_v43 = vpop.xlane.xlu0 %4537  ;;  %v4754_v7 = vmul.f32 %v8788_v61, %v8030_v63 }
 0x3ae   : > { %v4955_v44 = vrot.slane %v4541_v31, %v8247_v5  ;;  %v4951_v10 = vrot.slane %v4538_v43, %v8245_v38  ;;  %v4449_v54 = vsel %vm3077_vm10, %v9029_v28, %v4448_v22  ;;  %v2783_v28 = vmul.f32 %v9193_v62, %v8047_v25 }
 0x3af   : > { %v4826_v63 = vsel %vm2522_vm0, %v4754_v7, 0.0  ;;  %v9186_v20 = vsel %vm3481_vm12, %v4459_v52, %v4449_v54  ;;  %v9244_v52 = vld [vmem:[%s10022_s2 + $0x5] ss:$0 sm:$0xff] }
 0x3b0   : > { %v4956_v60 = vsel %vm2928_vm1, %v4955_v44, %v4951_v10  ;;  %4697 = vadd.xlane.f32.xlu1 %v4696_v23  ;;  %4694 = vadd.xlane.f32.xlu0 %v4693_v53  ;;  %v2870_v10 = vsel %vm2522_vm0, %v2784_v9, 0.0  ;;  %v2867_v23 = vsel %vm2522_vm0, %v2783_v28, 0.0  ;;  %v9209_v53 = vld [vmem:[%s10022_s2 + $0x3] ss:$0 sm:$0xff] }
 0x3b1   : > { %v5043_v14 = vsel %vm3075_vm9, %v4956_v60, %v8935_v51  ;;  %v4674_v42 = vpop.xlane.xlu1 %4673  ;;  %v4671_v36 = vpop.xlane.xlu0 %4670  ;;  %v2517_v51 = vmul.f32 %v9153_v34, %v8062_v3  ;;  %v3516_v48 = vmul.f32 %v9209_v53, %v8062_v3  ;;  %v3515_v7 = vmul.f32 %v9209_v53, %v8047_v25 }
 0x3b2   : > { %v5044_v2 = vsel %vm3077_vm10, %v9040_v49, %v5043_v14  ;;  %v5147_v33 = vrot.slane %v4674_v42, %v8270_v55  ;;  %v5143_v4 = vrot.slane %v4671_v36, %v8266_v27 }
 0x3b3   : > { %v2604_v12 = vsel %vm2522_vm0, %v2517_v51, 0.0  ;;  %v9228_v51 = vld [vmem:[%s10022_s2 + $0x4] ss:$0 sm:$0xff] }
 0x3b4   : > { %v5148_v49 = vsel %vm3130_vm2, %v5147_v33, %v5143_v4  ;;  %4830 = vadd.xlane.f32.xlu1 %v4829_v6  ;;  %4827 = vadd.xlane.f32.xlu0 %v4826_v63  ;;  %v3602_v6 = vsel %vm2522_vm0, %v3516_v48, 0.0  ;;  %v3599_v63 = vsel %vm2522_vm0, %v3515_v7, 0.0  ;;  %v3649_v58 = vmul.f32 %v9228_v51, %v8062_v3  ;;  %v9276_v48 = vld [vmem:[%s10022_s2 + $0x7] ss:$0 sm:$0xff] }
 0x3b5   : > { %v5235_v15 = vsel %vm3075_vm9, %v5148_v49, %v8950_v39  ;;  %v2582_v35 = vpop.xlane.xlu1 %2581  ;;  %v2579_v26 = vpop.xlane.xlu0 %2578  ;;  %v2651_v39 = vmul.f32 %v9172_v11, %v8062_v3  ;;  %v3648_v49 = vmul.f32 %v9228_v51, %v8047_v25  ;;  %v4628_v7 = vmul.f32 %v9276_v48, %v8062_v3 }
 0x3b6   : > { %v5236_v37 = vsel %vm3077_vm10, %v9051_v24, %v5235_v15  ;;  %v3009_v19 = vrot.slane %v2582_v35, %v8247_v5  ;;  %v3005_v0 = vrot.slane %v2579_v26, %v8245_v38  ;;  %v2650_v24 = vmul.f32 %v9172_v11, %v8047_v25 }
 0x3b7   : > { %v2737_v45 = vsel %vm2522_vm0, %v2651_v39, 0.0  ;;  %v9221_v4 = vsel %vm3478_vm11, %v5044_v2, %v5236_v37 }
 0x3b8   : > { %v9179_v46 = vsel %vm2928_vm1, %v3009_v19, %v3005_v0  ;;  %2605 = vadd.xlane.f32.xlu1 %v2604_v12  ;;  %2602 = vadd.xlane.f32.xlu0 %v2601_v16  ;;  %v2734_v57 = vsel %vm2522_vm0, %v2650_v24, 0.0  ;;  %v3735_v19 = vsel %vm2522_vm0, %v3649_v58, 0.0  ;;  %v3732_v0 = vsel %vm2522_vm0, %v3648_v49, 0.0 }
 0x3b9   : > { %v2715_v40 = vpop.xlane.xlu1 %2714  ;;  %v2712_v32 = vpop.xlane.xlu0 %2711  ;;  %v3782_v12 = vmul.f32 %v9244_v52, %v8062_v3  ;;  %v3781_v16 = vmul.f32 %v9244_v52, %v8047_v25  ;;  %v4714_v58 = vsel %vm2522_vm0, %v4628_v7, 0.0 }
 0x3ba   : > { %v3211_v56 = vrot.slane %v2715_v40, %v8270_v55  ;;  %v3207_v41 = vrot.slane %v2712_v32, %v8266_v27 }
 0x3bc   : > { %v9200_v30 = vsel %vm3130_vm2, %v3211_v56, %v3207_v41  ;;  %2738 = vadd.xlane.f32.xlu1 %v2737_v45  ;;  %2735 = vadd.xlane.f32.xlu0 %v2734_v57  ;;  %v3868_v56 = vsel %vm2522_vm0, %v3782_v12, 0.0  ;;  %v3865_v41 = vsel %vm2522_vm0, %v3781_v16, 0.0  ;;  %v9260_v45 = vld [vmem:[%s10022_s2 + $0x6] ss:$0 sm:$0xff] }
 0x3bd   : > { %v2848_v22 = vpop.xlane.xlu1 %2847  ;;  %v2845_v31 = vpop.xlane.xlu0 %2844  ;;  %v4495_v57 = vmul.f32 %v9260_v45, %v8062_v3  ;;  %v4494_v9 = vmul.f32 %v9260_v45, %v8047_v25 }
 0x3be   : > { %v3406_v43 = vrot.slane %v2848_v22, %v8285_v1  ;;  %v3402_v44 = vrot.slane %v2845_v31, %v8282_v21 }
 0x3c0   : > { %v9216_v60 = vsel %vm3325_vm3, %v3406_v43, %v3402_v44  ;;  %2871 = vadd.xlane.f32.xlu1 %v2870_v10  ;;  %2868 = vadd.xlane.f32.xlu0 %v2867_v23  ;;  %v4581_v10 = vsel %vm2522_vm0, %v4495_v57, 0.0  ;;  %v4578_v23 = vsel %vm2522_vm0, %v4494_v9, 0.0  ;;  %v2649_v9 = vmul.f32 %v9172_v11, %v8065_v59 }
 0x3c1   : > { %v3580_v14 = vpop.xlane.xlu1 %3579  ;;  %v3577_v42 = vpop.xlane.xlu0 %3576 }
 0x3c2   : > { %v4003_v36 = vrot.slane %v3580_v14, %v8247_v5  ;;  %v3999_v33 = vrot.slane %v3577_v42, %v8245_v38  ;;  %v4627_v14 = vmul.f32 %v9276_v48, %v8047_v25 }
 0x3c4   : > { %v9235_v15 = vsel %vm2928_vm1, %v4003_v36, %v3999_v33  ;;  %3603 = vadd.xlane.f32.xlu1 %v3602_v6  ;;  %3600 = vadd.xlane.f32.xlu0 %v3599_v63  ;;  %v4711_v49 = vsel %vm2522_vm0, %v4627_v14, 0.0  ;;  %v2731_v14 = vsel %vm2522_vm0, %v2649_v9, 0.0 }
 0x3c5   : > { %v3713_v2 = vpop.xlane.xlu1 %3712  ;;  %v3710_v35 = vpop.xlane.xlu0 %3709 }
 0x3c6   : > { %v4195_v26 = vrot.slane %v3713_v2, %v8270_v55  ;;  %v4191_v37 = vrot.slane %v3710_v35, %v8266_v27  ;;  %v4761_v2 = vmul.f32 %v8788_v61, %v8062_v3  ;;  %v4760_v35 = vmul.f32 %v8788_v61, %v8047_v25 }
 0x3c7   : > { %v2515_v3 = vmul.f32 %v9153_v34, %v8065_v59  ;;  %v2514_v25 = vmul.f32 %v9153_v34, %v8054_v17 }
 0x3c8   : > { %v9251_v39 = vsel %vm3130_vm2, %v4195_v26, %v4191_v37  ;;  %3736 = vadd.xlane.f32.xlu1 %v3735_v19  ;;  %3733 = vadd.xlane.f32.xlu0 %v3732_v0  ;;  %v4847_v16 = vsel %vm2522_vm0, %v4761_v2, 0.0 }
 0x3c9   : > { %v3846_v24 = vpop.xlane.xlu1 %3845  ;;  %v3843_v40 = vpop.xlane.xlu0 %3842  ;;  %v2595_v57 = vsel %vm2522_vm0, %v2514_v25, 0.0 }
 0x3ca   : > { %v4387_v32 = vrot.slane %v3846_v24, %v8285_v1  ;;  %v4383_v54 = vrot.slane %v3843_v40, %v8282_v21  ;;  %v4844_v24 = vsel %vm2522_vm0, %v4760_v35, 0.0 }
 0x3cc   : > { %v9267_v28 = vsel %vm3325_vm3, %v4387_v32, %v4383_v54  ;;  %3869 = vadd.xlane.f32.xlu1 %v3868_v56  ;;  %3866 = vadd.xlane.f32.xlu0 %v3865_v41  ;;  %v2598_v41 = vsel %vm2522_vm0, %v2515_v3, 0.0 }
 0x3cd   : > { %v4559_v22 = vpop.xlane.xlu1 %4558  ;;  %v4556_v31 = vpop.xlane.xlu0 %4555 }
 0x3ce   : > { %v4982_v43 = vrot.slane %v4559_v22, %v8247_v5  ;;  %v4978_v44 = vrot.slane %v4556_v31, %v8245_v38  ;;  %v2648_v22 = vmul.f32 %v9172_v11, %v8054_v17 }
 0x3d0   : > { %v9283_v42 = vsel %vm2928_vm1, %v4982_v43, %v4978_v44  ;;  %4582 = vadd.xlane.f32.xlu1 %v4581_v10  ;;  %4579 = vadd.xlane.f32.xlu0 %v4578_v23 }
 0x3d1   : > { %v4692_v36 = vpop.xlane.xlu1 %4691  ;;  %v4689_v33 = vpop.xlane.xlu0 %4688 }
 0x3d2   : > { %v5174_v6 = vrot.slane %v4692_v36, %v8270_v55  ;;  %v5170_v63 = vrot.slane %v4689_v33, %v8266_v27  ;;  %v2728_v36 = vsel %vm2522_vm0, %v2648_v22, 0.0  ;;  %v2782_v33 = vmul.f32 %v9193_v62, %v8065_v59 }
 0x3d4   : > { %v9294_v26 = vsel %vm3130_vm2, %v5174_v6, %v5170_v63  ;;  %4715 = vadd.xlane.f32.xlu1 %v4714_v58  ;;  %4712 = vadd.xlane.f32.xlu0 %v4711_v49  ;;  %v2781_v6 = vmul.f32 %v9193_v62, %v8054_v17 }
 0x3d5   : > { %v4825_v37 = vpop.xlane.xlu1 %4824  ;;  %v4822_v19 = vpop.xlane.xlu0 %4821 }
 0x3d6   : > { %v5366_v0 = vrot.slane %v4825_v37, %v8285_v1  ;;  %v5362_v12 = vrot.slane %v4822_v19, %v8282_v21  ;;  %v2864_v37 = vsel %vm2522_vm0, %v2782_v33, 0.0  ;;  %v2861_v19 = vsel %vm2522_vm0, %v2781_v6, 0.0 }
 0x3d8   : > { %v9305_v61 = vsel %vm3325_vm3, %v5366_v0, %v5362_v12  ;;  %4848 = vadd.xlane.f32.xlu1 %v4847_v16  ;;  %4845 = vadd.xlane.f32.xlu0 %v4844_v24  ;;  %v3514_v0 = vmul.f32 %v9209_v53, %v8065_v59  ;;  %v3513_v12 = vmul.f32 %v9209_v53, %v8054_v17 }
 0x3d9   : > { %v2576_v40 = vpop.xlane.xlu1 %2575  ;;  %v2573_v32 = vpop.xlane.xlu0 %2572 }
 0x3da   : > { %v3000_v54 = vrot.slane %v2576_v40, %v8247_v5  ;;  %v2996_v56 = vrot.slane %v2573_v32, %v8245_v38  ;;  %v3596_v32 = vsel %vm2522_vm0, %v3514_v0, 0.0 }
 0x3dc   : > { %v3001_v31 = vsel %vm2928_vm1, %v3000_v54, %v2996_v56  ;;  %2599 = vadd.xlane.f32.xlu1 %v2598_v41  ;;  %2596 = vadd.xlane.f32.xlu0 %v2595_v57  ;;  %v3593_v54 = vsel %vm2522_vm0, %v3513_v12, 0.0  ;;  %v3647_v56 = vmul.f32 %v9228_v51, %v8065_v59  ;;  %v3646_v41 = vmul.f32 %v9228_v51, %v8054_v17 }
 0x3dd   : > { %v9318_v43 = vsel %vm3065_vm4, %v9179_v46, %v3001_v31  ;;  %v2709_v44 = vpop.xlane.xlu1 %2708  ;;  %v2706_v10 = vpop.xlane.xlu0 %2705 }
 0x3de   : > { %v3202_v23 = vrot.slane %v2709_v44, %v8270_v55  ;;  %v3198_v7 = vrot.slane %v2706_v10, %v8266_v27  ;;  %v3729_v10 = vsel %vm2522_vm0, %v3647_v56, 0.0 }
 0x3e0   : > { %v3203_v63 = vsel %vm3130_vm2, %v3202_v23, %v3198_v7  ;;  %2732 = vadd.xlane.f32.xlu1 %v2731_v14  ;;  %2729 = vadd.xlane.f32.xlu0 %v2728_v36  ;;  %v3726_v23 = vsel %vm2522_vm0, %v3646_v41, 0.0  ;;  %v3780_v7 = vmul.f32 %v9244_v52, %v8065_v59  ;;  %v3779_v14 = vmul.f32 %v9244_v52, %v8054_v17 }
 0x3e1   : > { %v9331_v46 = vsel %vm3065_vm4, %v9200_v30, %v3203_v63  ;;  %v2842_v58 = vpop.xlane.xlu1 %2841  ;;  %v2839_v49 = vpop.xlane.xlu0 %2838 }
 0x3e2   : > { %v3397_v2 = vrot.slane %v2842_v58, %v8285_v1  ;;  %v3393_v35 = vrot.slane %v2839_v49, %v8282_v21  ;;  %v3862_v49 = vsel %vm2522_vm0, %v3780_v7, 0.0 }
 0x3e4   : > { %v3398_v16 = vsel %vm3325_vm3, %v3397_v2, %v3393_v35  ;;  %2865 = vadd.xlane.f32.xlu1 %v2864_v37  ;;  %2862 = vadd.xlane.f32.xlu0 %v2861_v19  ;;  %v3859_v2 = vsel %vm2522_vm0, %v3779_v14, 0.0  ;;  %v4493_v35 = vmul.f32 %v9260_v45, %v8065_v59  ;;  %v4492_v37 = vmul.f32 %v9260_v45, %v8054_v17 }
 0x3e5   : > { %v9344_v30 = vsel %vm3065_vm4, %v9216_v60, %v3398_v16  ;;  %v3574_v24 = vpop.xlane.xlu1 %3573  ;;  %v3571_v3 = vpop.xlane.xlu0 %3570 }
 0x3e6   : > { %v3994_v25 = vrot.slane %v3574_v24, %v8247_v5  ;;  %v3990_v40 = vrot.slane %v3571_v3, %v8245_v38  ;;  %v4575_v3 = vsel %vm2522_vm0, %v4493_v35, 0.0 }
 0x3e8   : > { %v3995_v57 = vsel %vm2928_vm1, %v3994_v25, %v3990_v40  ;;  %3597 = vadd.xlane.f32.xlu1 %v3596_v32  ;;  %3594 = vadd.xlane.f32.xlu0 %v3593_v54  ;;  %v4572_v25 = vsel %vm2522_vm0, %v4492_v37, 0.0  ;;  %v4626_v40 = vmul.f32 %v9276_v48, %v8065_v59  ;;  %v4625_v32 = vmul.f32 %v9276_v48, %v8054_v17 }
 0x3e9   : > { %v9357_v60 = vsel %vm3065_vm4, %v9235_v15, %v3995_v57  ;;  %v3707_v9 = vpop.xlane.xlu1 %3706  ;;  %v3704_v22 = vpop.xlane.xlu0 %3703 }
 0x3ea   : > { %v4186_v31 = vrot.slane %v3707_v9, %v8270_v55  ;;  %v4182_v44 = vrot.slane %v3704_v22, %v8266_v27  ;;  %v4708_v22 = vsel %vm2522_vm0, %v4626_v40, 0.0 }
 0x3ec   : > { %v4187_v36 = vsel %vm3130_vm2, %v4186_v31, %v4182_v44  ;;  %3730 = vadd.xlane.f32.xlu1 %v3729_v10  ;;  %3727 = vadd.xlane.f32.xlu0 %v3726_v23  ;;  %v4705_v31 = vsel %vm2522_vm0, %v4625_v32, 0.0  ;;  %v9405_v44 = vld [vmem:[%s10022_s2 + $0x8] ss:$0 sm:$0xff] }
 0x3ed   : > { %v9370_v15 = vsel %vm3065_vm4, %v9251_v39, %v4187_v36  ;;  %v3840_v33 = vpop.xlane.xlu1 %3839  ;;  %v3837_v6 = vpop.xlane.xlu0 %3836  ;;  %v4759_v10 = vmul.f32 %v9405_v44, %v8065_v59 }
 0x3ee   : > { %v4378_v63 = vrot.slane %v3840_v33, %v8285_v1  ;;  %v4374_v58 = vrot.slane %v3837_v6, %v8282_v21 }
 0x3f0   : > { %v4379_v19 = vsel %vm3325_vm3, %v4378_v63, %v4374_v58  ;;  %3863 = vadd.xlane.f32.xlu1 %v3862_v49  ;;  %3860 = vadd.xlane.f32.xlu0 %v3859_v2  ;;  %v4841_v63 = vsel %vm2522_vm0, %v4759_v10, 0.0  ;;  %v10037_v58 = vld [vmem:[#allocation7_spill] sm:$0xff]  ;;  %v10038_v49 = vld [vmem:[#allocation5_spill] sm:$0xff] }
 0x3f1   : > { %v9383_v39 = vsel %vm3065_vm4, %v9267_v28, %v4379_v19  ;;  %v4553_v0 = vpop.xlane.xlu1 %4552  ;;  %v4550_v12 = vpop.xlane.xlu0 %4549  ;;  %v2520_v2 = vmul.f32 %v9153_v34, %v10038_v49 }
 0x3f2   : > { %v4973_v16 = vrot.slane %v4553_v0, %v8247_v5  ;;  %v4969_v24 = vrot.slane %v4550_v12, %v8245_v38 }
 0x3f4   : > { %v4974_v54 = vsel %vm2928_vm1, %v4973_v16, %v4969_v24  ;;  %4576 = vadd.xlane.f32.xlu1 %v4575_v3  ;;  %4573 = vadd.xlane.f32.xlu0 %v4572_v25  ;;  %v2613_v24 = vsel %vm2522_vm0, %v2520_v2, 0.0  ;;  %v2655_v3 = vmul.f32 %v9172_v11, %v10037_v58  ;;  %v2654_v25 = vmul.f32 %v9172_v11, %v10038_v49 }
 0x3f5   : > { %v9396_v28 = vsel %vm3065_vm4, %v9283_v42, %v4974_v54  ;;  %v4686_v56 = vpop.xlane.xlu1 %4685  ;;  %v4683_v41 = vpop.xlane.xlu0 %4682  ;;  %v4758_v42 = vmul.f32 %v9405_v44, %v8054_v17  ;;  %v2521_v17 = vmul.f32 %v9153_v34, %v10037_v58 }
 0x3f6   : > { %v5165_v57 = vrot.slane %v4686_v56, %v8270_v55  ;;  %v5161_v9 = vrot.slane %v4683_v41, %v8266_v27  ;;  %v2749_v41 = vsel %vm2522_vm0, %v2655_v3, 0.0 }
 0x3f7   : > { %v4838_v59 = vsel %vm2522_vm0, %v4758_v42, 0.0  ;;  %v2616_v16 = vsel %vm2522_vm0, %v2521_v17, 0.0 }
 0x3f8   : > { %v5166_v23 = vsel %vm3130_vm2, %v5165_v57, %v5161_v9  ;;  %4709 = vadd.xlane.f32.xlu1 %v4708_v22  ;;  %4706 = vadd.xlane.f32.xlu0 %v4705_v31  ;;  %v2746_v57 = vsel %vm2522_vm0, %v2654_v25, 0.0  ;;  %v2788_v9 = vmul.f32 %v9193_v62, %v10037_v58  ;;  %v2787_v22 = vmul.f32 %v9193_v62, %v10038_v49 }
 0x3f9   : > { %v9414_v7 = vsel %vm3065_vm4, %v9294_v26, %v5166_v23  ;;  %v4819_v14 = vpop.xlane.xlu1 %4818  ;;  %v4816_v36 = vpop.xlane.xlu0 %4815 }
 0x3fa   : > { %v5357_v33 = vrot.slane %v4819_v14, %v8285_v1  ;;  %v5353_v6 = vrot.slane %v4816_v36, %v8282_v21  ;;  %v2882_v36 = vsel %vm2522_vm0, %v2788_v9, 0.0 }
 0x3fc   : > { %v5358_v35 = vsel %vm3325_vm3, %v5357_v33, %v5353_v6  ;;  %4842 = vadd.xlane.f32.xlu1 %v4841_v63  ;;  %4839 = vadd.xlane.f32.xlu0 %v4838_v59  ;;  %v2879_v33 = vsel %vm2522_vm0, %v2787_v22, 0.0  ;;  %v3520_v6 = vmul.f32 %v9209_v53, %v10037_v58  ;;  %v3519_v63 = vmul.f32 %v9209_v53, %v10038_v49 }
 0x3fd   : > { %v9427_v26 = vsel %vm3065_vm4, %v9305_v61, %v5358_v35  ;;  %v2594_v37 = vpop.xlane.xlu1 %2593  ;;  %v2591_v19 = vpop.xlane.xlu0 %2590 }
 0x3fe   : > { %v3027_v0 = vrot.slane %v2594_v37, %v8247_v5  ;;  %v3023_v12 = vrot.slane %v2591_v19, %v8245_v38  ;;  %v3614_v19 = vsel %vm2522_vm0, %v3520_v6, 0.0  ;;  %v4498_v6 = vmul.f32 %v9260_v45, %v10038_v49 }
 0x400   : > { %v9438_v40 = vsel %vm2928_vm1, %v3027_v0, %v3023_v12  ;;  %2617 = vadd.xlane.f32.xlu1 %v2616_v16  ;;  %2614 = vadd.xlane.f32.xlu0 %v2613_v24  ;;  %v3611_v0 = vsel %vm2522_vm0, %v3519_v63, 0.0  ;;  %v3653_v12 = vmul.f32 %v9228_v51, %v10037_v58  ;;  %v3652_v16 = vmul.f32 %v9228_v51, %v10038_v49 }
 0x401   : > { %v2727_v61 = vpop.xlane.xlu1 %2726  ;;  %v2724_v32 = vpop.xlane.xlu0 %2723 }
 0x402   : > { %v3229_v54 = vrot.slane %v2727_v61, %v8270_v55  ;;  %v3225_v56 = vrot.slane %v2724_v32, %v8266_v27 }
 0x404   : > { %v9449_v31 = vsel %vm3130_vm2, %v3229_v54, %v3225_v56  ;;  %2750 = vadd.xlane.f32.xlu1 %v2749_v41  ;;  %2747 = vadd.xlane.f32.xlu0 %v2746_v57  ;;  %v3747_v54 = vsel %vm2522_vm0, %v3653_v12, 0.0  ;;  %v3744_v56 = vsel %vm2522_vm0, %v3652_v16, 0.0  ;;  %v3786_v41 = vmul.f32 %v9244_v52, %v10037_v58 }
 0x405   : > { %v2860_v10 = vpop.xlane.xlu1 %2859  ;;  %v2857_v42 = vpop.xlane.xlu0 %2856  ;;  %v3785_v57 = vmul.f32 %v9244_v52, %v10038_v49  ;;  %v4632_v12 = vmul.f32 %v9276_v48, %v10037_v58  ;;  %v4631_v16 = vmul.f32 %v9276_v48, %v10038_v49 }
 0x406   : > { %v3424_v23 = vrot.slane %v2860_v10, %v8285_v1  ;;  %v3420_v14 = vrot.slane %v2857_v42, %v8282_v21 }
 0x408   : > { %v9460_v59 = vsel %vm3325_vm3, %v3424_v23, %v3420_v14  ;;  %2883 = vadd.xlane.f32.xlu1 %v2882_v36  ;;  %2880 = vadd.xlane.f32.xlu0 %v2879_v33  ;;  %v3880_v14 = vsel %vm2522_vm0, %v3786_v41, 0.0  ;;  %v3877_v36 = vsel %vm2522_vm0, %v3785_v57, 0.0  ;;  %v4499_v33 = vmul.f32 %v9260_v45, %v10037_v58  ;;  %v10039_v57 = vld [vmem:[#allocation8_spill] sm:$0xff] }
 0x409   : > { %v3592_v17 = vpop.xlane.xlu1 %3591  ;;  %v3589_v2 = vpop.xlane.xlu0 %3588  ;;  %v4723_v41 = vsel %vm2522_vm0, %v4631_v16, 0.0 }
 0x40a   : > { %v4021_v35 = vrot.slane %v3592_v17, %v8247_v5  ;;  %v4017_v37 = vrot.slane %v3589_v2, %v8245_v38 }
 0x40c   : > { %v9471_v24 = vsel %vm2928_vm1, %v4021_v35, %v4017_v37  ;;  %3615 = vadd.xlane.f32.xlu1 %v3614_v19  ;;  %3612 = vadd.xlane.f32.xlu0 %v3611_v0  ;;  %v4593_v19 = vsel %vm2522_vm0, %v4499_v33, 0.0  ;;  %v4590_v0 = vsel %vm2522_vm0, %v4498_v6, 0.0 }
 0x40d   : > { %v3725_v3 = vpop.xlane.xlu1 %3724  ;;  %v3722_v25 = vpop.xlane.xlu0 %3721 }
 0x40e   : > { %v4213_v61 = vrot.slane %v3725_v3, %v8270_v55  ;;  %v4209_v32 = vrot.slane %v3722_v25, %v8266_v27 }
 0x410   : > { %v9482_v9 = vsel %vm3130_vm2, %v4213_v61, %v4209_v32  ;;  %3748 = vadd.xlane.f32.xlu1 %v3747_v54  ;;  %3745 = vadd.xlane.f32.xlu0 %v3744_v56  ;;  %v4726_v56 = vsel %vm2522_vm0, %v4632_v12, 0.0 }
 0x411   : > { %v3858_v22 = vpop.xlane.xlu1 %3857  ;;  %v3855_v10 = vpop.xlane.xlu0 %3854 }
 0x412   : > { %v4405_v42 = vrot.slane %v3858_v22, %v8285_v1  ;;  %v4401_v23 = vrot.slane %v3855_v10, %v8282_v21  ;;  %v2519_v22 = vmul.f32 %v9153_v34, %v10039_v57  ;;  %v10040_v10 = vld [vmem:[#allocation6_spill] sm:$0xff] }
 0x414   : > { %v9493_v63 = vsel %vm3325_vm3, %v4405_v42, %v4401_v23  ;;  %3881 = vadd.xlane.f32.xlu1 %v3880_v14  ;;  %3878 = vadd.xlane.f32.xlu0 %v3877_v36  ;;  %v2518_v42 = vmul.f32 %v9153_v34, %v10040_v10  ;;  %v2652_v34 = vmul.f32 %v9172_v11, %v10040_v10 }
 0x415   : > { %v4571_v17 = vpop.xlane.xlu1 %4570  ;;  %v4568_v2 = vpop.xlane.xlu0 %4567 }
 0x416   : > { %v5000_v35 = vrot.slane %v4571_v17, %v8247_v5  ;;  %v4996_v37 = vrot.slane %v4568_v2, %v8245_v38  ;;  %v2610_v17 = vsel %vm2522_vm0, %v2519_v22, 0.0  ;;  %v2607_v2 = vsel %vm2522_vm0, %v2518_v42, 0.0 }
 0x418   : > { %v9504_v3 = vsel %vm2928_vm1, %v5000_v35, %v4996_v37  ;;  %4594 = vadd.xlane.f32.xlu1 %v4593_v19  ;;  %4591 = vadd.xlane.f32.xlu0 %v4590_v0  ;;  %v2653_v35 = vmul.f32 %v9172_v11, %v10039_v57  ;;  %v2785_v11 = vmul.f32 %v9193_v62, %v10040_v10 }
 0x419   : > { %v4704_v25 = vpop.xlane.xlu1 %4703  ;;  %v4701_v61 = vpop.xlane.xlu0 %4700 }
 0x41a   : > { %v5192_v32 = vrot.slane %v4704_v25, %v8270_v55  ;;  %v5188_v54 = vrot.slane %v4701_v61, %v8266_v27  ;;  %v2743_v25 = vsel %vm2522_vm0, %v2653_v35, 0.0  ;;  %v2740_v61 = vsel %vm2522_vm0, %v2652_v34, 0.0 }
 0x41c   : > { %v9515_v23 = vsel %vm3130_vm2, %v5192_v32, %v5188_v54  ;;  %4727 = vadd.xlane.f32.xlu1 %v4726_v56  ;;  %4724 = vadd.xlane.f32.xlu0 %v4723_v41  ;;  %v2786_v32 = vmul.f32 %v9193_v62, %v10039_v57  ;;  %v2873_v62 = vsel %vm2522_vm0, %v2785_v11, 0.0 }
 0x41d   : > { %v4837_v14 = vpop.xlane.xlu1 %4836  ;;  %v4834_v36 = vpop.xlane.xlu0 %4833 }
 0x41e   : > { %v5384_v33 = vrot.slane %v4837_v14, %v8285_v1  ;;  %v5380_v6 = vrot.slane %v4834_v36, %v8282_v21 }
 0x420   : > { %v9526_v37 = vsel %vm3325_vm3, %v5384_v33, %v5380_v6  ;;  %2611 = vadd.xlane.f32.xlu1 %v2610_v17  ;;  %2608 = vadd.xlane.f32.xlu0 %v2607_v2  ;;  %v2876_v33 = vsel %vm2522_vm0, %v2786_v32, 0.0  ;;  %v3518_v6 = vmul.f32 %v9209_v53, %v10039_v57 }
 0x421   : > { %v2588_v19 = vpop.xlane.xlu1 %2587  ;;  %v2585_v0 = vpop.xlane.xlu0 %2584 }
 0x422   : > { %v3018_v12 = vrot.slane %v2588_v19, %v8247_v5  ;;  %v3014_v16 = vrot.slane %v2585_v0, %v8245_v38 }
 0x424   : > { %v3019_v54 = vsel %vm2928_vm1, %v3018_v12, %v3014_v16  ;;  %2744 = vadd.xlane.f32.xlu1 %v2743_v25  ;;  %2741 = vadd.xlane.f32.xlu0 %v2740_v61  ;;  %v3608_v12 = vsel %vm2522_vm0, %v3518_v6, 0.0  ;;  %v3651_v16 = vmul.f32 %v9228_v51, %v10039_v57 }
 0x425   : > { %v3080_v56 = vsel %vm3067_vm5, %v3019_v54, %v9318_v43  ;;  %v2721_v41 = vpop.xlane.xlu1 %2720  ;;  %v2718_v22 = vpop.xlane.xlu0 %2717  ;;  %v3517_v43 = vmul.f32 %v9209_v53, %v10040_v10 }
 0x426   : > { %v3220_v42 = vrot.slane %v2721_v41, %v8270_v55  ;;  %v3216_v14 = vrot.slane %v2718_v22, %v8266_v27  ;;  %v9543_v36 = vsel %vm3069_vm6, %v9438_v40, %v3080_v56  ;;  %v3741_v41 = vsel %vm2522_vm0, %v3651_v16, 0.0 }
 0x427   : > { %v3605_v53 = vsel %vm2522_vm0, %v3517_v43, 0.0  ;;  %v3784_v22 = vmul.f32 %v9244_v52, %v10039_v57 }
 0x428   : > { %v3221_v17 = vsel %vm3130_vm2, %v3220_v42, %v3216_v14  ;;  %2877 = vadd.xlane.f32.xlu1 %v2876_v33  ;;  %2874 = vadd.xlane.f32.xlu0 %v2873_v62 }
 0x429   : > { %v3275_v2 = vsel %vm3067_vm5, %v3221_v17, %v9331_v46  ;;  %v2854_v35 = vpop.xlane.xlu1 %2853  ;;  %v2851_v40 = vpop.xlane.xlu0 %2850  ;;  %v3650_v46 = vmul.f32 %v9228_v51, %v10040_v10  ;;  %v3874_v17 = vsel %vm2522_vm0, %v3784_v22, 0.0 }
 0x42a   : > { %v3415_v34 = vrot.slane %v2854_v35, %v8285_v1  ;;  %v3411_v19 = vrot.slane %v2851_v40, %v8282_v21  ;;  %v9558_v0 = vsel %vm3069_vm6, %v9449_v31, %v3275_v2  ;;  %v4497_v2 = vmul.f32 %v9260_v45, %v10039_v57 }
 0x42b   : > { %v3738_v51 = vsel %vm2522_vm0, %v3650_v46, 0.0 }
 0x42c   : > { %v3416_v25 = vsel %vm3325_vm3, %v3415_v34, %v3411_v19  ;;  %3609 = vadd.xlane.f32.xlu1 %v3608_v12  ;;  %3606 = vadd.xlane.f32.xlu0 %v3605_v53  ;;  %v4630_v53 = vmul.f32 %v9276_v48, %v10039_v57 }
 0x42d   : > { %v3470_v61 = vsel %vm3067_vm5, %v3416_v25, %v9344_v30  ;;  %v3586_v32 = vpop.xlane.xlu1 %3585  ;;  %v3583_v31 = vpop.xlane.xlu0 %3582  ;;  %v3783_v30 = vmul.f32 %v9244_v52, %v10040_v10  ;;  %v6919_v25 = vld [vmem:[%s10023_s3] sm:$0xff]  }
 0x42e   : > { %v4012_v11 = vrot.slane %v3586_v32, %v8247_v5  ;;  %v4008_v54 = vrot.slane %v3583_v31, %v8245_v38  ;;  %v9573_v56 = vsel %vm3069_vm6, %v9460_v59, %v3470_v61 }
 0x42f   : > { %v3871_v52 = vsel %vm2522_vm0, %v3783_v30, 0.0  ;;  %v4746_v30 = vmul.f32 %v9405_v44, %v7967_v47 }
 0x430   : > { %v4013_v42 = vsel %vm2928_vm1, %v4012_v11, %v4008_v54  ;;  %3742 = vadd.xlane.f32.xlu1 %v3741_v41  ;;  %3739 = vadd.xlane.f32.xlu0 %v3738_v51  ;;  %v7008_v11 = vmov 0.0   ;;  %v4720_v51 = vsel %vm2522_vm0, %v4630_v53, 0.0 }
 0x431   : > { %v4067_v14 = vsel %vm3067_vm5, %v4013_v42, %v9357_v60  ;;  %v3719_v33 = vpop.xlane.xlu1 %3718  ;;  %v3716_v59 = vpop.xlane.xlu0 %3715  ;;  %v4496_v60 = vmul.f32 %v9260_v45, %v10040_v10  ;;  %v4587_v45 = vsel %vm2522_vm0, %v4497_v2, 0.0  ;;  %6508 = vmatprep.subr.bf16.mxu0 %v7008_v11  ;;  %v6920_v42 = vld [vmem:[%s10023_s3 + $0x8] sm:$0xff]   ;;  %v4762_v2 = vmul.f32 %v9405_v44, %v10040_v10  ;;  %6514 = vmatprep.mubr.msk.bf16.mxu0 %vm7009_vm13, %v7008_v11 }
 0x432   : > { %v4204_v62 = vrot.slane %v3719_v33, %v8270_v55  ;;  %v4200_v6 = vrot.slane %v3716_v59, %v8266_v27  ;;  %v9588_v43 = vsel %vm3069_vm6, %v9471_v24, %v4067_v14  ;;  %6509 = vmatpush3.bf16.msra.mxu0 %v6919_v25 }
 0x433   : > { %v4584_v46 = vsel %vm2522_vm0, %v4496_v60, 0.0  ;;  %6510 = vmatprep.subr.bf16.mxu0 %v7008_v11 }
 0x434   : > { %v4205_v35 = vsel %vm3130_vm2, %v4204_v62, %v4200_v6  ;;  %3875 = vadd.xlane.f32.xlu1 %v3874_v17  ;;  %3872 = vadd.xlane.f32.xlu0 %v3871_v52  ;;  %v6921_v6 = vld [vmem:[%s10023_s3 + $0x10] sm:$0xff]   ;;  %v4802_v52 = vsel %vm2522_vm0, %v4746_v30, 0.0 }
 0x435   : > { %v4259_v40 = vsel %vm3067_vm5, %v4205_v35, %v9370_v15  ;;  %v3852_v34 = vpop.xlane.xlu1 %3851  ;;  %v3849_v24 = vpop.xlane.xlu0 %3848  ;;  %v4629_v15 = vmul.f32 %v9276_v48, %v10040_v10 }
 0x436   : > { %v4396_v19 = vrot.slane %v3852_v34, %v8285_v1  ;;  %v4392_v12 = vrot.slane %v3849_v24, %v8282_v21  ;;  %v9605_v16 = vsel %vm3069_vm6, %v9482_v9, %v4259_v40  ;;  %6511 = vmatpush3.bf16.msra.mxu0 %v6920_v42 }
 0x437   : > { %v4717_v22 = vsel %vm2522_vm0, %v4629_v15, 0.0  ;;  %6512 = vmatprep.subr.bf16.mxu0 %v7008_v11 }
 0x438   : > { %v4397_v61 = vsel %vm3325_vm3, %v4396_v19, %v4392_v12  ;;  %4588 = vadd.xlane.f32.xlu1 %v4587_v45  ;;  %4585 = vadd.xlane.f32.xlu0 %v4584_v46  ;;  %v4850_v19 = vsel %vm2522_vm0, %v4762_v2, 0.0  ;;  %v4749_v12 = vmul.f32 %v9405_v44, %v7975_v50 }
 0x439   : > { %v4451_v32 = vsel %vm3067_vm5, %v4397_v61, %v9383_v39  ;;  %v4565_v9 = vpop.xlane.xlu1 %4564  ;;  %v4562_v31 = vpop.xlane.xlu0 %4561  ;;  %v4747_v39 = vmul.f32 %v9405_v44, %v7978_v13 }
 0x43a   : > { %v4991_v54 = vrot.slane %v4565_v9, %v8247_v5  ;;  %v4987_v48 = vrot.slane %v4562_v31, %v8245_v38  ;;  %v9622_v41 = vsel %vm3069_vm6, %v9493_v63, %v4451_v32  ;;  %6513 = vmatpush3.bf16.msra.mxu0 %v6921_v6  ;;  %v4811_v50 = vsel %vm2522_vm0, %v4749_v12, 0.0 }
 0x43b   : > { %v4805_v17 = vsel %vm2522_vm0, %v4747_v39, 0.0  ;;  %v4765_v32 = vmul.f32 %v9405_v44, %v10037_v58 }
 0x43c   : > { %v4992_v63 = vsel %vm2928_vm1, %v4991_v54, %v4987_v48  ;;  %4721 = vadd.xlane.f32.xlu1 %v4720_v51  ;;  %4718 = vadd.xlane.f32.xlu0 %v4717_v22 }
 0x43d   : > { %v5046_v14 = vsel %vm3067_vm5, %v4992_v63, %v9396_v28  ;;  %v4698_v33 = vpop.xlane.xlu1 %4697  ;;  %v4695_v59 = vpop.xlane.xlu0 %4694  ;;  %v4763_v28 = vmul.f32 %v9405_v44, %v10039_v57  ;;  %v4859_v51 = vsel %vm2522_vm0, %v4765_v32, 0.0 }
 0x43e   : > { %v5183_v13 = vrot.slane %v4698_v33, %v8270_v55  ;;  %v5179_v62 = vrot.slane %v4695_v59, %v8266_v27  ;;  %v9641_v47 = vsel %vm3069_vm6, %v9504_v3, %v5046_v14 }
 0x43f   : > { %v4853_v24 = vsel %vm2522_vm0, %v4763_v28, 0.0 }
 0x440   : > { %v5184_v3 = vsel %vm3130_vm2, %v5183_v13, %v5179_v62  ;;  %4806 = vadd.xlane.f32.xlu1 %v4805_v17  ;;  %4803 = vadd.xlane.f32.xlu0 %v4802_v52 }
 0x441   : > { %v5238_v60 = vsel %vm3067_vm5, %v5184_v3, %v9414_v7  ;;  %v4831_v35 = vpop.xlane.xlu1 %4830  ;;  %v4828_v40 = vpop.xlane.xlu0 %4827  ;;  %v4748_v7 = vmul.f32 %v9405_v44, %v7960_v18 }
 0x442   : > { %v5375_v57 = vrot.slane %v4831_v35, %v8285_v1  ;;  %v5371_v34 = vrot.slane %v4828_v40, %v8282_v21  ;;  %v9662_v10 = vsel %vm3069_vm6, %v9515_v23, %v5238_v60 }
 0x443   : > { %v4808_v18 = vsel %vm2522_vm0, %v4748_v7, 0.0 }
 0x444   : > { %v5376_v53 = vsel %vm3325_vm3, %v5375_v57, %v5371_v34  ;;  %4854 = vadd.xlane.f32.xlu1 %v4853_v24  ;;  %4851 = vadd.xlane.f32.xlu0 %v4850_v19 }
 0x445   : > { %v5430_v45 = vsel %vm3067_vm5, %v5376_v53, %v9427_v26  ;;  %v2606_v23 = vpop.xlane.xlu1 %2605  ;;  %v2603_v46 = vpop.xlane.xlu0 %2602  ;;  %v4764_v26 = vmul.f32 %v9405_v44, %v10038_v49 }
 0x446   : > { %v3045_v15 = vrot.slane %v2606_v23, %v8247_v5  ;;  %v3041_v25 = vrot.slane %v2603_v46, %v8245_v38  ;;  %v9677_v61 = vsel %vm3069_vm6, %v9526_v37, %v5430_v45 }
 0x447   : > { %v4856_v22 = vsel %vm2522_vm0, %v4764_v26, 0.0 }
 0x448   : > { %v3046_v9 = vsel %vm2928_vm1, %v3045_v15, %v3041_v25  ;;  %4812 = vadd.xlane.f32.xlu1 %v4811_v50  ;;  %4809 = vadd.xlane.f32.xlu0 %v4808_v18 }
 0x449   : > { %v2739_v31 = vpop.xlane.xlu1 %2738  ;;  %v2736_v54 = vpop.xlane.xlu0 %2735 }
 0x44a   : > { %v3247_v48 = vrot.slane %v2739_v31, %v8270_v55  ;;  %v3243_v37 = vrot.slane %v2736_v54, %v8266_v27 }
 0x44c   : > { %v3248_v39 = vsel %vm3130_vm2, %v3247_v48, %v3243_v37  ;;  %4860 = vadd.xlane.f32.xlu1 %v4859_v51  ;;  %4857 = vadd.xlane.f32.xlu0 %v4856_v22 }
 0x44d   : > { %v2872_v58 = vpop.xlane.xlu1 %2871  ;;  %v2869_v44 = vpop.xlane.xlu0 %2868 }
 0x44e   : > { %v3442_v49 = vrot.slane %v2872_v58, %v8285_v1  ;;  %v3438_v30 = vrot.slane %v2869_v44, %v8282_v21 }
 0x450   : > { %v3443_v42 = vsel %vm3325_vm3, %v3442_v49, %v3438_v30 }
 0x451   : > { %v3604_v63 = vpop.xlane.xlu1 %3603  ;;  %v3601_v14 = vpop.xlane.xlu0 %3600 }
 0x452   : > { %v4039_v33 = vrot.slane %v3604_v63, %v8247_v5  ;;  %v4035_v59 = vrot.slane %v3601_v14, %v8245_v38 }
 0x454   : > { %v4040_v13 = vsel %vm2928_vm1, %v4039_v33, %v4035_v59 }
 0x455   : > { %v3737_v62 = vpop.xlane.xlu1 %3736  ;;  %v3734_v6 = vpop.xlane.xlu0 %3733 }
 0x456   : > { %v4231_v17 = vrot.slane %v3737_v62, %v8270_v55  ;;  %v4227_v52 = vrot.slane %v3734_v6, %v8266_v27 }
 0x458   : > { %v4232_v28 = vsel %vm3130_vm2, %v4231_v17, %v4227_v52 }
 0x459   : > { %v3870_v2 = vpop.xlane.xlu1 %3869  ;;  %v3867_v3 = vpop.xlane.xlu0 %3866 }
 0x45a   : > { %v4423_v60 = vrot.slane %v3870_v2, %v8285_v1  ;;  %v4419_v35 = vrot.slane %v3867_v3, %v8282_v21 }
 0x45c   : > { %v4424_v40 = vsel %vm3325_vm3, %v4423_v60, %v4419_v35 }
 0x45d   : > { %v4583_v57 = vpop.xlane.xlu1 %4582  ;;  %v4580_v34 = vpop.xlane.xlu0 %4579 }
 0x45e   : > { %v5018_v24 = vrot.slane %v4583_v57, %v8247_v5  ;;  %v5014_v19 = vrot.slane %v4580_v34, %v8245_v38 }
 0x460   : > { %v9706_v12 = vsel %vm2928_vm1, %v5018_v24, %v5014_v19 }
 0x461   : > { %v4716_v7 = vpop.xlane.xlu1 %4715  ;;  %v4713_v53 = vpop.xlane.xlu0 %4712 }
 0x462   : > { %v5210_v45 = vrot.slane %v4716_v7, %v8270_v55  ;;  %v5206_v23 = vrot.slane %v4713_v53, %v8266_v27 }
 0x464   : > { %v9711_v46 = vsel %vm3130_vm2, %v5210_v45, %v5206_v23 }
 0x465   : > { %v4849_v15 = vpop.xlane.xlu1 %4848  ;;  %v4846_v25 = vpop.xlane.xlu0 %4845 }
 0x466   : > { %v5402_v50 = vrot.slane %v4849_v15, %v8285_v1  ;;  %v5398_v18 = vrot.slane %v4846_v25, %v8282_v21 }
 0x468   : > { %v9716_v32 = vsel %vm3325_vm3, %v5402_v50, %v5398_v18 }
 0x469   : > { %v2600_v26 = vpop.xlane.xlu1 %2599  ;;  %v2597_v31 = vpop.xlane.xlu0 %2596 }
 0x46a   : > { %v3036_v54 = vrot.slane %v2600_v26, %v8247_v5  ;;  %v3032_v48 = vrot.slane %v2597_v31, %v8245_v38 }
 0x46c   : > { %v3037_v37 = vsel %vm2928_vm1, %v3036_v54, %v3032_v48 }
 0x46d   : > { %v3082_v51 = vsel %vm3071_vm7, %v3037_v37, %v9543_v36  ;;  %v2733_v22 = vpop.xlane.xlu1 %2732  ;;  %v2730_v58 = vpop.xlane.xlu0 %2729 }
 0x46e   : > { %v3238_v44 = vrot.slane %v2733_v22, %v8270_v55  ;;  %v3234_v49 = vrot.slane %v2730_v58, %v8266_v27  ;;  %v9726_v30 = vsel %vm3073_vm8, %v3046_v9, %v3082_v51 }
 0x470   : > { %v3239_v63 = vsel %vm3130_vm2, %v3238_v44, %v3234_v49 }
 0x471   : > { %v3277_v14 = vsel %vm3071_vm7, %v3239_v63, %v9558_v0  ;;  %v2866_v33 = vpop.xlane.xlu1 %2865  ;;  %v2863_v59 = vpop.xlane.xlu0 %2862 }
 0x472   : > { %v3433_v62 = vrot.slane %v2866_v33, %v8285_v1  ;;  %v3429_v36 = vrot.slane %v2863_v59, %v8282_v21  ;;  %v9734_v6 = vsel %vm3073_vm8, %v3248_v39, %v3277_v14 }
 0x474   : > { %v3434_v17 = vsel %vm3325_vm3, %v3433_v62, %v3429_v36 }
 0x475   : > { %v3472_v9 = vsel %vm3071_vm7, %v3434_v17, %v9573_v56  ;;  %v3598_v52 = vpop.xlane.xlu1 %3597  ;;  %v3595_v2 = vpop.xlane.xlu0 %3594 }
 0x476   : > { %v4030_v3 = vrot.slane %v3598_v52, %v8247_v5  ;;  %v4026_v0 = vrot.slane %v3595_v2, %v8245_v38  ;;  %v9742_v60 = vsel %vm3073_vm8, %v3443_v42, %v3472_v9 }
 0x478   : > { %v4031_v35 = vsel %vm2928_vm1, %v4030_v3, %v4026_v0 }
 0x479   : > { %v4069_v39 = vsel %vm3071_vm7, %v4031_v35, %v9588_v43  ;;  %v3731_v57 = vpop.xlane.xlu1 %3730  ;;  %v3728_v34 = vpop.xlane.xlu0 %3727 }
 0x47a   : > { %v4222_v24 = vrot.slane %v3731_v57, %v8270_v55  ;;  %v4218_v56 = vrot.slane %v3728_v34, %v8266_v27  ;;  %v9750_v19 = vsel %vm3073_vm8, %v4040_v13, %v4069_v39 }
 0x47c   : > { %v4223_v7 = vsel %vm3130_vm2, %v4222_v24, %v4218_v56 }
 0x47d   : > { %v4261_v42 = vsel %vm3071_vm7, %v4223_v7, %v9605_v16  ;;  %v3864_v53 = vpop.xlane.xlu1 %3863  ;;  %v3861_v45 = vpop.xlane.xlu0 %3860 }
 0x47e   : > { %v4414_v23 = vrot.slane %v3864_v53, %v8285_v1  ;;  %v4410_v43 = vrot.slane %v3861_v45, %v8282_v21  ;;  %v9758_v15 = vsel %vm3073_vm8, %v4232_v28, %v4261_v42 }
 0x480   : > { %v4415_v25 = vsel %vm3325_vm3, %v4414_v23, %v4410_v43 }
 0x481   : > { %v4453_v13 = vsel %vm3071_vm7, %v4415_v25, %v9622_v41  ;;  %v4577_v50 = vpop.xlane.xlu1 %4576  ;;  %v4574_v18 = vpop.xlane.xlu0 %4573 }
 0x482   : > { %v5009_v26 = vrot.slane %v4577_v50, %v8247_v5  ;;  %v5005_v16 = vrot.slane %v4574_v18, %v8245_v38  ;;  %v9766_v31 = vsel %vm3073_vm8, %v4424_v40, %v4453_v13 }
 0x484   : > { %v5010_v54 = vsel %vm2928_vm1, %v5009_v26, %v5005_v16 }
 0x485   : > { %v5048_v28 = vsel %vm3071_vm7, %v5010_v54, %v9641_v47  ;;  %v4710_v48 = vpop.xlane.xlu1 %4709  ;;  %v4707_v37 = vpop.xlane.xlu0 %4706 }
 0x486   : > { %v5201_v51 = vrot.slane %v4710_v48, %v8270_v55  ;;  %v5197_v41 = vrot.slane %v4707_v37, %v8266_v27  ;;  %v9775_v22 = vsel %vm3073_vm8, %v9706_v12, %v5048_v28 }
 0x488   : > { %v5202_v58 = vsel %vm3130_vm2, %v5201_v51, %v5197_v41 }
 0x489   : > { %v5240_v40 = vsel %vm3071_vm7, %v5202_v58, %v9662_v10  ;;  %v4843_v44 = vpop.xlane.xlu1 %4842  ;;  %v4840_v49 = vpop.xlane.xlu0 %4839 }
 0x48a   : > { %v5393_v63 = vrot.slane %v4843_v44, %v8285_v1  ;;  %v5389_v47 = vrot.slane %v4840_v49, %v8282_v21  ;;  %v9784_v14 = vsel %vm3073_vm8, %v9711_v46, %v5240_v40 }
 0x48c   : > { %v5394_v33 = vsel %vm3325_vm3, %v5393_v63, %v5389_v47 }
 0x48d   : > { %v5432_v12 = vsel %vm3071_vm7, %v5394_v33, %v9677_v61  ;;  %v2618_v59 = vpop.xlane.xlu1 %2617  ;;  %v2615_v62 = vpop.xlane.xlu0 %2614 }
 0x48e   : > { %v9791_v10 = vsel %vm3073_vm8, %v9716_v32, %v5432_v12  ;;  %v3063_v53 = vrot.slane %v2618_v59, %v8247_v5  ;;  %v3059_v45 = vrot.slane %v2615_v62, %v8245_v38 }
 0x490   : > { %v3064_v54 = vsel %vm2928_vm1, %v3063_v53, %v3059_v45 }
 0x491   : > { %v2751_v36 = vpop.xlane.xlu1 %2750  ;;  %v2748_v17 = vpop.xlane.xlu0 %2747 }
 0x492   : > { %v3265_v43 = vrot.slane %v2751_v36, %v8270_v55  ;;  %v3261_v25 = vrot.slane %v2748_v17, %v8266_v27 }
 0x494   : > { %v3266_v48 = vsel %vm3130_vm2, %v3265_v43, %v3261_v25 }
 0x495   : > { %v2884_v9 = vpop.xlane.xlu1 %2883  ;;  %v2881_v52 = vpop.xlane.xlu0 %2880 }
 0x496   : > { %v3460_v37 = vrot.slane %v2884_v9, %v8285_v1  ;;  %v3456_v51 = vrot.slane %v2881_v52, %v8282_v21 }
 0x498   : > { %v3461_v12 = vsel %vm3325_vm3, %v3460_v37, %v3456_v51 }
 0x499   : > { %v3616_v2 = vpop.xlane.xlu1 %3615  ;;  %v3613_v3 = vpop.xlane.xlu0 %3612 }
 0x49d   : > { %v3749_v0 = vpop.xlane.xlu1 %3748  ;;  %v3746_v46 = vpop.xlane.xlu0 %3745 }
 0x49e   : > { %v4245_v53 = vrot.slane %v3746_v46, %v8266_v27 }
 0x4a1   : > { %v9793_v35 = vpop.xlane.xlu1 %3881  ;;  %v9795_v39 = vpop.xlane.xlu0 %3878 }
 0x4a2   : > { %v4441_v46 = vrot.slane %v9793_v35, %v8285_v1 }
 0x4a5   : > { %v9797_v57 = vpop.xlane.xlu1 %4594  ;;  %v9799_v61 = vpop.xlane.xlu0 %4591 }
 0x4a9   : > { %v9801_v34 = vpop.xlane.xlu1 %4727  ;;  %v9803_v32 = vpop.xlane.xlu0 %4724 }
 0x4ad   : > { %v2612_v24 = vpop.xlane.xlu1 %2611  ;;  %v2609_v56 = vpop.xlane.xlu0 %2608 }
 0x4ae   : > { %v3054_v7 = vrot.slane %v2612_v24, %v8247_v5  ;;  %v3050_v42 = vrot.slane %v2609_v56, %v8245_v38  ;;  %v4057_v24 = vrot.slane %v3616_v2, %v8247_v5  ;;  %v4053_v56 = vrot.slane %v3613_v3, %v8245_v38 }
 0x4b0   : > { %v3055_v23 = vsel %vm2928_vm1, %v3054_v7, %v3050_v42 }
 0x4b1   : > { %v2745_v13 = vpop.xlane.xlu1 %2744  ;;  %v2742_v50 = vpop.xlane.xlu0 %2741  ;;  %v3084_v16 = vsel %vm3075_vm9, %v3055_v23, %v9726_v30 }
 0x4b2   : > { %v3256_v18 = vrot.slane %v2745_v13, %v8270_v55  ;;  %v3252_v26 = vrot.slane %v2742_v50, %v8266_v27  ;;  %v3085_v44 = vsel %vm3077_vm10, %v3064_v54, %v3084_v16  ;;  %v4437_v13 = vrot.slane %v9795_v39, %v8282_v21 }
 0x4b4   : > { %v3257_v28 = vsel %vm3130_vm2, %v3256_v18, %v3252_v26  ;;  %v4442_v37 = vsel %vm3325_vm3, %v4441_v46, %v4437_v13 }
 0x4b5   : > { %v3279_v41 = vsel %vm3075_vm9, %v3257_v28, %v9734_v6  ;;  %v2878_v58 = vpop.xlane.xlu1 %2877  ;;  %v2875_v40 = vpop.xlane.xlu0 %2874 }
 0x4b6   : > { %v3280_v49 = vsel %vm3077_vm10, %v3266_v48, %v3279_v41  ;;  %v3451_v30 = vrot.slane %v2878_v58, %v8285_v1  ;;  %v3447_v63 = vrot.slane %v2875_v40, %v8282_v21 }
 0x4b7   : > { %v3480_v47 = vsel %vm3478_vm11, %v3085_v44, %v3280_v49 }
 0x4b8   : > { %v3452_v33 = vsel %vm3325_vm3, %v3451_v30, %v3447_v63  ;;  %v5036_v63 = vrot.slane %v9797_v57, %v8247_v5 }
 0x4b9   : > { %v3474_v59 = vsel %vm3075_vm9, %v3452_v33, %v9742_v60  ;;  %v3610_v6 = vpop.xlane.xlu1 %3609  ;;  %v3607_v62 = vpop.xlane.xlu0 %3606  ;;  %v4249_v60 = vrot.slane %v3749_v0, %v8270_v55  ;;  %v5224_v33 = vrot.slane %v9803_v32, %v8266_v27 }
 0x4ba   : > { %v3475_v36 = vsel %vm3077_vm10, %v3461_v12, %v3474_v59  ;;  %v4048_v17 = vrot.slane %v3610_v6, %v8247_v5  ;;  %v4044_v9 = vrot.slane %v3607_v62, %v8245_v38 }
 0x4bb   : > { %v3483_v52 = vsel %vm3481_vm12, %v3480_v47, %v3475_v36  ;;  %v4250_v0 = vsel %vm3130_vm2, %v4249_v60, %v4245_v53  ;;  %v5228_v47 = vrot.slane %v9801_v34, %v8270_v55 }
 0x4bc   : > { %v4049_v7 = vsel %vm2928_vm1, %v4048_v17, %v4044_v9  ;;  %v5442_v42 = vpack.c.bf16 %v3483_v52, %v9133_v29  ;;  %v4058_v29 = vsel %vm2928_vm1, %v4057_v24, %v4053_v56 }
 0x4bd   : > { %v3743_v45 = vpop.xlane.xlu1 %3742  ;;  %v3740_v23 = vpop.xlane.xlu0 %3739  ;;  %v4071_v2 = vsel %vm3075_vm9, %v4049_v7, %v9750_v19  ;;  %v5229_v57 = vsel %vm3130_vm2, %v5228_v47, %v5224_v33 }
 0x4be   : > { %v4240_v43 = vrot.slane %v3743_v45, %v8270_v55  ;;  %v4236_v25 = vrot.slane %v3740_v23, %v8266_v27  ;;  %6515 = vmatmul.mubr.msk.bf16.vlgmr.msra.gmra.mrb[132].mxu0 %vm5469_vm14, %v5442_v42  ;;  %v4072_v26 = vsel %vm3077_vm10, %v4058_v29, %v4071_v2 }
 0x4bf   : > { %6518 = vmatprep.mubr.msk.bf16.mxu0 %vm7009_vm13, %v7008_v11 }
 0x4c0   : > { %v4241_v3 = vsel %vm3130_vm2, %v4240_v43, %v4236_v25 }
 0x4c1   : > { %v4263_v50 = vsel %vm3075_vm9, %v4241_v3, %v9758_v15  ;;  %v3876_v18 = vpop.xlane.xlu1 %3875  ;;  %v3873_v19 = vpop.xlane.xlu0 %3872 }
 0x4c2   : > { %v4264_v16 = vsel %vm3077_vm10, %v4250_v0, %v4263_v50  ;;  %v4432_v54 = vrot.slane %v3876_v18, %v8285_v1  ;;  %v4428_v28 = vrot.slane %v3873_v19, %v8282_v21 }
 0x4c3   : > { %v4460_v48 = vsel %vm3478_vm11, %v4072_v26, %v4264_v16 }
 0x4c4   : > { %v4433_v35 = vsel %vm3325_vm3, %v4432_v54, %v4428_v28 }
 0x4c5   : > { %v4455_v39 = vsel %vm3075_vm9, %v4433_v35, %v9766_v31  ;;  %v4589_v15 = vpop.xlane.xlu1 %4588  ;;  %v4586_v51 = vpop.xlane.xlu0 %4585  ;;  %v5032_v31 = vrot.slane %v9799_v61, %v8245_v38 }
 0x4c6   : > { %v4456_v41 = vsel %vm3077_vm10, %v4442_v37, %v4455_v39  ;;  %v5027_v58 = vrot.slane %v4589_v15, %v8247_v5  ;;  %v5023_v40 = vrot.slane %v4586_v51, %v8245_v38 }
 0x4c7   : > { %v4462_v44 = vsel %vm3481_vm12, %v4460_v48, %v4456_v41 }
 0x4c8   : > { %v5028_v49 = vsel %vm2928_vm1, %v5027_v58, %v5023_v40  ;;  %v5443_v30 = vpack.c.bf16 %v4462_v44, %v9186_v20  ;;  %v5037_v20 = vsel %vm2928_vm1, %v5036_v63, %v5032_v31  ;;  %v6923_v58 = vld [vmem:[%s10024_s4 + $0x8] sm:$0xff]   ;;  %v6924_v40 = vld [vmem:[%s10024_s4 + $0x10] sm:$0xff]   ;;  %v6925_v44 = vld [vmem:[%s10024_s4 + $0x18] sm:$0xff]  }
 0x4c9   : > { %v4722_v12 = vpop.xlane.xlu1 %4721  ;;  %v4719_v59 = vpop.xlane.xlu0 %4718  ;;  %v5050_v5 = vsel %vm3075_vm9, %v5028_v49, %v9775_v22  ;;  %v5549_v49 = vld [vmem:[%s10025_s5 + $0x10] sm:$0xff]  ;;  %v5550_v31 = vld [vmem:[%s10025_s5 + $0x18] sm:$0xff] }
 0x4ca   : > { %v5219_v6 = vrot.slane %v4722_v12, %v8270_v55  ;;  %v5215_v62 = vrot.slane %v4719_v59, %v8266_v27  ;;  %6519 = vmatmul.mubr.msk.bf16.gmra.mrb[136].mxu0 %vm5469_vm14, %v5443_v30  ;;  %v5051_v27 = vsel %vm3077_vm10, %v5037_v20, %v5050_v5  ;;  %v5547_v30 = vld [vmem:[%s10025_s5] sm:$0xff]  ;;  %v5548_v12 = vld [vmem:[%s10025_s5 + $0x8] sm:$0xff]  ;;  %v5553_v20 = vld [vmem:[%s10025_s5 + $0x30] sm:$0xff] }
 0x4cb   : > { %6522 = vmatprep.mubr.msk.bf16.mxu0 %vm7009_vm13, %v7008_v11 }
 0x4cc   : > { %v5220_v38 = vsel %vm3130_vm2, %v5219_v6, %v5215_v62 }
 0x4cd   : > { %v5242_v61 = vsel %vm3075_vm9, %v5220_v38, %v9784_v14  ;;  %v4807_v55 = vpop.xlane.xlu1 %4806  ;;  %v4804_v34 = vpop.xlane.xlu0 %4803 }
 0x4ce   : > { %v5243_v32 = vsel %vm3077_vm10, %v5229_v57, %v5242_v61  ;;  %v5339_v36 = vrot.slane %v4807_v55, %v8285_v1  ;;  %v5335_v11 = vrot.slane %v4804_v34, %v8282_v21  ;;  %v5551_v57 = vld [vmem:[%s10025_s5 + $0x20] sm:$0xff]  ;;  %v5554_v55 = vld [vmem:[%s10025_s5 + $0x38] sm:$0xff] }
 0x4cf   : > { %v5439_v22 = vsel %vm3478_vm11, %v5051_v27, %v5243_v32  ;;  %v5552_v32 = vld [vmem:[%s10025_s5 + $0x28] sm:$0xff] }
 0x4d0   : > { %v5340_v52 = vsel %vm3325_vm3, %v5339_v36, %v5335_v11 }
 0x4d1   : > { %v4855_v17 = vpop.xlane.xlu1 %4854  ;;  %v4852_v9 = vpop.xlane.xlu0 %4851  ;;  %v5427_v53 = vsel %vm3075_vm9, %v5340_v52, %v8996_v8 }
 0x4d2   : > { %v5411_v24 = vrot.slane %v4855_v17, %v8285_v1  ;;  %v5407_v14 = vrot.slane %v4852_v9, %v8282_v21 }
 0x4d4   : > { %v5412_v23 = vsel %vm3325_vm3, %v5411_v24, %v5407_v14 }
 0x4d5   : > { %v4813_v56 = vpop.xlane.xlu1 %4812  ;;  %v4810_v7 = vpop.xlane.xlu0 %4809  ;;  %v5434_v46 = vsel %vm3075_vm9, %v5412_v23, %v9791_v10 }
 0x4d6   : > { %v5348_v42 = vrot.slane %v4813_v56, %v8285_v1  ;;  %v5344_v60 = vrot.slane %v4810_v7, %v8282_v21 }
 0x4d8   : > { %v5349_v45 = vsel %vm3325_vm3, %v5348_v42, %v5344_v60 }
 0x4d9   : > { %v5428_v43 = vsel %vm3077_vm10, %v5349_v45, %v5427_v53  ;;  %v4861_v25 = vpop.xlane.xlu1 %4860  ;;  %v4858_v2 = vpop.xlane.xlu0 %4857 }
 0x4da   : > { %v5420_v29 = vrot.slane %v4861_v25, %v8285_v1  ;;  %v5416_v3 = vrot.slane %v4858_v2, %v8282_v21  ;;  %v5440_v0 = vsel %vm3481_vm12, %v9221_v4, %v5428_v43  ;;  %v6922_v1 = vld [vmem:[%s10024_s4] sm:$0xff]  }
 0x4dc   : > { %v5421_v8 = vsel %vm3325_vm3, %v5420_v29, %v5416_v3 }
 0x4dd   : > { %v5435_v13 = vsel %vm3077_vm10, %v5421_v8, %v5434_v46 }
 0x4de   : > { %v5441_v50 = vsel %vm3481_vm12, %v5439_v22, %v5435_v13 }
 0x4df   : > { %v5444_v18 = vpack.c.bf16 %v5441_v50, %v5440_v0 }
 0x4e1   : > { %6523 = vmatmul.mubr.msk.bf16.gmra.mrb[140].mxu0 %vm5469_vm14, %v5444_v18 }
 0x4e2   : > { %6532 = vmatprep.mubr.msk.bf16.mxu0 %vm5469_vm14, %v6922_v1 }
 0x591   : > { %v5513_v21 = vpop.f32.mrb[132].mxu0 }
 0x592   : > { %v6516_v4 = vpop.f32.mrb[133].mxu0 }
 0x593   : > { %v5516_v19 = vpop.f32.mrb[134].mxu0 }
 0x594   : > { %v5544_v26 = vpack.c.bf16 %v5516_v19, %v5513_v21  ;;  %v6517_v10 = vpop.f32.mrb[135].mxu0 }
 0x596   : > { %6526 = vmatprep.subr.bf16.mxu0 %v5544_v26 }
 0x597   : > { %6527 = vmatpush3.bf16.msra.mxu0 %v5544_v26 }
 0x59d   : > { %v5521_v16 = vpop.f32.mrb[136].mxu0 }
 0x59e   : > { %v6520_v54 = vpop.f32.mrb[137].mxu0 }
 0x59f   : > { %v5524_v28 = vpop.f32.mrb[138].mxu0 }
 0x5a0   : > { %v5545_v48 = vpack.c.bf16 %v5524_v28, %v5521_v16  ;;  %v6521_v35 = vpop.f32.mrb[139].mxu0 }
 0x5a2   : > { %6528 = vmatprep.subr.bf16.mxu0 %v5545_v48 }
 0x5a3   : > { %6529 = vmatpush3.bf16.msra.mxu0 %v5545_v48 }
 0x5b4   : > { %v5529_v37 = vpop.f32.mrb[140].mxu0 }
 0x5b5   : > { %v6524_v39 = vpop.f32.mrb[141].mxu0 }
 0x5b6   : > { %v5532_v15 = vpop.f32.mrb[142].mxu0 }
 0x5b7   : > { %v5546_v51 = vpack.c.bf16 %v5532_v15, %v5529_v37  ;;  %v6525_v41 = vpop.f32.mrb[143].mxu0 }
 0x5b9   : > { %6530 = vmatprep.subr.bf16.mxu0 %v5546_v51 }
 0x5ba   : > { %6531 = vmatpush3.bf16.msra.mxu0 %v5546_v51 }
 0x5bd   : > { %6533 = vmatmul.mubr.msk.bf16.vlgmr.msra.gmra.mrb[144].mxu0 %vm5469_vm14, %v6923_v58 }
 0x5be   : > { %6536 = vmatprep.mubr.msk.bf16.mxu0 %vm5469_vm14, %v6924_v40 }
 0x5c5   : > { %6537 = vmatmul.mubr.msk.bf16.gmra.mrb[148].mxu0 %vm5469_vm14, %v6925_v44 }
 0x690   : > { %v6534_v63 = vpop.f32.mrb[144].mxu0 }
 0x691   : > { %v5630_v47 = vadd.f32 %v6534_v63, %v5549_v49  ;;  %v5621_v33 = vpop.f32.mrb[145].mxu0 }
 0x692   : > { %v5622_v59 = vadd.f32 %v5621_v33, %v5547_v30  ;;  %v6535_v6 = vpop.f32.mrb[146].mxu0 }
 0x693   : > { %5655 = vst.msk [vmem:[%s244_s17 + $0x10] sm:$0xff] %vm5652_vm15, %v5630_v47  ;;  %v5633_v62 = vadd.f32 %v6535_v6, %v5550_v31  ;;  %v5624_v5 = vpop.f32.mrb[147].mxu0 }
 0x694   : > { %5653 = vst.msk [vmem:[%s244_s17] sm:$0xff] %vm5652_vm15, %v5622_v59  ;;  %v5625_v38 = vadd.f32 %v5624_v5, %v5548_v12 }
 0x695   : > { %5656 = vst.msk [vmem:[%s244_s17 + $0x18] sm:$0xff] %vm5652_vm15, %v5633_v62 }
 0x696   : > { %5654 = vst.msk [vmem:[%s244_s17 + $0x8] sm:$0xff] %vm5652_vm15, %v5625_v38 }
 0x698   : > { %v6538_v61 = vpop.f32.mrb[148].mxu0 }
 0x699   : > { %v5646_v34 = vadd.f32 %v6538_v61, %v5553_v20  ;;  %v5637_v27 = vpop.f32.mrb[149].mxu0 }
 0x69a   : > { %v5638_v22 = vadd.f32 %v5637_v27, %v5551_v57  ;;  %v6539_v36 = vpop.f32.mrb[150].mxu0 }
 0x69b   : > { %5659 = vst.msk [vmem:[%s244_s17 + $0x30] sm:$0xff] %vm5652_vm15, %v5646_v34  ;;  %v5649_v11 = vadd.f32 %v6539_v36, %v5554_v55  ;;  %v5640_v17 = vpop.f32.mrb[151].mxu0 }
 0x69c   : > { %5657 = vst.msk [vmem:[%s244_s17 + $0x20] sm:$0xff] %vm5652_vm15, %v5638_v22  ;;  %v5641_v9 = vadd.f32 %v5640_v17, %v5552_v32 }
 0x69d   : > { %5660 = vst.msk [vmem:[%s244_s17 + $0x38] sm:$0xff] %vm5652_vm15, %v5649_v11 }
 0x69e   : > { %5658 = vst.msk [vmem:[%s244_s17 + $0x28] sm:$0xff] %vm5652_vm15, %v5641_v9 }
 0x69f   : > { %6957 = shalt.err (!%p6954_p3)
}
 0x6a0   : > { %s6958_s29 = scalar_lea.hbm %s9970_s16, 1024  ;;  %s6962_s9 = scalar_lea.hbm %s10026_s6, 2048 }
 0x6a1   : > { %p6959_p4 = scmp.ne.s32.totalorder %s9970_s16, %s6958_s29  ;;  %p6963_p9 = scmp.lt.u32.totalorder %s9970_s16, %s10026_s6 }
 0x6a2   : > { %p6964_p10 = scmp.lt.u32.totalorder %s6962_s9, %s6958_s29  ;;  %p6966_p12 = scmp.lt.u32.totalorder %s6958_s29, %s9970_s16 }
 0x6a3   : > { %p6960_p7 = pnand %p6959_p4, %p7086_p5 }
 0x6a4   : > { %p6965_p11 = por %p6964_p10, %p6963_p9 }
 0x6a5   : > { %p6961_p8 = pneg %p6960_p7 }
 0x6a6   : > { %p6967_p13 = por %p6966_p12, %p6965_p11 }
 0x6a8   : > { %p6968_p0 = pnand %p6967_p13, %p6961_p8 }
 0x6aa   : > { %6971 = shalt.err (!%p6968_p0)
}
 0x6ab   : > { %s7011_s15 = smov 128   ;;  %s7012_s10 = smov 8  }
 0x6ac   : > { %6717 = dma.vmem_to_hbm [thread:$0]  (%p7086_p5), %s9972_s12, 1024, %s9970_s16, %s9979_s25, %s7011_s15, %s7011_s15, %s7012_s10  }
 0x6ad PF: > { %p6723_p1 = scmp.ge.s32.totalorder %s7006_s24, 2  ;;  %s5690_s14 = sand.u32 1, %s6994_s21  }
 0x6ae   : > { %s5691_s18 = scalar_lea.sflag [#allocation3], %s5690_s14 }
 0x6af   : > { %p6720_p2 = pnand %p6723_p1, %p7090_p6 }
 0x6b1   : > { %6989 = dma.done.wait (!%p6720_p2), %s5691_s18, 1024  }
 0x6b2   : > { %6991 = vsyncadd (!%p6720_p2), %s5691_s18, 4294966272  ;;  %p16_p3 = scmp.ge.s32.totalorder %s7073_s27, 4   ;;  %s10041_s21 = smov %s6998_s22 }
 0x6b3   : > { %s10042_s22 = smov %s7002_s23  ;;  %s10043_s23 = smov %s7084_s30 }
 0x6b4   : > { %s10044_s24 = smov %s7073_s27  ;;  %18 = sbr.rel (!%p16_p3) target bundleno = 3 (0x3), region = 79 }
 0x6bb   :  { %5696 = vsyncpa [#allocation3], 1 }
 0x6bc   :  { %5698 = vsyncpa [#allocation3 + $0x1], 1 }

</bundles_post_ra>
